<compile_context>
chip_gen: v7x
topology: tpu7x:2x2x1
jax: 0.10.0
libtpu: 0.0.40
codegen_flags: <defaults>
</compile_context>

<pallas_src>
import functools

import jax
import jax.numpy as jnp
from jax.experimental import pallas as pl
from jax.experimental.pallas import tpu as pltpu


def _round_up(x, m):
    return (x + m - 1) // m * m


# ----------------------------------------------------------------------------
# Fused kernel: embedding gather + num_layers LSTM, single invocation
# ----------------------------------------------------------------------------
def _backbone_kernel(ids_ref, proj0_ref, w_ih_ref, w_hh_ref, b_ref, out_ref,
                     xproj, act, *, T, B_pad, H_pad, num_layers, V_pad):
    """
    ids_ref   : (T*B_pad, 1) int32       time-major flattened token ids
    proj0_ref : (V_pad, 4*H_pad) f32     embedding_table @ W_ih0^T + b0 (layer-0 fold)
    w_ih_ref  : (L1, H_pad, 4*H_pad) f32 input-projection weights, layers 1..L-1 (L1=max(L-1,1))
    w_hh_ref  : (L,  H_pad, 4*H_pad) f32 recurrent weights, all layers
    b_ref     : (L1, 1, 4*H_pad) f32     folded biases, layers 1..L-1
    out_ref   : (T, B_pad, H_pad) f32    last-layer hidden states (time-major)
    xproj     : VMEM (T, B_pad, 4*H_pad) per-layer input-projection slab (scratch)
    act       : VMEM (T, B_pad, H_pad)   inter-layer activation slab (scratch)
    """
    N = T * B_pad
    G = 4 * H_pad

    # ---- Layer 0 input projection for ALL timesteps: fused embedding gather via a
    #      one-hot matmul against the folded table (V is tiny, table is VMEM-resident).
    ids = ids_ref[...]                                                    # (N, 1) int32
    onehot = (jax.lax.broadcasted_iota(jnp.int32, (N, V_pad), 1) == ids
              ).astype(jnp.float32)                                       # (N, V_pad)
    gx0 = jnp.dot(onehot, proj0_ref[...], preferred_element_type=jnp.float32)
    xproj[...] = gx0.reshape(T, B_pad, G)

    def run_layer(layer, dst):
        # Serial recurrence: only the small (B_pad, H_pad) x (H_pad, 4H_pad) matmul and the
        # elementwise gate math remain per step. T is small & static -> full unroll, so h/c
        # stay in vregs (no per-step VMEM carry traffic). For long T switch to lax.fori_loop.
        h = jnp.zeros((B_pad, H_pad), jnp.float32)
        c = jnp.zeros((B_pad, H_pad), jnp.float32)
        w_hh = w_hh_ref[layer]                                            # (H_pad, G)
        for t in range(T):
            gates = xproj[t] + jnp.dot(h, w_hh, preferred_element_type=jnp.float32)
            # H_pad is a multiple of 128 -> every gate slice is a lane-aligned 128-wide slab.
            i = jax.nn.sigmoid(gates[:, 0 * H_pad:1 * H_pad])
            f = jax.nn.sigmoid(gates[:, 1 * H_pad:2 * H_pad])
            g = jnp.tanh(gates[:, 2 * H_pad:3 * H_pad])
            o = jax.nn.sigmoid(gates[:, 3 * H_pad:4 * H_pad])
            c = f * c + i * g
            h = o * jnp.tanh(c)
            dst[t] = h

    last = num_layers - 1
    run_layer(0, act if last > 0 else out_ref)

    for layer in range(1, num_layers):
        # Time-parallel input projection for this layer, hoisted out of the recurrence:
        # one (N, H_pad) x (H_pad, 4H_pad) matmul over the whole sequence (+ folded bias).
        a = act[...].reshape(N, H_pad)
        gx = jnp.dot(a, w_ih_ref[layer - 1],
                     preferred_element_type=jnp.float32) + b_ref[layer - 1]
        xproj[...] = gx.reshape(T, B_pad, G)
        run_layer(layer, act if layer < last else out_ref)


# ----------------------------------------------------------------------------
# Parameter preparation (one-time): pad H to 128 lanes, fold embedding + biases
# ----------------------------------------------------------------------------
def prepare_backbone_params(embedding_table, torch_lstm_params, hidden_dim):
    """torch_lstm_params: per layer (w_ih (4H, IN), w_hh (4H, H), b_ih (4H,), b_hh (4H,)),
    torch.nn.LSTM layout, gate order (i, f, g, o)."""
    V, E = embedding_table.shape
    H = hidden_dim
    H_pad = _round_up(H, 128)
    G = 4 * H_pad
    num_layers = len(torch_lstm_params)

    def pad_gates(w_ih, w_hh, b_ih, b_hh, in_dim, in_pad):
        w_ih_p = jnp.zeros((in_pad, G), jnp.float32)
        w_hh_p = jnp.zeros((H_pad, G), jnp.float32)
        b_p = jnp.zeros((G,), jnp.float32)
        for g in range(4):
            w_ih_p = w_ih_p.at[:in_dim, g * H_pad:g * H_pad + H].set(
                w_ih[g * H:(g + 1) * H, :].T)
            w_hh_p = w_hh_p.at[:H, g * H_pad:g * H_pad + H].set(
                w_hh[g * H:(g + 1) * H, :].T)
            b_p = b_p.at[g * H_pad:g * H_pad + H].set(
                b_ih[g * H:(g + 1) * H] + b_hh[g * H:(g + 1) * H])
        return w_ih_p, w_hh_p, b_p
        # Padded gate columns are zero-weight/zero-bias, so padded hidden cells stay exactly
        # zero through the recurrence (sigmoid(0)*tanh(0) = 0) and never affect real units.

    # Layer 0: fold the frozen embedding into the input projection.
    w_ih0_p, w_hh0_p, b0_p = pad_gates(*torch_lstm_params[0], E, E)
    V_pad = _round_up(V, 128)     # lane-dense one-hot operand
    proj0 = embedding_table.astype(jnp.float32) @ w_ih0_p + b0_p          # (V, G)
    proj0 = jnp.pad(proj0, ((0, V_pad - V), (0, 0)))

    w_hh_all = [w_hh0_p]
    w_ih_rest, b_rest = [], []
    for layer in range(1, num_layers):
        w_ih_p, w_hh_p, b_p = pad_gates(*torch_lstm_params[layer], H, H_pad)
        w_ih_rest.append(w_ih_p)
        w_hh_all.append(w_hh_p)
        b_rest.append(b_p.reshape(1, G))
    if num_layers == 1:  # dummies (never read by the kernel)
        w_ih_rest.append(jnp.zeros((H_pad, G), jnp.float32))
        b_rest.append(jnp.zeros((1, G), jnp.float32))

    return (proj0, jnp.stack(w_ih_rest), jnp.stack(w_hh_all), jnp.stack(b_rest))


# ----------------------------------------------------------------------------
# Forward wrapper
# ----------------------------------------------------------------------------
@functools.partial(jax.jit, static_argnames=("hidden_dim",))
def backbone_forward(token_ids, params, hidden_dim):
    proj0, w_ih_rest, w_hh_all, b_rest = params
    B, T = token_ids.shape
    num_layers, H_pad, G = w_hh_all.shape
    V_pad = proj0.shape[0]
    B_pad = _round_up(B, 8)       # fill the sublanes / MXU rows
    N = T * B_pad

    ids = jnp.pad(token_ids.astype(jnp.int32), ((0, B_pad - B), (0, 0)))
    ids = jnp.transpose(ids, (1, 0)).reshape(N, 1)          # tiny int32 -> time-major

    kernel = functools.partial(_backbone_kernel, T=T, B_pad=B_pad, H_pad=H_pad,
                               num_layers=num_layers, V_pad=V_pad)

    out_tm = pl.pallas_call(
        kernel,
        out_shape=jax.ShapeDtypeStruct((T, B_pad, H_pad), jnp.float32),
        grid=(1,),
        in_specs=[
            pl.BlockSpec((N, 1), lambda i: (0, 0)),
            pl.BlockSpec((V_pad, G), lambda i: (0, 0)),
            pl.BlockSpec((w_ih_rest.shape[0], H_pad, G), lambda i: (0, 0, 0)),
            pl.BlockSpec((num_layers, H_pad, G), lambda i: (0, 0, 0)),
            pl.BlockSpec((b_rest.shape[0], 1, G), lambda i: (0, 0, 0)),
        ],
        out_specs=pl.BlockSpec((T, B_pad, H_pad), lambda i: (0, 0, 0)),
        scratch_shapes=[
            pltpu.VMEM((T, B_pad, G), jnp.float32),      # per-layer X @ W_ih slab
            pltpu.VMEM((T, B_pad, H_pad), jnp.float32),  # inter-layer activations
        ],
        compiler_params=pltpu.CompilerParams(
            dimension_semantics=("arbitrary",),
            vmem_limit_bytes=32 * 1024 * 1024,           # explicit budget (safe on v7x's 64 MiB)
        ),
    )(ids, proj0, w_ih_rest, w_hh_all, b_rest)

    # Tiny (~32 KB) layout fix-up back to batch_first + strip the pads.
    return jnp.transpose(out_tm, (1, 0, 2))[:B, :, :hidden_dim]


# ----------------------------------------------------------------------------
# Pure-JAX reference (matches torch.nn.LSTM with batch_first=True, zero init)
# ----------------------------------------------------------------------------
def backbone_reference(token_ids, embedding_table, torch_lstm_params, hidden_dim):
    x = jnp.take(embedding_table, token_ids, axis=0)        # (B, T, E)
    H = hidden_dim
    for (w_ih, w_hh, b_ih, b_hh) in torch_lstm_params:
        B = x.shape[0]
        w_ih_t, w_hh_t, b = w_ih.T, w_hh.T, b_ih + b_hh

        def step(carry, x_t, w_ih_t=w_ih_t, w_hh_t=w_hh_t, b=b):
            h, c = carry
            gates = x_t @ w_ih_t + h @ w_hh_t + b
            i = jax.nn.sigmoid(gates[:, 0 * H:1 * H])
            f = jax.nn.sigmoid(gates[:, 1 * H:2 * H])
            g = jnp.tanh(gates[:, 2 * H:3 * H])
            o = jax.nn.sigmoid(gates[:, 3 * H:4 * H])
            c = f * c + i * g
            h = o * jnp.tanh(c)
            return (h, c), h

        x_tm = jnp.transpose(x, (1, 0, 2))
        init = (jnp.zeros((B, H), jnp.float32), jnp.zeros((B, H), jnp.float32))
        _, hs = jax.lax.scan(step, init, x_tm)
        x = jnp.transpose(hs, (1, 0, 2))
    return x


if __name__ == "__main__":
    vocab_size = 50
    embedding_dim = 250        # fixed by the original script
    hidden_dim = 32
    num_layers = 2
    batch = 2
    seq_len = 8

    key = jax.random.PRNGKey(0)
    k_emb, k_ids, *k_w = jax.random.split(key, 2 + 4 * num_layers)

    # Frozen embedding table (fix_embedding=True in the module).
    embedding_table = jax.random.normal(k_emb, (vocab_size, embedding_dim), jnp.float32)
    token_ids = jax.random.randint(k_ids, (batch, seq_len), 0, vocab_size, jnp.int32)

    # PyTorch-style uniform(-1/sqrt(H), 1/sqrt(H)) LSTM parameters, gate order (i, f, g, o).
    bound = 1.0 / jnp.sqrt(jnp.float32(hidden_dim))
    torch_lstm_params = []
    for layer in range(num_layers):
        in_features = embedding_dim if layer == 0 else hidden_dim
        kw = k_w[4 * layer: 4 * layer + 4]
        w_ih = jax.random.uniform(kw[0], (4 * hidden_dim, in_features), jnp.float32, -bound, bound)
        w_hh = jax.random.uniform(kw[1], (4 * hidden_dim, hidden_dim), jnp.float32, -bound, bound)
        b_ih = jax.random.uniform(kw[2], (4 * hidden_dim,), jnp.float32, -bound, bound)
        b_hh = jax.random.uniform(kw[3], (4 * hidden_dim,), jnp.float32, -bound, bound)
        torch_lstm_params.append((w_ih, w_hh, b_ih, b_hh))

    params = prepare_backbone_params(embedding_table, torch_lstm_params, hidden_dim)

    out = backbone_forward(token_ids, params, hidden_dim=hidden_dim)
    out = jax.block_until_ready(out)

    ref = backbone_reference(token_ids, embedding_table, torch_lstm_params, hidden_dim)
    assert out.shape == (batch, seq_len, hidden_dim)
    err = float(jnp.max(jnp.abs(out - ref)))
    assert jnp.allclose(out, ref, atol=1e-4, rtol=1e-4), err

    print("KERNEL_OK")
</pallas_src>

<mosaic_0001>
module attributes {stable_mosaic.version = 11 : i64} {
  func.func @_backbone_kernel(%arg0: i32, %arg1: memref<64x1xi32, #tpu.memory_space<vmem>>, %arg2: memref<128x512xf32, #tpu.memory_space<vmem>>, %arg3: memref<1x128x512xf32, #tpu.memory_space<vmem>>, %arg4: memref<2x128x512xf32, #tpu.memory_space<vmem>>, %arg5: memref<1x1x512xf32, #tpu.memory_space<vmem>>, %arg6: memref<8x8x128xf32, #tpu.memory_space<vmem>>, %arg7: memref<8x8x512xf32, #tpu.memory_space<vmem>>, %arg8: memref<8x8x128xf32, #tpu.memory_space<vmem>>) attributes {dimension_semantics = [#tpu.dimension_semantics<arbitrary>], iteration_bounds = array<i64: 1>, scalar_prefetch = 0 : i64, scratch_operands = 2 : i64, tpu.core_type = #tpu.core_type<tc>, window_params = [{pipeline_mode = #tpu.pipeline_mode<synchronous>, transform_indices = @transform_0, window_bounds = array<i64: 64, 1>}, {pipeline_mode = #tpu.pipeline_mode<synchronous>, transform_indices = @transform_1, window_bounds = array<i64: 128, 512>}, {pipeline_mode = #tpu.pipeline_mode<synchronous>, transform_indices = @transform_2, window_bounds = array<i64: 1, 128, 512>}, {pipeline_mode = #tpu.pipeline_mode<synchronous>, transform_indices = @transform_3, window_bounds = array<i64: 2, 128, 512>}, {pipeline_mode = #tpu.pipeline_mode<synchronous>, transform_indices = @transform_4, window_bounds = array<i64: 1, 1, 512>}, {pipeline_mode = #tpu.pipeline_mode<synchronous>, transform_indices = @transform_5, window_bounds = array<i64: 8, 8, 128>}]} {
    %c0 = arith.constant 0 : index
    %c0_0 = arith.constant 0 : index
    %0 = vector.load %arg1[%c0, %c0_0] : memref<64x1xi32, #tpu.memory_space<vmem>>, vector<64x1xi32>
    %1 = tpu.iota {dimensions = array<i32: 1>} : vector<64x128xi32>
    %2 = vector.broadcast %0 : vector<64x1xi32> to vector<64x128xi32>
    %3 = arith.cmpi eq, %1, %2 : vector<64x128xi32>
    %4 = arith.extui %3 : vector<64x128xi1> to vector<64x128xi32>
    %5 = arith.sitofp %4 : vector<64x128xi32> to vector<64x128xf32>
    %c0_1 = arith.constant 0 : index
    %c0_2 = arith.constant 0 : index
    %6 = vector.load %arg2[%c0_1, %c0_2] : memref<128x512xf32, #tpu.memory_space<vmem>>, vector<128x512xf32>
    %cst = arith.constant dense<0.000000e+00> : vector<64x512xf32>
    %7 = tpu.matmul %5, %6, %cst {dimension_numbers = #tpu.dot_dimension_numbers<[1], [0], [0], [1], [0, 0, 1, 1], [], []>} : vector<64x128xf32>, vector<128x512xf32>, vector<64x512xf32> -> vector<64x512xf32>
    %8 = vector.shape_cast %7 : vector<64x512xf32> to vector<8x8x512xf32>
    %c0_3 = arith.constant 0 : index
    %c0_4 = arith.constant 0 : index
    %c0_5 = arith.constant 0 : index
    %9 = vector.load %arg7[%c0_3, %c0_4, %c0_5] : memref<8x8x512xf32, #tpu.memory_space<vmem>>, vector<8x8x512xf32>
    tpu.vector_store %arg7[%c0_3, %c0_4, %c0_5], %8 {strides = array<i32>} : memref<8x8x512xf32, #tpu.memory_space<vmem>>, vector<8x8x512xf32>,
    %cst_6 = arith.constant 0.000000e+00 : f32
    %10 = vector.broadcast %cst_6 : f32 to vector<8x128xf32>
    %cst_7 = arith.constant 0.000000e+00 : f32
    %11 = vector.broadcast %cst_7 : f32 to vector<8x128xf32>
    %c0_8 = arith.constant 0 : index
    %c0_9 = arith.constant 0 : index
    %c0_10 = arith.constant 0 : index
    %12 = vector.load %arg4[%c0_8, %c0_9, %c0_10] : memref<2x128x512xf32, #tpu.memory_space<vmem>>, vector<1x128x512xf32>
    %13 = vector.shape_cast %12 : vector<1x128x512xf32> to vector<128x512xf32>
    %c0_11 = arith.constant 0 : index
    %c0_12 = arith.constant 0 : index
    %c0_13 = arith.constant 0 : index
    %14 = vector.load %arg7[%c0_11, %c0_12, %c0_13] : memref<8x8x512xf32, #tpu.memory_space<vmem>>, vector<1x8x512xf32>
    %15 = vector.shape_cast %14 : vector<1x8x512xf32> to vector<8x512xf32>
    %cst_14 = arith.constant dense<0.000000e+00> : vector<8x512xf32>
    %16 = tpu.matmul %10, %13, %cst_14 {dimension_numbers = #tpu.dot_dimension_numbers<[1], [0], [0], [1], [0, 0, 1, 1], [], []>} : vector<8x128xf32>, vector<128x512xf32>, vector<8x512xf32> -> vector<8x512xf32>
    %17 = arith.addf %15, %16 : vector<8x512xf32>
    %18 = vector.extract_strided_slice %17 {offsets = [0, 0], sizes = [8, 128], strides = [1, 1]} : vector<8x512xf32> to vector<8x128xf32>
    %19 = arith.negf %18 : vector<8x128xf32>
    %20 = math.exp %19 : vector<8x128xf32>
    %cst_15 = arith.constant 1.000000e+00 : f32
    %21 = vector.broadcast %cst_15 : f32 to vector<8x128xf32>
    %22 = arith.addf %21, %20 : vector<8x128xf32>
    %23 = arith.divf %21, %22 : vector<8x128xf32>
    %24 = vector.extract_strided_slice %17 {offsets = [0, 128], sizes = [8, 128], strides = [1, 1]} : vector<8x512xf32> to vector<8x128xf32>
    %25 = arith.negf %24 : vector<8x128xf32>
    %26 = math.exp %25 : vector<8x128xf32>
    %cst_16 = arith.constant 1.000000e+00 : f32
    %27 = vector.broadcast %cst_16 : f32 to vector<8x128xf32>
    %28 = arith.addf %27, %26 : vector<8x128xf32>
    %29 = arith.divf %27, %28 : vector<8x128xf32>
    %30 = vector.extract_strided_slice %17 {offsets = [0, 256], sizes = [8, 128], strides = [1, 1]} : vector<8x512xf32> to vector<8x128xf32>
    %31 = math.tanh %30 : vector<8x128xf32>
    %32 = vector.extract_strided_slice %17 {offsets = [0, 384], sizes = [8, 128], strides = [1, 1]} : vector<8x512xf32> to vector<8x128xf32>
    %33 = arith.negf %32 : vector<8x128xf32>
    %34 = math.exp %33 : vector<8x128xf32>
    %cst_17 = arith.constant 1.000000e+00 : f32
    %35 = vector.broadcast %cst_17 : f32 to vector<8x128xf32>
    %36 = arith.addf %35, %34 : vector<8x128xf32>
    %37 = arith.divf %35, %36 : vector<8x128xf32>
    %38 = arith.mulf %29, %11 : vector<8x128xf32>
    %39 = arith.mulf %23, %31 : vector<8x128xf32>
    %40 = arith.addf %38, %39 : vector<8x128xf32>
    %41 = math.tanh %40 : vector<8x128xf32>
    %42 = arith.mulf %37, %41 : vector<8x128xf32>
    %c0_18 = arith.constant 0 : index
    %c0_19 = arith.constant 0 : index
    %c0_20 = arith.constant 0 : index
    %43 = vector.load %arg8[%c0_18, %c0_19, %c0_20] : memref<8x8x128xf32, #tpu.memory_space<vmem>>, vector<1x8x128xf32>
    %44 = vector.shape_cast %43 : vector<1x8x128xf32> to vector<8x128xf32>
    %45 = vector.shape_cast %42 : vector<8x128xf32> to vector<1x8x128xf32>
    tpu.vector_store %arg8[%c0_18, %c0_19, %c0_20], %45 {strides = array<i32>} : memref<8x8x128xf32, #tpu.memory_space<vmem>>, vector<1x8x128xf32>,
    %c1 = arith.constant 1 : index
    %c0_21 = arith.constant 0 : index
    %c0_22 = arith.constant 0 : index
    %46 = vector.load %arg7[%c1, %c0_21, %c0_22] : memref<8x8x512xf32, #tpu.memory_space<vmem>>, vector<1x8x512xf32>
    %47 = vector.shape_cast %46 : vector<1x8x512xf32> to vector<8x512xf32>
    %cst_23 = arith.constant dense<0.000000e+00> : vector<8x512xf32>
    %48 = tpu.matmul %42, %13, %cst_23 {dimension_numbers = #tpu.dot_dimension_numbers<[1], [0], [0], [1], [0, 0, 1, 1], [], []>} : vector<8x128xf32>, vector<128x512xf32>, vector<8x512xf32> -> vector<8x512xf32>
    %49 = arith.addf %47, %48 : vector<8x512xf32>
    %50 = vector.extract_strided_slice %49 {offsets = [0, 0], sizes = [8, 128], strides = [1, 1]} : vector<8x512xf32> to vector<8x128xf32>
    %51 = arith.negf %50 : vector<8x128xf32>
    %52 = math.exp %51 : vector<8x128xf32>
    %cst_24 = arith.constant 1.000000e+00 : f32
    %53 = vector.broadcast %cst_24 : f32 to vector<8x128xf32>
    %54 = arith.addf %53, %52 : vector<8x128xf32>
    %55 = arith.divf %53, %54 : vector<8x128xf32>
    %56 = vector.extract_strided_slice %49 {offsets = [0, 128], sizes = [8, 128], strides = [1, 1]} : vector<8x512xf32> to vector<8x128xf32>
    %57 = arith.negf %56 : vector<8x128xf32>
    %58 = math.exp %57 : vector<8x128xf32>
    %cst_25 = arith.constant 1.000000e+00 : f32
    %59 = vector.broadcast %cst_25 : f32 to vector<8x128xf32>
    %60 = arith.addf %59, %58 : vector<8x128xf32>
    %61 = arith.divf %59, %60 : vector<8x128xf32>
    %62 = vector.extract_strided_slice %49 {offsets = [0, 256], sizes = [8, 128], strides = [1, 1]} : vector<8x512xf32> to vector<8x128xf32>
    %63 = math.tanh %62 : vector<8x128xf32>
    %64 = vector.extract_strided_slice %49 {offsets = [0, 384], sizes = [8, 128], strides = [1, 1]} : vector<8x512xf32> to vector<8x128xf32>
    %65 = arith.negf %64 : vector<8x128xf32>
    %66 = math.exp %65 : vector<8x128xf32>
    %cst_26 = arith.constant 1.000000e+00 : f32
    %67 = vector.broadcast %cst_26 : f32 to vector<8x128xf32>
    %68 = arith.addf %67, %66 : vector<8x128xf32>
    %69 = arith.divf %67, %68 : vector<8x128xf32>
    %70 = arith.mulf %61, %40 : vector<8x128xf32>
    %71 = arith.mulf %55, %63 : vector<8x128xf32>
    %72 = arith.addf %70, %71 : vector<8x128xf32>
    %73 = math.tanh %72 : vector<8x128xf32>
    %74 = arith.mulf %69, %73 : vector<8x128xf32>
    %c1_27 = arith.constant 1 : index
    %c0_28 = arith.constant 0 : index
    %c0_29 = arith.constant 0 : index
    %75 = vector.load %arg8[%c1_27, %c0_28, %c0_29] : memref<8x8x128xf32, #tpu.memory_space<vmem>>, vector<1x8x128xf32>
    %76 = vector.shape_cast %75 : vector<1x8x128xf32> to vector<8x128xf32>
    %77 = vector.shape_cast %74 : vector<8x128xf32> to vector<1x8x128xf32>
    tpu.vector_store %arg8[%c1_27, %c0_28, %c0_29], %77 {strides = array<i32>} : memref<8x8x128xf32, #tpu.memory_space<vmem>>, vector<1x8x128xf32>,
    %c2 = arith.constant 2 : index
    %c0_30 = arith.constant 0 : index
    %c0_31 = arith.constant 0 : index
    %78 = vector.load %arg7[%c2, %c0_30, %c0_31] : memref<8x8x512xf32, #tpu.memory_space<vmem>>, vector<1x8x512xf32>
    %79 = vector.shape_cast %78 : vector<1x8x512xf32> to vector<8x512xf32>
    %cst_32 = arith.constant dense<0.000000e+00> : vector<8x512xf32>
    %80 = tpu.matmul %74, %13, %cst_32 {dimension_numbers = #tpu.dot_dimension_numbers<[1], [0], [0], [1], [0, 0, 1, 1], [], []>} : vector<8x128xf32>, vector<128x512xf32>, vector<8x512xf32> -> vector<8x512xf32>
    %81 = arith.addf %79, %80 : vector<8x512xf32>
    %82 = vector.extract_strided_slice %81 {offsets = [0, 0], sizes = [8, 128], strides = [1, 1]} : vector<8x512xf32> to vector<8x128xf32>
    %83 = arith.negf %82 : vector<8x128xf32>
    %84 = math.exp %83 : vector<8x128xf32>
    %cst_33 = arith.constant 1.000000e+00 : f32
    %85 = vector.broadcast %cst_33 : f32 to vector<8x128xf32>
    %86 = arith.addf %85, %84 : vector<8x128xf32>
    %87 = arith.divf %85, %86 : vector<8x128xf32>
    %88 = vector.extract_strided_slice %81 {offsets = [0, 128], sizes = [8, 128], strides = [1, 1]} : vector<8x512xf32> to vector<8x128xf32>
    %89 = arith.negf %88 : vector<8x128xf32>
    %90 = math.exp %89 : vector<8x128xf32>
    %cst_34 = arith.constant 1.000000e+00 : f32
    %91 = vector.broadcast %cst_34 : f32 to vector<8x128xf32>
    %92 = arith.addf %91, %90 : vector<8x128xf32>
    %93 = arith.divf %91, %92 : vector<8x128xf32>
    %94 = vector.extract_strided_slice %81 {offsets = [0, 256], sizes = [8, 128], strides = [1, 1]} : vector<8x512xf32> to vector<8x128xf32>
    %95 = math.tanh %94 : vector<8x128xf32>
    %96 = vector.extract_strided_slice %81 {offsets = [0, 384], sizes = [8, 128], strides = [1, 1]} : vector<8x512xf32> to vector<8x128xf32>
    %97 = arith.negf %96 : vector<8x128xf32>
    %98 = math.exp %97 : vector<8x128xf32>
    %cst_35 = arith.constant 1.000000e+00 : f32
    %99 = vector.broadcast %cst_35 : f32 to vector<8x128xf32>
    %100 = arith.addf %99, %98 : vector<8x128xf32>
    %101 = arith.divf %99, %100 : vector<8x128xf32>
    %102 = arith.mulf %93, %72 : vector<8x128xf32>
    %103 = arith.mulf %87, %95 : vector<8x128xf32>
    %104 = arith.addf %102, %103 : vector<8x128xf32>
    %105 = math.tanh %104 : vector<8x128xf32>
    %106 = arith.mulf %101, %105 : vector<8x128xf32>
    %c2_36 = arith.constant 2 : index
    %c0_37 = arith.constant 0 : index
    %c0_38 = arith.constant 0 : index
    %107 = vector.load %arg8[%c2_36, %c0_37, %c0_38] : memref<8x8x128xf32, #tpu.memory_space<vmem>>, vector<1x8x128xf32>
    %108 = vector.shape_cast %107 : vector<1x8x128xf32> to vector<8x128xf32>
    %109 = vector.shape_cast %106 : vector<8x128xf32> to vector<1x8x128xf32>
    tpu.vector_store %arg8[%c2_36, %c0_37, %c0_38], %109 {strides = array<i32>} : memref<8x8x128xf32, #tpu.memory_space<vmem>>, vector<1x8x128xf32>,
    %c3 = arith.constant 3 : index
    %c0_39 = arith.constant 0 : index
    %c0_40 = arith.constant 0 : index
    %110 = vector.load %arg7[%c3, %c0_39, %c0_40] : memref<8x8x512xf32, #tpu.memory_space<vmem>>, vector<1x8x512xf32>
    %111 = vector.shape_cast %110 : vector<1x8x512xf32> to vector<8x512xf32>
    %cst_41 = arith.constant dense<0.000000e+00> : vector<8x512xf32>
    %112 = tpu.matmul %106, %13, %cst_41 {dimension_numbers = #tpu.dot_dimension_numbers<[1], [0], [0], [1], [0, 0, 1, 1], [], []>} : vector<8x128xf32>, vector<128x512xf32>, vector<8x512xf32> -> vector<8x512xf32>
    %113 = arith.addf %111, %112 : vector<8x512xf32>
    %114 = vector.extract_strided_slice %113 {offsets = [0, 0], sizes = [8, 128], strides = [1, 1]} : vector<8x512xf32> to vector<8x128xf32>
    %115 = arith.negf %114 : vector<8x128xf32>
    %116 = math.exp %115 : vector<8x128xf32>
    %cst_42 = arith.constant 1.000000e+00 : f32
    %117 = vector.broadcast %cst_42 : f32 to vector<8x128xf32>
    %118 = arith.addf %117, %116 : vector<8x128xf32>
    %119 = arith.divf %117, %118 : vector<8x128xf32>
    %120 = vector.extract_strided_slice %113 {offsets = [0, 128], sizes = [8, 128], strides = [1, 1]} : vector<8x512xf32> to vector<8x128xf32>
    %121 = arith.negf %120 : vector<8x128xf32>
    %122 = math.exp %121 : vector<8x128xf32>
    %cst_43 = arith.constant 1.000000e+00 : f32
    %123 = vector.broadcast %cst_43 : f32 to vector<8x128xf32>
    %124 = arith.addf %123, %122 : vector<8x128xf32>
    %125 = arith.divf %123, %124 : vector<8x128xf32>
    %126 = vector.extract_strided_slice %113 {offsets = [0, 256], sizes = [8, 128], strides = [1, 1]} : vector<8x512xf32> to vector<8x128xf32>
    %127 = math.tanh %126 : vector<8x128xf32>
    %128 = vector.extract_strided_slice %113 {offsets = [0, 384], sizes = [8, 128], strides = [1, 1]} : vector<8x512xf32> to vector<8x128xf32>
    %129 = arith.negf %128 : vector<8x128xf32>
    %130 = math.exp %129 : vector<8x128xf32>
    %cst_44 = arith.constant 1.000000e+00 : f32
    %131 = vector.broadcast %cst_44 : f32 to vector<8x128xf32>
    %132 = arith.addf %131, %130 : vector<8x128xf32>
    %133 = arith.divf %131, %132 : vector<8x128xf32>
    %134 = arith.mulf %125, %104 : vector<8x128xf32>
    %135 = arith.mulf %119, %127 : vector<8x128xf32>
    %136 = arith.addf %134, %135 : vector<8x128xf32>
    %137 = math.tanh %136 : vector<8x128xf32>
    %138 = arith.mulf %133, %137 : vector<8x128xf32>
    %c3_45 = arith.constant 3 : index
    %c0_46 = arith.constant 0 : index
    %c0_47 = arith.constant 0 : index
    %139 = vector.load %arg8[%c3_45, %c0_46, %c0_47] : memref<8x8x128xf32, #tpu.memory_space<vmem>>, vector<1x8x128xf32>
    %140 = vector.shape_cast %139 : vector<1x8x128xf32> to vector<8x128xf32>
    %141 = vector.shape_cast %138 : vector<8x128xf32> to vector<1x8x128xf32>
    tpu.vector_store %arg8[%c3_45, %c0_46, %c0_47], %141 {strides = array<i32>} : memref<8x8x128xf32, #tpu.memory_space<vmem>>, vector<1x8x128xf32>,
    %c4 = arith.constant 4 : index
    %c0_48 = arith.constant 0 : index
    %c0_49 = arith.constant 0 : index
    %142 = vector.load %arg7[%c4, %c0_48, %c0_49] : memref<8x8x512xf32, #tpu.memory_space<vmem>>, vector<1x8x512xf32>
    %143 = vector.shape_cast %142 : vector<1x8x512xf32> to vector<8x512xf32>
    %cst_50 = arith.constant dense<0.000000e+00> : vector<8x512xf32>
    %144 = tpu.matmul %138, %13, %cst_50 {dimension_numbers = #tpu.dot_dimension_numbers<[1], [0], [0], [1], [0, 0, 1, 1], [], []>} : vector<8x128xf32>, vector<128x512xf32>, vector<8x512xf32> -> vector<8x512xf32>
    %145 = arith.addf %143, %144 : vector<8x512xf32>
    %146 = vector.extract_strided_slice %145 {offsets = [0, 0], sizes = [8, 128], strides = [1, 1]} : vector<8x512xf32> to vector<8x128xf32>
    %147 = arith.negf %146 : vector<8x128xf32>
    %148 = math.exp %147 : vector<8x128xf32>
    %cst_51 = arith.constant 1.000000e+00 : f32
    %149 = vector.broadcast %cst_51 : f32 to vector<8x128xf32>
    %150 = arith.addf %149, %148 : vector<8x128xf32>
    %151 = arith.divf %149, %150 : vector<8x128xf32>
    %152 = vector.extract_strided_slice %145 {offsets = [0, 128], sizes = [8, 128], strides = [1, 1]} : vector<8x512xf32> to vector<8x128xf32>
    %153 = arith.negf %152 : vector<8x128xf32>
    %154 = math.exp %153 : vector<8x128xf32>
    %cst_52 = arith.constant 1.000000e+00 : f32
    %155 = vector.broadcast %cst_52 : f32 to vector<8x128xf32>
    %156 = arith.addf %155, %154 : vector<8x128xf32>
    %157 = arith.divf %155, %156 : vector<8x128xf32>
    %158 = vector.extract_strided_slice %145 {offsets = [0, 256], sizes = [8, 128], strides = [1, 1]} : vector<8x512xf32> to vector<8x128xf32>
    %159 = math.tanh %158 : vector<8x128xf32>
    %160 = vector.extract_strided_slice %145 {offsets = [0, 384], sizes = [8, 128], strides = [1, 1]} : vector<8x512xf32> to vector<8x128xf32>
    %161 = arith.negf %160 : vector<8x128xf32>
    %162 = math.exp %161 : vector<8x128xf32>
    %cst_53 = arith.constant 1.000000e+00 : f32
    %163 = vector.broadcast %cst_53 : f32 to vector<8x128xf32>
    %164 = arith.addf %163, %162 : vector<8x128xf32>
    %165 = arith.divf %163, %164 : vector<8x128xf32>
    %166 = arith.mulf %157, %136 : vector<8x128xf32>
    %167 = arith.mulf %151, %159 : vector<8x128xf32>
    %168 = arith.addf %166, %167 : vector<8x128xf32>
    %169 = math.tanh %168 : vector<8x128xf32>
    %170 = arith.mulf %165, %169 : vector<8x128xf32>
    %c4_54 = arith.constant 4 : index
    %c0_55 = arith.constant 0 : index
    %c0_56 = arith.constant 0 : index
    %171 = vector.load %arg8[%c4_54, %c0_55, %c0_56] : memref<8x8x128xf32, #tpu.memory_space<vmem>>, vector<1x8x128xf32>
    %172 = vector.shape_cast %171 : vector<1x8x128xf32> to vector<8x128xf32>
    %173 = vector.shape_cast %170 : vector<8x128xf32> to vector<1x8x128xf32>
    tpu.vector_store %arg8[%c4_54, %c0_55, %c0_56], %173 {strides = array<i32>} : memref<8x8x128xf32, #tpu.memory_space<vmem>>, vector<1x8x128xf32>,
    %c5 = arith.constant 5 : index
    %c0_57 = arith.constant 0 : index
    %c0_58 = arith.constant 0 : index
    %174 = vector.load %arg7[%c5, %c0_57, %c0_58] : memref<8x8x512xf32, #tpu.memory_space<vmem>>, vector<1x8x512xf32>
    %175 = vector.shape_cast %174 : vector<1x8x512xf32> to vector<8x512xf32>
    %cst_59 = arith.constant dense<0.000000e+00> : vector<8x512xf32>
    %176 = tpu.matmul %170, %13, %cst_59 {dimension_numbers = #tpu.dot_dimension_numbers<[1], [0], [0], [1], [0, 0, 1, 1], [], []>} : vector<8x128xf32>, vector<128x512xf32>, vector<8x512xf32> -> vector<8x512xf32>
    %177 = arith.addf %175, %176 : vector<8x512xf32>
    %178 = vector.extract_strided_slice %177 {offsets = [0, 0], sizes = [8, 128], strides = [1, 1]} : vector<8x512xf32> to vector<8x128xf32>
    %179 = arith.negf %178 : vector<8x128xf32>
    %180 = math.exp %179 : vector<8x128xf32>
    %cst_60 = arith.constant 1.000000e+00 : f32
    %181 = vector.broadcast %cst_60 : f32 to vector<8x128xf32>
    %182 = arith.addf %181, %180 : vector<8x128xf32>
    %183 = arith.divf %181, %182 : vector<8x128xf32>
    %184 = vector.extract_strided_slice %177 {offsets = [0, 128], sizes = [8, 128], strides = [1, 1]} : vector<8x512xf32> to vector<8x128xf32>
    %185 = arith.negf %184 : vector<8x128xf32>
    %186 = math.exp %185 : vector<8x128xf32>
    %cst_61 = arith.constant 1.000000e+00 : f32
    %187 = vector.broadcast %cst_61 : f32 to vector<8x128xf32>
    %188 = arith.addf %187, %186 : vector<8x128xf32>
    %189 = arith.divf %187, %188 : vector<8x128xf32>
    %190 = vector.extract_strided_slice %177 {offsets = [0, 256], sizes = [8, 128], strides = [1, 1]} : vector<8x512xf32> to vector<8x128xf32>
    %191 = math.tanh %190 : vector<8x128xf32>
    %192 = vector.extract_strided_slice %177 {offsets = [0, 384], sizes = [8, 128], strides = [1, 1]} : vector<8x512xf32> to vector<8x128xf32>
    %193 = arith.negf %192 : vector<8x128xf32>
    %194 = math.exp %193 : vector<8x128xf32>
    %cst_62 = arith.constant 1.000000e+00 : f32
    %195 = vector.broadcast %cst_62 : f32 to vector<8x128xf32>
    %196 = arith.addf %195, %194 : vector<8x128xf32>
    %197 = arith.divf %195, %196 : vector<8x128xf32>
    %198 = arith.mulf %189, %168 : vector<8x128xf32>
    %199 = arith.mulf %183, %191 : vector<8x128xf32>
    %200 = arith.addf %198, %199 : vector<8x128xf32>
    %201 = math.tanh %200 : vector<8x128xf32>
    %202 = arith.mulf %197, %201 : vector<8x128xf32>
    %c5_63 = arith.constant 5 : index
    %c0_64 = arith.constant 0 : index
    %c0_65 = arith.constant 0 : index
    %203 = vector.load %arg8[%c5_63, %c0_64, %c0_65] : memref<8x8x128xf32, #tpu.memory_space<vmem>>, vector<1x8x128xf32>
    %204 = vector.shape_cast %203 : vector<1x8x128xf32> to vector<8x128xf32>
    %205 = vector.shape_cast %202 : vector<8x128xf32> to vector<1x8x128xf32>
    tpu.vector_store %arg8[%c5_63, %c0_64, %c0_65], %205 {strides = array<i32>} : memref<8x8x128xf32, #tpu.memory_space<vmem>>, vector<1x8x128xf32>,
    %c6 = arith.constant 6 : index
    %c0_66 = arith.constant 0 : index
    %c0_67 = arith.constant 0 : index
    %206 = vector.load %arg7[%c6, %c0_66, %c0_67] : memref<8x8x512xf32, #tpu.memory_space<vmem>>, vector<1x8x512xf32>
    %207 = vector.shape_cast %206 : vector<1x8x512xf32> to vector<8x512xf32>
    %cst_68 = arith.constant dense<0.000000e+00> : vector<8x512xf32>
    %208 = tpu.matmul %202, %13, %cst_68 {dimension_numbers = #tpu.dot_dimension_numbers<[1], [0], [0], [1], [0, 0, 1, 1], [], []>} : vector<8x128xf32>, vector<128x512xf32>, vector<8x512xf32> -> vector<8x512xf32>
    %209 = arith.addf %207, %208 : vector<8x512xf32>
    %210 = vector.extract_strided_slice %209 {offsets = [0, 0], sizes = [8, 128], strides = [1, 1]} : vector<8x512xf32> to vector<8x128xf32>
    %211 = arith.negf %210 : vector<8x128xf32>
    %212 = math.exp %211 : vector<8x128xf32>
    %cst_69 = arith.constant 1.000000e+00 : f32
    %213 = vector.broadcast %cst_69 : f32 to vector<8x128xf32>
    %214 = arith.addf %213, %212 : vector<8x128xf32>
    %215 = arith.divf %213, %214 : vector<8x128xf32>
    %216 = vector.extract_strided_slice %209 {offsets = [0, 128], sizes = [8, 128], strides = [1, 1]} : vector<8x512xf32> to vector<8x128xf32>
    %217 = arith.negf %216 : vector<8x128xf32>
    %218 = math.exp %217 : vector<8x128xf32>
    %cst_70 = arith.constant 1.000000e+00 : f32
    %219 = vector.broadcast %cst_70 : f32 to vector<8x128xf32>
    %220 = arith.addf %219, %218 : vector<8x128xf32>
    %221 = arith.divf %219, %220 : vector<8x128xf32>
    %222 = vector.extract_strided_slice %209 {offsets = [0, 256], sizes = [8, 128], strides = [1, 1]} : vector<8x512xf32> to vector<8x128xf32>
    %223 = math.tanh %222 : vector<8x128xf32>
    %224 = vector.extract_strided_slice %209 {offsets = [0, 384], sizes = [8, 128], strides = [1, 1]} : vector<8x512xf32> to vector<8x128xf32>
    %225 = arith.negf %224 : vector<8x128xf32>
    %226 = math.exp %225 : vector<8x128xf32>
    %cst_71 = arith.constant 1.000000e+00 : f32
    %227 = vector.broadcast %cst_71 : f32 to vector<8x128xf32>
    %228 = arith.addf %227, %226 : vector<8x128xf32>
    %229 = arith.divf %227, %228 : vector<8x128xf32>
    %230 = arith.mulf %221, %200 : vector<8x128xf32>
    %231 = arith.mulf %215, %223 : vector<8x128xf32>
    %232 = arith.addf %230, %231 : vector<8x128xf32>
    %233 = math.tanh %232 : vector<8x128xf32>
    %234 = arith.mulf %229, %233 : vector<8x128xf32>
    %c6_72 = arith.constant 6 : index
    %c0_73 = arith.constant 0 : index
    %c0_74 = arith.constant 0 : index
    %235 = vector.load %arg8[%c6_72, %c0_73, %c0_74] : memref<8x8x128xf32, #tpu.memory_space<vmem>>, vector<1x8x128xf32>
    %236 = vector.shape_cast %235 : vector<1x8x128xf32> to vector<8x128xf32>
    %237 = vector.shape_cast %234 : vector<8x128xf32> to vector<1x8x128xf32>
    tpu.vector_store %arg8[%c6_72, %c0_73, %c0_74], %237 {strides = array<i32>} : memref<8x8x128xf32, #tpu.memory_space<vmem>>, vector<1x8x128xf32>,
    %c7 = arith.constant 7 : index
    %c0_75 = arith.constant 0 : index
    %c0_76 = arith.constant 0 : index
    %238 = vector.load %arg7[%c7, %c0_75, %c0_76] : memref<8x8x512xf32, #tpu.memory_space<vmem>>, vector<1x8x512xf32>
    %239 = vector.shape_cast %238 : vector<1x8x512xf32> to vector<8x512xf32>
    %cst_77 = arith.constant dense<0.000000e+00> : vector<8x512xf32>
    %240 = tpu.matmul %234, %13, %cst_77 {dimension_numbers = #tpu.dot_dimension_numbers<[1], [0], [0], [1], [0, 0, 1, 1], [], []>} : vector<8x128xf32>, vector<128x512xf32>, vector<8x512xf32> -> vector<8x512xf32>
    %241 = arith.addf %239, %240 : vector<8x512xf32>
    %242 = vector.extract_strided_slice %241 {offsets = [0, 0], sizes = [8, 128], strides = [1, 1]} : vector<8x512xf32> to vector<8x128xf32>
    %243 = arith.negf %242 : vector<8x128xf32>
    %244 = math.exp %243 : vector<8x128xf32>
    %cst_78 = arith.constant 1.000000e+00 : f32
    %245 = vector.broadcast %cst_78 : f32 to vector<8x128xf32>
    %246 = arith.addf %245, %244 : vector<8x128xf32>
    %247 = arith.divf %245, %246 : vector<8x128xf32>
    %248 = vector.extract_strided_slice %241 {offsets = [0, 128], sizes = [8, 128], strides = [1, 1]} : vector<8x512xf32> to vector<8x128xf32>
    %249 = arith.negf %248 : vector<8x128xf32>
    %250 = math.exp %249 : vector<8x128xf32>
    %cst_79 = arith.constant 1.000000e+00 : f32
    %251 = vector.broadcast %cst_79 : f32 to vector<8x128xf32>
    %252 = arith.addf %251, %250 : vector<8x128xf32>
    %253 = arith.divf %251, %252 : vector<8x128xf32>
    %254 = vector.extract_strided_slice %241 {offsets = [0, 256], sizes = [8, 128], strides = [1, 1]} : vector<8x512xf32> to vector<8x128xf32>
    %255 = math.tanh %254 : vector<8x128xf32>
    %256 = vector.extract_strided_slice %241 {offsets = [0, 384], sizes = [8, 128], strides = [1, 1]} : vector<8x512xf32> to vector<8x128xf32>
    %257 = arith.negf %256 : vector<8x128xf32>
    %258 = math.exp %257 : vector<8x128xf32>
    %cst_80 = arith.constant 1.000000e+00 : f32
    %259 = vector.broadcast %cst_80 : f32 to vector<8x128xf32>
    %260 = arith.addf %259, %258 : vector<8x128xf32>
    %261 = arith.divf %259, %260 : vector<8x128xf32>
    %262 = arith.mulf %253, %232 : vector<8x128xf32>
    %263 = arith.mulf %247, %255 : vector<8x128xf32>
    %264 = arith.addf %262, %263 : vector<8x128xf32>
    %265 = math.tanh %264 : vector<8x128xf32>
    %266 = arith.mulf %261, %265 : vector<8x128xf32>
    %c7_81 = arith.constant 7 : index
    %c0_82 = arith.constant 0 : index
    %c0_83 = arith.constant 0 : index
    %267 = vector.load %arg8[%c7_81, %c0_82, %c0_83] : memref<8x8x128xf32, #tpu.memory_space<vmem>>, vector<1x8x128xf32>
    %268 = vector.shape_cast %267 : vector<1x8x128xf32> to vector<8x128xf32>
    %269 = vector.shape_cast %266 : vector<8x128xf32> to vector<1x8x128xf32>
    tpu.vector_store %arg8[%c7_81, %c0_82, %c0_83], %269 {strides = array<i32>} : memref<8x8x128xf32, #tpu.memory_space<vmem>>, vector<1x8x128xf32>,
    %c0_84 = arith.constant 0 : index
    %c0_85 = arith.constant 0 : index
    %c0_86 = arith.constant 0 : index
    %270 = vector.load %arg8[%c0_84, %c0_85, %c0_86] : memref<8x8x128xf32, #tpu.memory_space<vmem>>, vector<8x8x128xf32>
    %271 = vector.shape_cast %270 : vector<8x8x128xf32> to vector<64x128xf32>
    %c0_87 = arith.constant 0 : index
    %c0_88 = arith.constant 0 : index
    %c0_89 = arith.constant 0 : index
    %272 = vector.load %arg3[%c0_87, %c0_88, %c0_89] : memref<1x128x512xf32, #tpu.memory_space<vmem>>, vector<1x128x512xf32>
    %273 = vector.shape_cast %272 : vector<1x128x512xf32> to vector<128x512xf32>
    %cst_90 = arith.constant dense<0.000000e+00> : vector<64x512xf32>
    %274 = tpu.matmul %271, %273, %cst_90 {dimension_numbers = #tpu.dot_dimension_numbers<[1], [0], [0], [1], [0, 0, 1, 1], [], []>} : vector<64x128xf32>, vector<128x512xf32>, vector<64x512xf32> -> vector<64x512xf32>
    %c0_91 = arith.constant 0 : index
    %c0_92 = arith.constant 0 : index
    %c0_93 = arith.constant 0 : index
    %275 = vector.load %arg5[%c0_91, %c0_92, %c0_93] : memref<1x1x512xf32, #tpu.memory_space<vmem>>, vector<1x1x512xf32>
    %276 = vector.shape_cast %275 : vector<1x1x512xf32> to vector<1x512xf32>
    %277 = vector.broadcast %276 : vector<1x512xf32> to vector<64x512xf32>
    %278 = arith.addf %274, %277 : vector<64x512xf32>
    %279 = vector.shape_cast %278 : vector<64x512xf32> to vector<8x8x512xf32>
    %c0_94 = arith.constant 0 : index
    %c0_95 = arith.constant 0 : index
    %c0_96 = arith.constant 0 : index
    %280 = vector.load %arg7[%c0_94, %c0_95, %c0_96] : memref<8x8x512xf32, #tpu.memory_space<vmem>>, vector<8x8x512xf32>
    tpu.vector_store %arg7[%c0_94, %c0_95, %c0_96], %279 {strides = array<i32>} : memref<8x8x512xf32, #tpu.memory_space<vmem>>, vector<8x8x512xf32>,
    %cst_97 = arith.constant 0.000000e+00 : f32
    %281 = vector.broadcast %cst_97 : f32 to vector<8x128xf32>
    %cst_98 = arith.constant 0.000000e+00 : f32
    %282 = vector.broadcast %cst_98 : f32 to vector<8x128xf32>
    %c1_99 = arith.constant 1 : index
    %c0_100 = arith.constant 0 : index
    %c0_101 = arith.constant 0 : index
    %283 = vector.load %arg4[%c1_99, %c0_100, %c0_101] : memref<2x128x512xf32, #tpu.memory_space<vmem>>, vector<1x128x512xf32>
    %284 = vector.shape_cast %283 : vector<1x128x512xf32> to vector<128x512xf32>
    %c0_102 = arith.constant 0 : index
    %c0_103 = arith.constant 0 : index
    %c0_104 = arith.constant 0 : index
    %285 = vector.load %arg7[%c0_102, %c0_103, %c0_104] : memref<8x8x512xf32, #tpu.memory_space<vmem>>, vector<1x8x512xf32>
    %286 = vector.shape_cast %285 : vector<1x8x512xf32> to vector<8x512xf32>
    %cst_105 = arith.constant dense<0.000000e+00> : vector<8x512xf32>
    %287 = tpu.matmul %281, %284, %cst_105 {dimension_numbers = #tpu.dot_dimension_numbers<[1], [0], [0], [1], [0, 0, 1, 1], [], []>} : vector<8x128xf32>, vector<128x512xf32>, vector<8x512xf32> -> vector<8x512xf32>
    %288 = arith.addf %286, %287 : vector<8x512xf32>
    %289 = vector.extract_strided_slice %288 {offsets = [0, 0], sizes = [8, 128], strides = [1, 1]} : vector<8x512xf32> to vector<8x128xf32>
    %290 = arith.negf %289 : vector<8x128xf32>
    %291 = math.exp %290 : vector<8x128xf32>
    %cst_106 = arith.constant 1.000000e+00 : f32
    %292 = vector.broadcast %cst_106 : f32 to vector<8x128xf32>
    %293 = arith.addf %292, %291 : vector<8x128xf32>
    %294 = arith.divf %292, %293 : vector<8x128xf32>
    %295 = vector.extract_strided_slice %288 {offsets = [0, 128], sizes = [8, 128], strides = [1, 1]} : vector<8x512xf32> to vector<8x128xf32>
    %296 = arith.negf %295 : vector<8x128xf32>
    %297 = math.exp %296 : vector<8x128xf32>
    %cst_107 = arith.constant 1.000000e+00 : f32
    %298 = vector.broadcast %cst_107 : f32 to vector<8x128xf32>
    %299 = arith.addf %298, %297 : vector<8x128xf32>
    %300 = arith.divf %298, %299 : vector<8x128xf32>
    %301 = vector.extract_strided_slice %288 {offsets = [0, 256], sizes = [8, 128], strides = [1, 1]} : vector<8x512xf32> to vector<8x128xf32>
    %302 = math.tanh %301 : vector<8x128xf32>
    %303 = vector.extract_strided_slice %288 {offsets = [0, 384], sizes = [8, 128], strides = [1, 1]} : vector<8x512xf32> to vector<8x128xf32>
    %304 = arith.negf %303 : vector<8x128xf32>
    %305 = math.exp %304 : vector<8x128xf32>
    %cst_108 = arith.constant 1.000000e+00 : f32
    %306 = vector.broadcast %cst_108 : f32 to vector<8x128xf32>
    %307 = arith.addf %306, %305 : vector<8x128xf32>
    %308 = arith.divf %306, %307 : vector<8x128xf32>
    %309 = arith.mulf %300, %282 : vector<8x128xf32>
    %310 = arith.mulf %294, %302 : vector<8x128xf32>
    %311 = arith.addf %309, %310 : vector<8x128xf32>
    %312 = math.tanh %311 : vector<8x128xf32>
    %313 = arith.mulf %308, %312 : vector<8x128xf32>
    %c0_109 = arith.constant 0 : index
    %c0_110 = arith.constant 0 : index
    %c0_111 = arith.constant 0 : index
    %314 = vector.load %arg6[%c0_109, %c0_110, %c0_111] : memref<8x8x128xf32, #tpu.memory_space<vmem>>, vector<1x8x128xf32>
    %315 = vector.shape_cast %314 : vector<1x8x128xf32> to vector<8x128xf32>
    %316 = vector.shape_cast %313 : vector<8x128xf32> to vector<1x8x128xf32>
    tpu.vector_store %arg6[%c0_109, %c0_110, %c0_111], %316 {strides = array<i32>} : memref<8x8x128xf32, #tpu.memory_space<vmem>>, vector<1x8x128xf32>,
    %c1_112 = arith.constant 1 : index
    %c0_113 = arith.constant 0 : index
    %c0_114 = arith.constant 0 : index
    %317 = vector.load %arg7[%c1_112, %c0_113, %c0_114] : memref<8x8x512xf32, #tpu.memory_space<vmem>>, vector<1x8x512xf32>
    %318 = vector.shape_cast %317 : vector<1x8x512xf32> to vector<8x512xf32>
    %cst_115 = arith.constant dense<0.000000e+00> : vector<8x512xf32>
    %319 = tpu.matmul %313, %284, %cst_115 {dimension_numbers = #tpu.dot_dimension_numbers<[1], [0], [0], [1], [0, 0, 1, 1], [], []>} : vector<8x128xf32>, vector<128x512xf32>, vector<8x512xf32> -> vector<8x512xf32>
    %320 = arith.addf %318, %319 : vector<8x512xf32>
    %321 = vector.extract_strided_slice %320 {offsets = [0, 0], sizes = [8, 128], strides = [1, 1]} : vector<8x512xf32> to vector<8x128xf32>
    %322 = arith.negf %321 : vector<8x128xf32>
    %323 = math.exp %322 : vector<8x128xf32>
    %cst_116 = arith.constant 1.000000e+00 : f32
    %324 = vector.broadcast %cst_116 : f32 to vector<8x128xf32>
    %325 = arith.addf %324, %323 : vector<8x128xf32>
    %326 = arith.divf %324, %325 : vector<8x128xf32>
    %327 = vector.extract_strided_slice %320 {offsets = [0, 128], sizes = [8, 128], strides = [1, 1]} : vector<8x512xf32> to vector<8x128xf32>
    %328 = arith.negf %327 : vector<8x128xf32>
    %329 = math.exp %328 : vector<8x128xf32>
    %cst_117 = arith.constant 1.000000e+00 : f32
    %330 = vector.broadcast %cst_117 : f32 to vector<8x128xf32>
    %331 = arith.addf %330, %329 : vector<8x128xf32>
    %332 = arith.divf %330, %331 : vector<8x128xf32>
    %333 = vector.extract_strided_slice %320 {offsets = [0, 256], sizes = [8, 128], strides = [1, 1]} : vector<8x512xf32> to vector<8x128xf32>
    %334 = math.tanh %333 : vector<8x128xf32>
    %335 = vector.extract_strided_slice %320 {offsets = [0, 384], sizes = [8, 128], strides = [1, 1]} : vector<8x512xf32> to vector<8x128xf32>
    %336 = arith.negf %335 : vector<8x128xf32>
    %337 = math.exp %336 : vector<8x128xf32>
    %cst_118 = arith.constant 1.000000e+00 : f32
    %338 = vector.broadcast %cst_118 : f32 to vector<8x128xf32>
    %339 = arith.addf %338, %337 : vector<8x128xf32>
    %340 = arith.divf %338, %339 : vector<8x128xf32>
    %341 = arith.mulf %332, %311 : vector<8x128xf32>
    %342 = arith.mulf %326, %334 : vector<8x128xf32>
    %343 = arith.addf %341, %342 : vector<8x128xf32>
    %344 = math.tanh %343 : vector<8x128xf32>
    %345 = arith.mulf %340, %344 : vector<8x128xf32>
    %c1_119 = arith.constant 1 : index
    %c0_120 = arith.constant 0 : index
    %c0_121 = arith.constant 0 : index
    %346 = vector.load %arg6[%c1_119, %c0_120, %c0_121] : memref<8x8x128xf32, #tpu.memory_space<vmem>>, vector<1x8x128xf32>
    %347 = vector.shape_cast %346 : vector<1x8x128xf32> to vector<8x128xf32>
    %348 = vector.shape_cast %345 : vector<8x128xf32> to vector<1x8x128xf32>
    tpu.vector_store %arg6[%c1_119, %c0_120, %c0_121], %348 {strides = array<i32>} : memref<8x8x128xf32, #tpu.memory_space<vmem>>, vector<1x8x128xf32>,
    %c2_122 = arith.constant 2 : index
    %c0_123 = arith.constant 0 : index
    %c0_124 = arith.constant 0 : index
    %349 = vector.load %arg7[%c2_122, %c0_123, %c0_124] : memref<8x8x512xf32, #tpu.memory_space<vmem>>, vector<1x8x512xf32>
    %350 = vector.shape_cast %349 : vector<1x8x512xf32> to vector<8x512xf32>
    %cst_125 = arith.constant dense<0.000000e+00> : vector<8x512xf32>
    %351 = tpu.matmul %345, %284, %cst_125 {dimension_numbers = #tpu.dot_dimension_numbers<[1], [0], [0], [1], [0, 0, 1, 1], [], []>} : vector<8x128xf32>, vector<128x512xf32>, vector<8x512xf32> -> vector<8x512xf32>
    %352 = arith.addf %350, %351 : vector<8x512xf32>
    %353 = vector.extract_strided_slice %352 {offsets = [0, 0], sizes = [8, 128], strides = [1, 1]} : vector<8x512xf32> to vector<8x128xf32>
    %354 = arith.negf %353 : vector<8x128xf32>
    %355 = math.exp %354 : vector<8x128xf32>
    %cst_126 = arith.constant 1.000000e+00 : f32
    %356 = vector.broadcast %cst_126 : f32 to vector<8x128xf32>
    %357 = arith.addf %356, %355 : vector<8x128xf32>
    %358 = arith.divf %356, %357 : vector<8x128xf32>
    %359 = vector.extract_strided_slice %352 {offsets = [0, 128], sizes = [8, 128], strides = [1, 1]} : vector<8x512xf32> to vector<8x128xf32>
    %360 = arith.negf %359 : vector<8x128xf32>
    %361 = math.exp %360 : vector<8x128xf32>
    %cst_127 = arith.constant 1.000000e+00 : f32
    %362 = vector.broadcast %cst_127 : f32 to vector<8x128xf32>
    %363 = arith.addf %362, %361 : vector<8x128xf32>
    %364 = arith.divf %362, %363 : vector<8x128xf32>
    %365 = vector.extract_strided_slice %352 {offsets = [0, 256], sizes = [8, 128], strides = [1, 1]} : vector<8x512xf32> to vector<8x128xf32>
    %366 = math.tanh %365 : vector<8x128xf32>
    %367 = vector.extract_strided_slice %352 {offsets = [0, 384], sizes = [8, 128], strides = [1, 1]} : vector<8x512xf32> to vector<8x128xf32>
    %368 = arith.negf %367 : vector<8x128xf32>
    %369 = math.exp %368 : vector<8x128xf32>
    %cst_128 = arith.constant 1.000000e+00 : f32
    %370 = vector.broadcast %cst_128 : f32 to vector<8x128xf32>
    %371 = arith.addf %370, %369 : vector<8x128xf32>
    %372 = arith.divf %370, %371 : vector<8x128xf32>
    %373 = arith.mulf %364, %343 : vector<8x128xf32>
    %374 = arith.mulf %358, %366 : vector<8x128xf32>
    %375 = arith.addf %373, %374 : vector<8x128xf32>
    %376 = math.tanh %375 : vector<8x128xf32>
    %377 = arith.mulf %372, %376 : vector<8x128xf32>
    %c2_129 = arith.constant 2 : index
    %c0_130 = arith.constant 0 : index
    %c0_131 = arith.constant 0 : index
    %378 = vector.load %arg6[%c2_129, %c0_130, %c0_131] : memref<8x8x128xf32, #tpu.memory_space<vmem>>, vector<1x8x128xf32>
    %379 = vector.shape_cast %378 : vector<1x8x128xf32> to vector<8x128xf32>
    %380 = vector.shape_cast %377 : vector<8x128xf32> to vector<1x8x128xf32>
    tpu.vector_store %arg6[%c2_129, %c0_130, %c0_131], %380 {strides = array<i32>} : memref<8x8x128xf32, #tpu.memory_space<vmem>>, vector<1x8x128xf32>,
    %c3_132 = arith.constant 3 : index
    %c0_133 = arith.constant 0 : index
    %c0_134 = arith.constant 0 : index
    %381 = vector.load %arg7[%c3_132, %c0_133, %c0_134] : memref<8x8x512xf32, #tpu.memory_space<vmem>>, vector<1x8x512xf32>
    %382 = vector.shape_cast %381 : vector<1x8x512xf32> to vector<8x512xf32>
    %cst_135 = arith.constant dense<0.000000e+00> : vector<8x512xf32>
    %383 = tpu.matmul %377, %284, %cst_135 {dimension_numbers = #tpu.dot_dimension_numbers<[1], [0], [0], [1], [0, 0, 1, 1], [], []>} : vector<8x128xf32>, vector<128x512xf32>, vector<8x512xf32> -> vector<8x512xf32>
    %384 = arith.addf %382, %383 : vector<8x512xf32>
    %385 = vector.extract_strided_slice %384 {offsets = [0, 0], sizes = [8, 128], strides = [1, 1]} : vector<8x512xf32> to vector<8x128xf32>
    %386 = arith.negf %385 : vector<8x128xf32>
    %387 = math.exp %386 : vector<8x128xf32>
    %cst_136 = arith.constant 1.000000e+00 : f32
    %388 = vector.broadcast %cst_136 : f32 to vector<8x128xf32>
    %389 = arith.addf %388, %387 : vector<8x128xf32>
    %390 = arith.divf %388, %389 : vector<8x128xf32>
    %391 = vector.extract_strided_slice %384 {offsets = [0, 128], sizes = [8, 128], strides = [1, 1]} : vector<8x512xf32> to vector<8x128xf32>
    %392 = arith.negf %391 : vector<8x128xf32>
    %393 = math.exp %392 : vector<8x128xf32>
    %cst_137 = arith.constant 1.000000e+00 : f32
    %394 = vector.broadcast %cst_137 : f32 to vector<8x128xf32>
    %395 = arith.addf %394, %393 : vector<8x128xf32>
    %396 = arith.divf %394, %395 : vector<8x128xf32>
    %397 = vector.extract_strided_slice %384 {offsets = [0, 256], sizes = [8, 128], strides = [1, 1]} : vector<8x512xf32> to vector<8x128xf32>
    %398 = math.tanh %397 : vector<8x128xf32>
    %399 = vector.extract_strided_slice %384 {offsets = [0, 384], sizes = [8, 128], strides = [1, 1]} : vector<8x512xf32> to vector<8x128xf32>
    %400 = arith.negf %399 : vector<8x128xf32>
    %401 = math.exp %400 : vector<8x128xf32>
    %cst_138 = arith.constant 1.000000e+00 : f32
    %402 = vector.broadcast %cst_138 : f32 to vector<8x128xf32>
    %403 = arith.addf %402, %401 : vector<8x128xf32>
    %404 = arith.divf %402, %403 : vector<8x128xf32>
    %405 = arith.mulf %396, %375 : vector<8x128xf32>
    %406 = arith.mulf %390, %398 : vector<8x128xf32>
    %407 = arith.addf %405, %406 : vector<8x128xf32>
    %408 = math.tanh %407 : vector<8x128xf32>
    %409 = arith.mulf %404, %408 : vector<8x128xf32>
    %c3_139 = arith.constant 3 : index
    %c0_140 = arith.constant 0 : index
    %c0_141 = arith.constant 0 : index
    %410 = vector.load %arg6[%c3_139, %c0_140, %c0_141] : memref<8x8x128xf32, #tpu.memory_space<vmem>>, vector<1x8x128xf32>
    %411 = vector.shape_cast %410 : vector<1x8x128xf32> to vector<8x128xf32>
    %412 = vector.shape_cast %409 : vector<8x128xf32> to vector<1x8x128xf32>
    tpu.vector_store %arg6[%c3_139, %c0_140, %c0_141], %412 {strides = array<i32>} : memref<8x8x128xf32, #tpu.memory_space<vmem>>, vector<1x8x128xf32>,
    %c4_142 = arith.constant 4 : index
    %c0_143 = arith.constant 0 : index
    %c0_144 = arith.constant 0 : index
    %413 = vector.load %arg7[%c4_142, %c0_143, %c0_144] : memref<8x8x512xf32, #tpu.memory_space<vmem>>, vector<1x8x512xf32>
    %414 = vector.shape_cast %413 : vector<1x8x512xf32> to vector<8x512xf32>
    %cst_145 = arith.constant dense<0.000000e+00> : vector<8x512xf32>
    %415 = tpu.matmul %409, %284, %cst_145 {dimension_numbers = #tpu.dot_dimension_numbers<[1], [0], [0], [1], [0, 0, 1, 1], [], []>} : vector<8x128xf32>, vector<128x512xf32>, vector<8x512xf32> -> vector<8x512xf32>
    %416 = arith.addf %414, %415 : vector<8x512xf32>
    %417 = vector.extract_strided_slice %416 {offsets = [0, 0], sizes = [8, 128], strides = [1, 1]} : vector<8x512xf32> to vector<8x128xf32>
    %418 = arith.negf %417 : vector<8x128xf32>
    %419 = math.exp %418 : vector<8x128xf32>
    %cst_146 = arith.constant 1.000000e+00 : f32
    %420 = vector.broadcast %cst_146 : f32 to vector<8x128xf32>
    %421 = arith.addf %420, %419 : vector<8x128xf32>
    %422 = arith.divf %420, %421 : vector<8x128xf32>
    %423 = vector.extract_strided_slice %416 {offsets = [0, 128], sizes = [8, 128], strides = [1, 1]} : vector<8x512xf32> to vector<8x128xf32>
    %424 = arith.negf %423 : vector<8x128xf32>
    %425 = math.exp %424 : vector<8x128xf32>
    %cst_147 = arith.constant 1.000000e+00 : f32
    %426 = vector.broadcast %cst_147 : f32 to vector<8x128xf32>
    %427 = arith.addf %426, %425 : vector<8x128xf32>
    %428 = arith.divf %426, %427 : vector<8x128xf32>
    %429 = vector.extract_strided_slice %416 {offsets = [0, 256], sizes = [8, 128], strides = [1, 1]} : vector<8x512xf32> to vector<8x128xf32>
    %430 = math.tanh %429 : vector<8x128xf32>
    %431 = vector.extract_strided_slice %416 {offsets = [0, 384], sizes = [8, 128], strides = [1, 1]} : vector<8x512xf32> to vector<8x128xf32>
    %432 = arith.negf %431 : vector<8x128xf32>
    %433 = math.exp %432 : vector<8x128xf32>
    %cst_148 = arith.constant 1.000000e+00 : f32
    %434 = vector.broadcast %cst_148 : f32 to vector<8x128xf32>
    %435 = arith.addf %434, %433 : vector<8x128xf32>
    %436 = arith.divf %434, %435 : vector<8x128xf32>
    %437 = arith.mulf %428, %407 : vector<8x128xf32>
    %438 = arith.mulf %422, %430 : vector<8x128xf32>
    %439 = arith.addf %437, %438 : vector<8x128xf32>
    %440 = math.tanh %439 : vector<8x128xf32>
    %441 = arith.mulf %436, %440 : vector<8x128xf32>
    %c4_149 = arith.constant 4 : index
    %c0_150 = arith.constant 0 : index
    %c0_151 = arith.constant 0 : index
    %442 = vector.load %arg6[%c4_149, %c0_150, %c0_151] : memref<8x8x128xf32, #tpu.memory_space<vmem>>, vector<1x8x128xf32>
    %443 = vector.shape_cast %442 : vector<1x8x128xf32> to vector<8x128xf32>
    %444 = vector.shape_cast %441 : vector<8x128xf32> to vector<1x8x128xf32>
    tpu.vector_store %arg6[%c4_149, %c0_150, %c0_151], %444 {strides = array<i32>} : memref<8x8x128xf32, #tpu.memory_space<vmem>>, vector<1x8x128xf32>,
    %c5_152 = arith.constant 5 : index
    %c0_153 = arith.constant 0 : index
    %c0_154 = arith.constant 0 : index
    %445 = vector.load %arg7[%c5_152, %c0_153, %c0_154] : memref<8x8x512xf32, #tpu.memory_space<vmem>>, vector<1x8x512xf32>
    %446 = vector.shape_cast %445 : vector<1x8x512xf32> to vector<8x512xf32>
    %cst_155 = arith.constant dense<0.000000e+00> : vector<8x512xf32>
    %447 = tpu.matmul %441, %284, %cst_155 {dimension_numbers = #tpu.dot_dimension_numbers<[1], [0], [0], [1], [0, 0, 1, 1], [], []>} : vector<8x128xf32>, vector<128x512xf32>, vector<8x512xf32> -> vector<8x512xf32>
    %448 = arith.addf %446, %447 : vector<8x512xf32>
    %449 = vector.extract_strided_slice %448 {offsets = [0, 0], sizes = [8, 128], strides = [1, 1]} : vector<8x512xf32> to vector<8x128xf32>
    %450 = arith.negf %449 : vector<8x128xf32>
    %451 = math.exp %450 : vector<8x128xf32>
    %cst_156 = arith.constant 1.000000e+00 : f32
    %452 = vector.broadcast %cst_156 : f32 to vector<8x128xf32>
    %453 = arith.addf %452, %451 : vector<8x128xf32>
    %454 = arith.divf %452, %453 : vector<8x128xf32>
    %455 = vector.extract_strided_slice %448 {offsets = [0, 128], sizes = [8, 128], strides = [1, 1]} : vector<8x512xf32> to vector<8x128xf32>
    %456 = arith.negf %455 : vector<8x128xf32>
    %457 = math.exp %456 : vector<8x128xf32>
    %cst_157 = arith.constant 1.000000e+00 : f32
    %458 = vector.broadcast %cst_157 : f32 to vector<8x128xf32>
    %459 = arith.addf %458, %457 : vector<8x128xf32>
    %460 = arith.divf %458, %459 : vector<8x128xf32>
    %461 = vector.extract_strided_slice %448 {offsets = [0, 256], sizes = [8, 128], strides = [1, 1]} : vector<8x512xf32> to vector<8x128xf32>
    %462 = math.tanh %461 : vector<8x128xf32>
    %463 = vector.extract_strided_slice %448 {offsets = [0, 384], sizes = [8, 128], strides = [1, 1]} : vector<8x512xf32> to vector<8x128xf32>
    %464 = arith.negf %463 : vector<8x128xf32>
    %465 = math.exp %464 : vector<8x128xf32>
    %cst_158 = arith.constant 1.000000e+00 : f32
    %466 = vector.broadcast %cst_158 : f32 to vector<8x128xf32>
    %467 = arith.addf %466, %465 : vector<8x128xf32>
    %468 = arith.divf %466, %467 : vector<8x128xf32>
    %469 = arith.mulf %460, %439 : vector<8x128xf32>
    %470 = arith.mulf %454, %462 : vector<8x128xf32>
    %471 = arith.addf %469, %470 : vector<8x128xf32>
    %472 = math.tanh %471 : vector<8x128xf32>
    %473 = arith.mulf %468, %472 : vector<8x128xf32>
    %c5_159 = arith.constant 5 : index
    %c0_160 = arith.constant 0 : index
    %c0_161 = arith.constant 0 : index
    %474 = vector.load %arg6[%c5_159, %c0_160, %c0_161] : memref<8x8x128xf32, #tpu.memory_space<vmem>>, vector<1x8x128xf32>
    %475 = vector.shape_cast %474 : vector<1x8x128xf32> to vector<8x128xf32>
    %476 = vector.shape_cast %473 : vector<8x128xf32> to vector<1x8x128xf32>
    tpu.vector_store %arg6[%c5_159, %c0_160, %c0_161], %476 {strides = array<i32>} : memref<8x8x128xf32, #tpu.memory_space<vmem>>, vector<1x8x128xf32>,
    %c6_162 = arith.constant 6 : index
    %c0_163 = arith.constant 0 : index
    %c0_164 = arith.constant 0 : index
    %477 = vector.load %arg7[%c6_162, %c0_163, %c0_164] : memref<8x8x512xf32, #tpu.memory_space<vmem>>, vector<1x8x512xf32>
    %478 = vector.shape_cast %477 : vector<1x8x512xf32> to vector<8x512xf32>
    %cst_165 = arith.constant dense<0.000000e+00> : vector<8x512xf32>
    %479 = tpu.matmul %473, %284, %cst_165 {dimension_numbers = #tpu.dot_dimension_numbers<[1], [0], [0], [1], [0, 0, 1, 1], [], []>} : vector<8x128xf32>, vector<128x512xf32>, vector<8x512xf32> -> vector<8x512xf32>
    %480 = arith.addf %478, %479 : vector<8x512xf32>
    %481 = vector.extract_strided_slice %480 {offsets = [0, 0], sizes = [8, 128], strides = [1, 1]} : vector<8x512xf32> to vector<8x128xf32>
    %482 = arith.negf %481 : vector<8x128xf32>
    %483 = math.exp %482 : vector<8x128xf32>
    %cst_166 = arith.constant 1.000000e+00 : f32
    %484 = vector.broadcast %cst_166 : f32 to vector<8x128xf32>
    %485 = arith.addf %484, %483 : vector<8x128xf32>
    %486 = arith.divf %484, %485 : vector<8x128xf32>
    %487 = vector.extract_strided_slice %480 {offsets = [0, 128], sizes = [8, 128], strides = [1, 1]} : vector<8x512xf32> to vector<8x128xf32>
    %488 = arith.negf %487 : vector<8x128xf32>
    %489 = math.exp %488 : vector<8x128xf32>
    %cst_167 = arith.constant 1.000000e+00 : f32
    %490 = vector.broadcast %cst_167 : f32 to vector<8x128xf32>
    %491 = arith.addf %490, %489 : vector<8x128xf32>
    %492 = arith.divf %490, %491 : vector<8x128xf32>
    %493 = vector.extract_strided_slice %480 {offsets = [0, 256], sizes = [8, 128], strides = [1, 1]} : vector<8x512xf32> to vector<8x128xf32>
    %494 = math.tanh %493 : vector<8x128xf32>
    %495 = vector.extract_strided_slice %480 {offsets = [0, 384], sizes = [8, 128], strides = [1, 1]} : vector<8x512xf32> to vector<8x128xf32>
    %496 = arith.negf %495 : vector<8x128xf32>
    %497 = math.exp %496 : vector<8x128xf32>
    %cst_168 = arith.constant 1.000000e+00 : f32
    %498 = vector.broadcast %cst_168 : f32 to vector<8x128xf32>
    %499 = arith.addf %498, %497 : vector<8x128xf32>
    %500 = arith.divf %498, %499 : vector<8x128xf32>
    %501 = arith.mulf %492, %471 : vector<8x128xf32>
    %502 = arith.mulf %486, %494 : vector<8x128xf32>
    %503 = arith.addf %501, %502 : vector<8x128xf32>
    %504 = math.tanh %503 : vector<8x128xf32>
    %505 = arith.mulf %500, %504 : vector<8x128xf32>
    %c6_169 = arith.constant 6 : index
    %c0_170 = arith.constant 0 : index
    %c0_171 = arith.constant 0 : index
    %506 = vector.load %arg6[%c6_169, %c0_170, %c0_171] : memref<8x8x128xf32, #tpu.memory_space<vmem>>, vector<1x8x128xf32>
    %507 = vector.shape_cast %506 : vector<1x8x128xf32> to vector<8x128xf32>
    %508 = vector.shape_cast %505 : vector<8x128xf32> to vector<1x8x128xf32>
    tpu.vector_store %arg6[%c6_169, %c0_170, %c0_171], %508 {strides = array<i32>} : memref<8x8x128xf32, #tpu.memory_space<vmem>>, vector<1x8x128xf32>,
    %c7_172 = arith.constant 7 : index
    %c0_173 = arith.constant 0 : index
    %c0_174 = arith.constant 0 : index
    %509 = vector.load %arg7[%c7_172, %c0_173, %c0_174] : memref<8x8x512xf32, #tpu.memory_space<vmem>>, vector<1x8x512xf32>
    %510 = vector.shape_cast %509 : vector<1x8x512xf32> to vector<8x512xf32>
    %cst_175 = arith.constant dense<0.000000e+00> : vector<8x512xf32>
    %511 = tpu.matmul %505, %284, %cst_175 {dimension_numbers = #tpu.dot_dimension_numbers<[1], [0], [0], [1], [0, 0, 1, 1], [], []>} : vector<8x128xf32>, vector<128x512xf32>, vector<8x512xf32> -> vector<8x512xf32>
    %512 = arith.addf %510, %511 : vector<8x512xf32>
    %513 = vector.extract_strided_slice %512 {offsets = [0, 0], sizes = [8, 128], strides = [1, 1]} : vector<8x512xf32> to vector<8x128xf32>
    %514 = arith.negf %513 : vector<8x128xf32>
    %515 = math.exp %514 : vector<8x128xf32>
    %cst_176 = arith.constant 1.000000e+00 : f32
    %516 = vector.broadcast %cst_176 : f32 to vector<8x128xf32>
    %517 = arith.addf %516, %515 : vector<8x128xf32>
    %518 = arith.divf %516, %517 : vector<8x128xf32>
    %519 = vector.extract_strided_slice %512 {offsets = [0, 128], sizes = [8, 128], strides = [1, 1]} : vector<8x512xf32> to vector<8x128xf32>
    %520 = arith.negf %519 : vector<8x128xf32>
    %521 = math.exp %520 : vector<8x128xf32>
    %cst_177 = arith.constant 1.000000e+00 : f32
    %522 = vector.broadcast %cst_177 : f32 to vector<8x128xf32>
    %523 = arith.addf %522, %521 : vector<8x128xf32>
    %524 = arith.divf %522, %523 : vector<8x128xf32>
    %525 = vector.extract_strided_slice %512 {offsets = [0, 256], sizes = [8, 128], strides = [1, 1]} : vector<8x512xf32> to vector<8x128xf32>
    %526 = math.tanh %525 : vector<8x128xf32>
    %527 = vector.extract_strided_slice %512 {offsets = [0, 384], sizes = [8, 128], strides = [1, 1]} : vector<8x512xf32> to vector<8x128xf32>
    %528 = arith.negf %527 : vector<8x128xf32>
    %529 = math.exp %528 : vector<8x128xf32>
    %cst_178 = arith.constant 1.000000e+00 : f32
    %530 = vector.broadcast %cst_178 : f32 to vector<8x128xf32>
    %531 = arith.addf %530, %529 : vector<8x128xf32>
    %532 = arith.divf %530, %531 : vector<8x128xf32>
    %533 = arith.mulf %524, %503 : vector<8x128xf32>
    %534 = arith.mulf %518, %526 : vector<8x128xf32>
    %535 = arith.addf %533, %534 : vector<8x128xf32>
    %536 = math.tanh %535 : vector<8x128xf32>
    %537 = arith.mulf %532, %536 : vector<8x128xf32>
    %c7_179 = arith.constant 7 : index
    %c0_180 = arith.constant 0 : index
    %c0_181 = arith.constant 0 : index
    %538 = vector.load %arg6[%c7_179, %c0_180, %c0_181] : memref<8x8x128xf32, #tpu.memory_space<vmem>>, vector<1x8x128xf32>
    %539 = vector.shape_cast %538 : vector<1x8x128xf32> to vector<8x128xf32>
    %540 = vector.shape_cast %537 : vector<8x128xf32> to vector<1x8x128xf32>
    tpu.vector_store %arg6[%c7_179, %c0_180, %c0_181], %540 {strides = array<i32>} : memref<8x8x128xf32, #tpu.memory_space<vmem>>, vector<1x8x128xf32>,
    return
  }
  func.func @transform_0(%arg0: i32) -> (i32, i32) {
    %c0_i32 = arith.constant 0 : i32
    %c0_i32_0 = arith.constant 0 : i32
    %c0_i32_1 = arith.constant 0 : i32
    return %c0_i32, %c0_i32_0 : i32, i32
  }
  func.func @transform_1(%arg0: i32) -> (i32, i32) {
    %c0_i32 = arith.constant 0 : i32
    %c0_i32_0 = arith.constant 0 : i32
    %c0_i32_1 = arith.constant 0 : i32
    return %c0_i32, %c0_i32_0 : i32, i32
  }
  func.func @transform_2(%arg0: i32) -> (i32, i32, i32) {
    %c0_i32 = arith.constant 0 : i32
    %c0_i32_0 = arith.constant 0 : i32
    %c0_i32_1 = arith.constant 0 : i32
    %c0_i32_2 = arith.constant 0 : i32
    return %c0_i32, %c0_i32_0, %c0_i32_1 : i32, i32, i32
  }
  func.func @transform_3(%arg0: i32) -> (i32, i32, i32) {
    %c0_i32 = arith.constant 0 : i32
    %c0_i32_0 = arith.constant 0 : i32
    %c0_i32_1 = arith.constant 0 : i32
    %c0_i32_2 = arith.constant 0 : i32
    return %c0_i32, %c0_i32_0, %c0_i32_1 : i32, i32, i32
  }
  func.func @transform_4(%arg0: i32) -> (i32, i32, i32) {
    %c0_i32 = arith.constant 0 : i32
    %c0_i32_0 = arith.constant 0 : i32
    %c0_i32_1 = arith.constant 0 : i32
    %c0_i32_2 = arith.constant 0 : i32
    return %c0_i32, %c0_i32_0, %c0_i32_1 : i32, i32, i32
  }
  func.func @transform_5(%arg0: i32) -> (i32, i32, i32) {
    %c0_i32 = arith.constant 0 : i32
    %c0_i32_0 = arith.constant 0 : i32
    %c0_i32_1 = arith.constant 0 : i32
    %c0_i32_2 = arith.constant 0 : i32
    return %c0_i32, %c0_i32_0, %c0_i32_1 : i32, i32, i32
  }
}

</mosaic_0001>

<bundles_post_ra>
// kernel: backbone_forward.1
= control target key start
LH: loop header
LB: loop body
LE: loop exit
PB: predicated region body
PF: predicated region fallthrough
CT: control target
= control target key end

     0   :  { %10 = vsyncpa [#allocation5], 0  ;;  %s6427_s0 = inlined_call_operand.vmem [shape: s32[64,1], index: 0, kind: input, shape index: {}]   ;;  %s6428_s1 = inlined_call_operand.hbm [shape: f32[128,512], index: 1, kind: input, shape index: {}]   ;;  %s6429_s2 = inlined_call_operand.hbm [shape: f32[1,128,512], index: 2, kind: input, shape index: {}]   ;;  %s6430_s3 = inlined_call_operand.hbm [shape: f32[2,128,512], index: 3, kind: input, shape index: {}]   ;;  %s6431_s4 = inlined_call_operand.vmem [shape: f32[1,1,512], index: 4, kind: input, shape index: {}]   ;;  %s6432_s5 = inlined_call_operand.vmem [shape: f32[8,8,128], index: 5, kind: output, shape index: {}]  }
   0x1   :  { %11 = vsyncpa [#allocation7], 0  ;;  %s5412_s18 = smov [#allocation6]   ;;  %s5413_s20 = smov [#allocation4]  }
   0x2   :  { %s31_s19 = sshll.u32 %s5412_s18, 4  ;;  %s19_s21 = sshll.u32 %s5413_s20, 4  ;;  %s32_s19 = int_to_ptr.vmem [resolvable:$true] %s31_s19  ;;  %s5450_s21 = int_to_ptr.vmem [resolvable:$true] %s19_s21 }
   0x3   :  { %s5342_s24 = scalar_lea.hbm %s6429_s2, 8192 }
   0x4   :  { %p5343_p0 = scmp.ne.s32.totalorder %s6429_s2, %s5342_s24  ;;  %p5346_p1 = scmp.lt.u32.totalorder %s5342_s24, %s6429_s2 }
   0x6   :  { %p5348_p2 = pnand %p5346_p1, %p5343_p0 }
   0x8   :  { %5351 = shalt.err (!%p5348_p2)
}
   0x9   :  { %s5352_s29 = scalar_lea.vmem %s32_s19, 8192  ;;  %p5357_p4 = scmp.lt.s32.totalorder %s32_s19, %s32_s19 }
   0xa   :  { %p5353_p3 = scmp.ne.s32.totalorder %s32_s19, %s5352_s29  ;;  %p5358_p5 = scmp.lt.s32.totalorder %s5352_s29, %s5352_s29 }
   0xc   :  { %p5359_p6 = por %p5358_p5, %p5357_p4 }
   0xe   :  { %p5360_p7 = pnand %p5359_p6, %p5353_p3 }
  0x10   :  { %5363 = shalt.err (!%p5360_p7)
}
  0x11   :  { %s5414_s30 = smov 512   ;;  %s5415_s6 = smov 32  }
  0x12   :  { %37 = dma.hbm_to_vmem [thread:$0]  %s6429_s2, 8192, %s32_s19, [#allocation7], %s5414_s30, %s5414_s30, %s5415_s6  }
  0x13   :  { %s5364_s11 = scalar_lea.hbm %s6428_s1, 8192 }
  0x14   :  { %p5365_p8 = scmp.ne.s32.totalorder %s6428_s1, %s5364_s11  ;;  %p5368_p9 = scmp.lt.u32.totalorder %s5364_s11, %s6428_s1 }
  0x16   :  { %p5370_p10 = pnand %p5368_p9, %p5365_p8 }
  0x18   :  { %5373 = shalt.err (!%p5370_p10)
}
  0x19   :  { %s5374_s16 = scalar_lea.vmem %s5450_s21, 8192  ;;  %p5379_p12 = scmp.lt.s32.totalorder %s5450_s21, %s5450_s21 }
  0x1a   :  { %p5375_p11 = scmp.ne.s32.totalorder %s5450_s21, %s5374_s16  ;;  %p5380_p13 = scmp.lt.s32.totalorder %s5374_s16, %s5374_s16 }
  0x1c   :  { %p5381_p0 = por %p5380_p13, %p5379_p12 }
  0x1e   :  { %p5382_p1 = pnand %p5381_p0, %p5375_p11 }
  0x20   :  { %5385 = shalt.err (!%p5382_p1)
}
  0x21   :  { %25 = dma.hbm_to_vmem [thread:$0]  %s6428_s1, 8192, %s5450_s21, [#allocation5], %s5414_s30, %s5414_s30, %s5415_s6  }
  0x22   :  { %s5416_s18 = smov [#allocation8]   ;;  %s5386_s23 = scalar_lea.hbm %s6430_s3, 16384 }
  0x23   :  { %s43_s19 = sshll.u32 %s5416_s18, 4  ;;  %p5387_p2 = scmp.ne.s32.totalorder %s6430_s3, %s5386_s23  ;;  %s44_s19 = int_to_ptr.vmem [resolvable:$true] %s43_s19 }
  0x24   :  { %p5390_p3 = scmp.lt.u32.totalorder %s5386_s23, %s6430_s3 }
  0x26   :  { %p5392_p4 = pnand %p5390_p3, %p5387_p2 }
  0x28   :  { %5395 = shalt.err (!%p5392_p4)
}
  0x29   :  { %s5396_s28 = scalar_lea.vmem %s44_s19, 16384  ;;  %p5401_p6 = scmp.lt.s32.totalorder %s44_s19, %s44_s19 }
  0x2a   :  { %p5397_p5 = scmp.ne.s32.totalorder %s44_s19, %s5396_s28  ;;  %p5402_p7 = scmp.lt.s32.totalorder %s5396_s28, %s5396_s28 }
  0x2c   :  { %p5403_p8 = por %p5402_p7, %p5401_p6 }
  0x2e   :  { %p5404_p9 = pnand %p5403_p8, %p5397_p5 }
  0x30   :  { %5407 = shalt.err (!%p5404_p9)
}
  0x31   :  { %49 = dma.hbm_to_vmem [thread:$0]  %s6430_s3, 16384, %s44_s19, [#allocation7], %s5414_s30, %s5414_s30, %s5415_s6  }
  0x32   :  { %5408 = dma.done.wait [#allocation5], 8192  }
  0x33   :  { %5409 = vsyncadd [#allocation5], 4294959104 }
  0x34   :  { %5410 = dma.done.wait [#allocation7], 24576  }
  0x35   :  { %5411 = vsyncadd [#allocation7], 4294942720  ;;  %v5417_v0 = vmov 0   ;;  %v63_v1 = vld [vmem:[%s6427_s0 + $0x10] sm:$0xff]  ;;  %v61_v2 = vld [vmem:[%s6427_s0] sm:$0xff]  ;;  %v5418_v6 = vmov 0.0  }
  0x36   :  { %5085 = vset.pattern.permute.xlu1 %v5417_v0  ;;  %5084 = vset.pattern.permute.xlu0 %v5417_v0  ;;  %v64_v3 = vld [vmem:[%s6427_s0 + $0x18] sm:$0xff]  ;;  %v62_v4 = vld [vmem:[%s6427_s0 + $0x8] sm:$0xff]  ;;  %v119_v8 = vld [vmem:[#allocation4] sm:$0xff] }
  0x37   :  { %78 = vperm.xlu1 %5085, %v63_v1   ;;  %72 = vperm.xlu0 %5084, %v61_v2   ;;  %v120_v5 = vld [vmem:[#allocation4 + $0x8] sm:$0xff]  ;;  %v123_v9 = vld [vmem:[#allocation4 + $0x20] sm:$0xff]  ;;  %v122_v14 = vld [vmem:[#allocation4 + $0x18] sm:$0xff] }
  0x38   :  { %247 = vmatprep.mubr.f32.mxu0 %v5418_v6  ;;  %360 = vmatprep.mubr.f32.mxu1 %v5418_v6  ;;  %v124_v7 = vld [vmem:[#allocation4 + $0x28] sm:$0xff]  ;;  %v65_v11 = vld [vmem:[%s6427_s0 + $0x20] sm:$0xff]  ;;  %v3830_v13 = vpack.c.bf16 %v123_v9, %v119_v8  ;;  %v126_v15 = vld [vmem:[#allocation4 + $0x38] sm:$0xff] }
  0x39   :  { %v66_v10 = vld [vmem:[%s6427_s0 + $0x28] sm:$0xff]  ;;  %v3828_v12 = vpack.c.bf16 %v124_v7, %v120_v5  ;;  %v121_v16 = vld [vmem:[#allocation4 + $0x10] sm:$0xff]  ;;  %v3860_v17 = vpack.c.bf16 %v126_v15, %v122_v14  ;;  %v127_v23 = vld [vmem:[#allocation4 + $0x40] sm:$0xff] }
  0x3a   :  { %v125_v18 = vld [vmem:[#allocation4 + $0x30] sm:$0xff]  ;;  %v128_v19 = vld [vmem:[#allocation4 + $0x48] sm:$0xff]  ;;  %v131_v24 = vld [vmem:[#allocation4 + $0x60] sm:$0xff] }
  0x3b   :  { %81 = vperm.xlu1 %5085, %v64_v3   ;;  %75 = vperm.xlu0 %5084, %v62_v4   ;;  %v132_v20 = vld [vmem:[#allocation4 + $0x68] sm:$0xff]  ;;  %v3862_v21 = vpack.c.bf16 %v125_v18, %v121_v16  ;;  %v130_v25 = vld [vmem:[#allocation4 + $0x58] sm:$0xff]  ;;  %v3834_v26 = vpack.c.bf16 %v131_v24, %v127_v23  ;;  %v129_v28 = vld [vmem:[#allocation4 + $0x50] sm:$0xff] }
  0x3c   :  { %3829 = vmatprep.subr.bf16.mxu0 %v3828_v12  ;;  %v3832_v22 = vpack.c.bf16 %v132_v20, %v128_v19  ;;  %3861 = vmatprep.subr.bf16.mxu1 %v3860_v17  ;;  %v134_v27 = vld [vmem:[#allocation4 + $0x78] sm:$0xff]  ;;  %v133_v29 = vld [vmem:[#allocation4 + $0x70] sm:$0xff]  ;;  %v136_v34 = vld [vmem:[#allocation4 + $0x88] sm:$0xff] }
  0x3d   :  { %3831 = vmatpush1.bf16.msra.mxu0 %v3830_v13  ;;  %v68_v30 = vld [vmem:[%s6427_s0 + $0x38] sm:$0xff]  ;;  %v67_v31 = vld [vmem:[%s6427_s0 + $0x30] sm:$0xff]  ;;  %3863 = vmatpush1.bf16.msra.mxu1 %v3862_v21  ;;  %v3864_v32 = vpack.c.bf16 %v134_v27, %v130_v25  ;;  %v3866_v33 = vpack.c.bf16 %v133_v29, %v129_v28  ;;  %v140_v35 = vld [vmem:[#allocation4 + $0xa8] sm:$0xff] }
  0x3e   :  { %3833 = vmatprep.subr.bf16.mxu0 %v3832_v22  ;;  %v135_v36 = vld [vmem:[#allocation4 + $0x80] sm:$0xff]  ;;  %v3836_v37 = vpack.c.bf16 %v140_v35, %v136_v34  ;;  %v138_v39 = vld [vmem:[#allocation4 + $0x98] sm:$0xff]  ;;  %v137_v42 = vld [vmem:[#allocation4 + $0x90] sm:$0xff] }
  0x3f   :  { %87 = vperm.xlu1 %5085, %v66_v10   ;;  %84 = vperm.xlu0 %5084, %v65_v11   ;;  %v139_v38 = vld [vmem:[#allocation4 + $0xa0] sm:$0xff]  ;;  %v142_v40 = vld [vmem:[#allocation4 + $0xb8] sm:$0xff]  ;;  %v141_v43 = vld [vmem:[#allocation4 + $0xb0] sm:$0xff] }
  0x40   :  { %3865 = vmatprep.subr.bf16.mxu1 %v3864_v32  ;;  %v3868_v41 = vpack.c.bf16 %v142_v40, %v138_v39  ;;  %v144_v44 = vld [vmem:[#allocation4 + $0xc8] sm:$0xff]  ;;  %v3838_v45 = vpack.c.bf16 %v139_v38, %v135_v36  ;;  %v143_v47 = vld [vmem:[#allocation4 + $0xc0] sm:$0xff]  ;;  %v3870_v49 = vpack.c.bf16 %v141_v43, %v137_v42  ;;  %v146_v51 = vld [vmem:[#allocation4 + $0xd8] sm:$0xff] }
  0x41   :  { %3835 = vmatpush1.bf16.msra.mxu0 %v3834_v26  ;;  %v148_v46 = vld [vmem:[#allocation4 + $0xe8] sm:$0xff]  ;;  %v147_v48 = vld [vmem:[#allocation4 + $0xe0] sm:$0xff]  ;;  %3867 = vmatpush1.bf16.msra.mxu1 %v3866_v33  ;;  %v150_v52 = vld [vmem:[#allocation4 + $0xf8] sm:$0xff] }
  0x42   :  { %3837 = vmatprep.subr.bf16.mxu0 %v3836_v37  ;;  %v3840_v50 = vpack.c.bf16 %v148_v46, %v144_v44  ;;  %v145_v53 = vld [vmem:[#allocation4 + $0xd0] sm:$0xff]  ;;  %v3872_v54 = vpack.c.bf16 %v150_v52, %v146_v51  ;;  %v152_v56 = vld [vmem:[#allocation4 + $0x108] sm:$0xff]  ;;  %3869 = vmatprep.subr.bf16.mxu1 %v3868_v41  ;;  %v154_v58 = vld [vmem:[#allocation4 + $0x118] sm:$0xff]  ;;  %v3842_v59 = vpack.c.bf16 %v147_v48, %v143_v47 }
  0x43   :  { %93 = vperm.xlu1 %5085, %v68_v30   ;;  %90 = vperm.xlu0 %5084, %v67_v31   ;;  %v149_v55 = vld [vmem:[#allocation4 + $0xf0] sm:$0xff]  ;;  %v156_v57 = vld [vmem:[#allocation4 + $0x128] sm:$0xff]  ;;  %v158_v60 = vld [vmem:[#allocation4 + $0x138] sm:$0xff] }
  0x44   :  { %v3874_v61 = vpack.c.bf16 %v149_v55, %v145_v53  ;;  %v3844_v62 = vpack.c.bf16 %v156_v57, %v152_v56  ;;  %v151_v63 = vld [vmem:[#allocation4 + $0x100] sm:$0xff]  ;;  %v153_v1 = vld [vmem:[#allocation4 + $0x110] sm:$0xff]  ;;  %v3876_v2 = vpack.c.bf16 %v158_v60, %v154_v58  ;;  %v160_v4 = vld [vmem:[#allocation4 + $0x148] sm:$0xff] }
  0x45   :  { %3839 = vmatpush1.bf16.msra.mxu0 %v3838_v45  ;;  %3871 = vmatpush1.bf16.msra.mxu1 %v3870_v49  ;;  %v155_v0 = vld [vmem:[#allocation4 + $0x120] sm:$0xff]  ;;  %v157_v3 = vld [vmem:[#allocation4 + $0x130] sm:$0xff]  ;;  %v164_v5 = vld [vmem:[#allocation4 + $0x168] sm:$0xff]  ;;  %v69_v49 = vlaneseq }
  0x46   :  { %3841 = vmatprep.subr.bf16.mxu0 %v3840_v50  ;;  %3873 = vmatprep.subr.bf16.mxu1 %v3872_v54  ;;  %v162_v7 = vld [vmem:[#allocation4 + $0x158] sm:$0xff]  ;;  %v3846_v9 = vpack.c.bf16 %v155_v0, %v151_v63  ;;  %v3878_v10 = vpack.c.bf16 %v157_v3, %v153_v1  ;;  %v3848_v11 = vpack.c.bf16 %v164_v5, %v160_v4  ;;  %v159_v12 = vld [vmem:[#allocation4 + $0x140] sm:$0xff]  ;;  %v161_v14 = vld [vmem:[#allocation4 + $0x150] sm:$0xff]  ;;  %v5419_v5 = vmov 1.0  }
  0x47   :  { %v166_v8 = vld [vmem:[#allocation4 + $0x178] sm:$0xff]  ;;  %v163_v13 = vld [vmem:[#allocation4 + $0x160] sm:$0xff]  ;;  %v165_v16 = vld [vmem:[#allocation4 + $0x170] sm:$0xff]  ;;  %v5535_v54 = vand.u32 127, %v69_v49 }
  0x48   :  { %v3880_v15 = vpack.c.bf16 %v166_v8, %v162_v7  ;;  %v168_v17 = vld [vmem:[#allocation4 + $0x188] sm:$0xff]  ;;  %v170_v19 = vld [vmem:[#allocation4 + $0x198] sm:$0xff]  ;;  %v3850_v21 = vpack.c.bf16 %v163_v13, %v159_v12  ;;  %v3882_v22 = vpack.c.bf16 %v165_v16, %v161_v14  ;;  %v167_v24 = vld [vmem:[#allocation4 + $0x180] sm:$0xff] }
  0x49   :  { %3843 = vmatpush1.bf16.msra.mxu0 %v3842_v59  ;;  %3875 = vmatpush1.bf16.msra.mxu1 %v3874_v61  ;;  %v172_v18 = vld [vmem:[#allocation4 + $0x1a8] sm:$0xff]  ;;  %v174_v20 = vld [vmem:[#allocation4 + $0x1b8] sm:$0xff]  ;;  %v171_v25 = vld [vmem:[#allocation4 + $0x1a0] sm:$0xff] }
  0x4a   :  { %3845 = vmatprep.subr.bf16.mxu0 %v3844_v62  ;;  %3877 = vmatprep.subr.bf16.mxu1 %v3876_v2  ;;  %v3852_v23 = vpack.c.bf16 %v172_v18, %v168_v17  ;;  %v169_v26 = vld [vmem:[#allocation4 + $0x190] sm:$0xff]  ;;  %v3884_v27 = vpack.c.bf16 %v174_v20, %v170_v19  ;;  %v176_v29 = vld [vmem:[#allocation4 + $0x1c8] sm:$0xff]  ;;  %v178_v31 = vld [vmem:[#allocation4 + $0x1d8] sm:$0xff]  ;;  %v3854_v33 = vpack.c.bf16 %v171_v25, %v167_v24 }
  0x4b   :  { %v173_v28 = vld [vmem:[#allocation4 + $0x1b0] sm:$0xff]  ;;  %v180_v30 = vld [vmem:[#allocation4 + $0x1e8] sm:$0xff]  ;;  %v182_v32 = vld [vmem:[#allocation4 + $0x1f8] sm:$0xff] }
  0x4c   :  { %v3886_v34 = vpack.c.bf16 %v173_v28, %v169_v26  ;;  %v3856_v35 = vpack.c.bf16 %v180_v30, %v176_v29  ;;  %v175_v36 = vld [vmem:[#allocation4 + $0x1c0] sm:$0xff]  ;;  %v177_v38 = vld [vmem:[#allocation4 + $0x1d0] sm:$0xff]  ;;  %v3888_v39 = vpack.c.bf16 %v182_v32, %v178_v31  ;;  %v442_v41 = vld [vmem:[#allocation8 + $0x8] sm:$0xff] }
  0x4d   :  { %3847 = vmatpush1.bf16.msra.mxu0 %v3846_v9  ;;  %3879 = vmatpush1.bf16.msra.mxu1 %v3878_v10  ;;  %v179_v37 = vld [vmem:[#allocation4 + $0x1e0] sm:$0xff]  ;;  %v181_v40 = vld [vmem:[#allocation4 + $0x1f0] sm:$0xff]  ;;  %v446_v42 = vld [vmem:[#allocation8 + $0x28] sm:$0xff] }
  0x4e   :  { %3849 = vmatprep.subr.bf16.mxu0 %v3848_v11  ;;  %3881 = vmatprep.subr.bf16.mxu1 %v3880_v15  ;;  %v444_v43 = vld [vmem:[#allocation8 + $0x18] sm:$0xff]  ;;  %v3858_v45 = vpack.c.bf16 %v179_v37, %v175_v36  ;;  %v3890_v46 = vpack.c.bf16 %v181_v40, %v177_v38  ;;  %v5528_v47 = vpack.c.bf16 %v446_v42, %v442_v41  ;;  %v441_v50 = vld [vmem:[#allocation8] sm:$0xff]  ;;  %v443_v52 = vld [vmem:[#allocation8 + $0x10] sm:$0xff] }
  0x4f   :  { %v448_v44 = vld [vmem:[#allocation8 + $0x38] sm:$0xff]  ;;  %v445_v51 = vld [vmem:[#allocation8 + $0x20] sm:$0xff]  ;;  %v447_v53 = vld [vmem:[#allocation8 + $0x30] sm:$0xff] }
  0x50   :  { %v5530_v48 = vpack.c.bf16 %v448_v44, %v444_v43  ;;  %v450_v55 = vld [vmem:[#allocation8 + $0x48] sm:$0xff]  ;;  %v452_v57 = vld [vmem:[#allocation8 + $0x58] sm:$0xff]  ;;  %v5537_v59 = vpack.c.bf16 %v445_v51, %v441_v50  ;;  %v5539_v60 = vpack.c.bf16 %v447_v53, %v443_v52  ;;  %v449_v61 = vld [vmem:[#allocation8 + $0x40] sm:$0xff] }
  0x51   :  { %3851 = vmatpush1.bf16.msra.mxu0 %v3850_v21  ;;  %3883 = vmatpush1.bf16.msra.mxu1 %v3882_v22  ;;  %v454_v56 = vld [vmem:[#allocation8 + $0x68] sm:$0xff]  ;;  %v456_v58 = vld [vmem:[#allocation8 + $0x78] sm:$0xff]  ;;  %v453_v63 = vld [vmem:[#allocation8 + $0x60] sm:$0xff] }
  0x52   :  { %3853 = vmatprep.subr.bf16.mxu0 %v3852_v23  ;;  %3885 = vmatprep.subr.bf16.mxu1 %v3884_v27  ;;  %v451_v0 = vld [vmem:[#allocation8 + $0x50] sm:$0xff]  ;;  %v5542_v2 = vpack.c.bf16 %v454_v56, %v450_v55  ;;  %v5544_v3 = vpack.c.bf16 %v456_v58, %v452_v57  ;;  %v458_v4 = vld [vmem:[#allocation8 + $0x88] sm:$0xff]  ;;  %v460_v8 = vld [vmem:[#allocation8 + $0x98] sm:$0xff]  ;;  %v5550_v10 = vpack.c.bf16 %v453_v63, %v449_v61 }
  0x53   :  { %v455_v1 = vld [vmem:[#allocation8 + $0x70] sm:$0xff]  ;;  %v462_v7 = vld [vmem:[#allocation8 + $0xa8] sm:$0xff]  ;;  %v464_v9 = vld [vmem:[#allocation8 + $0xb8] sm:$0xff] }
  0x54   :  { %v5552_v11 = vpack.c.bf16 %v455_v1, %v451_v0  ;;  %v457_v12 = vld [vmem:[#allocation8 + $0x80] sm:$0xff]  ;;  %v459_v15 = vld [vmem:[#allocation8 + $0x90] sm:$0xff]  ;;  %v5559_v17 = vpack.c.bf16 %v462_v7, %v458_v4  ;;  %v5561_v18 = vpack.c.bf16 %v464_v9, %v460_v8  ;;  %v466_v19 = vld [vmem:[#allocation8 + $0xc8] sm:$0xff] }
  0x55   :  { %3855 = vmatpush1.bf16.msra.mxu0 %v3854_v33  ;;  %3887 = vmatpush1.bf16.msra.mxu1 %v3886_v34  ;;  %v461_v14 = vld [vmem:[#allocation8 + $0xa0] sm:$0xff]  ;;  %v463_v16 = vld [vmem:[#allocation8 + $0xb0] sm:$0xff]  ;;  %v470_v21 = vld [vmem:[#allocation8 + $0xe8] sm:$0xff] }
  0x56   :  { %3857 = vmatprep.subr.bf16.mxu0 %v3856_v35  ;;  %3889 = vmatprep.subr.bf16.mxu1 %v3888_v39  ;;  %v468_v22 = vld [vmem:[#allocation8 + $0xd8] sm:$0xff]  ;;  %v5568_v24 = vpack.c.bf16 %v461_v14, %v457_v12  ;;  %v5570_v25 = vpack.c.bf16 %v463_v16, %v459_v15  ;;  %v465_v26 = vld [vmem:[#allocation8 + $0xc0] sm:$0xff]  ;;  %v467_v28 = vld [vmem:[#allocation8 + $0xd0] sm:$0xff]  ;;  %v5576_v30 = vpack.c.bf16 %v470_v21, %v466_v19 }
  0x57   :  { %v472_v23 = vld [vmem:[#allocation8 + $0xf8] sm:$0xff]  ;;  %v469_v27 = vld [vmem:[#allocation8 + $0xe0] sm:$0xff]  ;;  %v471_v29 = vld [vmem:[#allocation8 + $0xf0] sm:$0xff] }
  0x58   :  { %v5578_v31 = vpack.c.bf16 %v472_v23, %v468_v22  ;;  %v474_v32 = vld [vmem:[#allocation8 + $0x108] sm:$0xff]  ;;  %v476_v34 = vld [vmem:[#allocation8 + $0x118] sm:$0xff]  ;;  %v5588_v36 = vpack.c.bf16 %v469_v27, %v465_v26  ;;  %v5590_v37 = vpack.c.bf16 %v471_v29, %v467_v28  ;;  %v473_v38 = vld [vmem:[#allocation8 + $0x100] sm:$0xff] }
  0x59   :  { %3859 = vmatpush1.bf16.msra.mxu0 %v3858_v45  ;;  %3891 = vmatpush1.bf16.msra.mxu1 %v3890_v46  ;;  %v478_v33 = vld [vmem:[#allocation8 + $0x128] sm:$0xff]  ;;  %v480_v35 = vld [vmem:[#allocation8 + $0x138] sm:$0xff]  ;;  %v477_v40 = vld [vmem:[#allocation8 + $0x120] sm:$0xff] }
  0x5a   :  { %3893 = vmatprep.subr.bf16.mxu0 %v5528_v47  ;;  %3925 = vmatprep.subr.bf16.mxu1 %v5530_v48  ;;  %v475_v41 = vld [vmem:[#allocation8 + $0x110] sm:$0xff]  ;;  %v5597_v43 = vpack.c.bf16 %v478_v33, %v474_v32  ;;  %v5599_v44 = vpack.c.bf16 %v480_v35, %v476_v34  ;;  %v482_v45 = vld [vmem:[#allocation8 + $0x148] sm:$0xff]  ;;  %v484_v51 = vld [vmem:[#allocation8 + $0x158] sm:$0xff]  ;;  %v5605_v53 = vpack.c.bf16 %v477_v40, %v473_v38 }
  0x5b   :  { %v479_v42 = vld [vmem:[#allocation8 + $0x130] sm:$0xff]  ;;  %v486_v50 = vld [vmem:[#allocation8 + $0x168] sm:$0xff]  ;;  %v488_v52 = vld [vmem:[#allocation8 + $0x178] sm:$0xff] }
  0x5c   :  { %v5607_v55 = vpack.c.bf16 %v479_v42, %v475_v41  ;;  %v481_v56 = vld [vmem:[#allocation8 + $0x140] sm:$0xff]  ;;  %v483_v58 = vld [vmem:[#allocation8 + $0x150] sm:$0xff]  ;;  %v5616_v63 = vpack.c.bf16 %v488_v52, %v484_v51  ;;  %v490_v0 = vld [vmem:[#allocation8 + $0x188] sm:$0xff] }
  0x5d   :  { %v485_v57 = vld [vmem:[#allocation8 + $0x160] sm:$0xff]  ;;  %v487_v61 = vld [vmem:[#allocation8 + $0x170] sm:$0xff]  ;;  %v494_v4 = vld [vmem:[#allocation8 + $0x1a8] sm:$0xff] }
  0x5e   :  { %v492_v7 = vld [vmem:[#allocation8 + $0x198] sm:$0xff]  ;;  %v5622_v9 = vpack.c.bf16 %v485_v57, %v481_v56  ;;  %v5624_v12 = vpack.c.bf16 %v487_v61, %v483_v58  ;;  %v493_v14 = vld [vmem:[#allocation8 + $0x1a0] sm:$0xff]  ;;  %v491_v15 = vld [vmem:[#allocation8 + $0x190] sm:$0xff]  ;;  %v5631_v19 = vpack.c.bf16 %v494_v4, %v490_v0 }
  0x5f   :  { %v496_v8 = vld [vmem:[#allocation8 + $0x1b8] sm:$0xff]  ;;  %v495_v16 = vld [vmem:[#allocation8 + $0x1b0] sm:$0xff]  ;;  %v498_v21 = vld [vmem:[#allocation8 + $0x1c8] sm:$0xff] }
  0x60   :  { %v502_v23 = vld [vmem:[#allocation8 + $0x1e8] sm:$0xff]  ;;  %v500_v26 = vld [vmem:[#allocation8 + $0x1d8] sm:$0xff]  ;;  %v5641_v29 = vpack.c.bf16 %v495_v16, %v491_v15  ;;  %v497_v32 = vld [vmem:[#allocation8 + $0x1c0] sm:$0xff] }
  0x61   :  { %v504_v27 = vld [vmem:[#allocation8 + $0x1f8] sm:$0xff]  ;;  %v501_v33 = vld [vmem:[#allocation8 + $0x1e0] sm:$0xff]  ;;  %v499_v34 = vld [vmem:[#allocation8 + $0x1d0] sm:$0xff]  ;;  %v5648_v38 = vpack.c.bf16 %v502_v23, %v498_v21 }
  0x62   :  { %v503_v35 = vld [vmem:[#allocation8 + $0x1f0] sm:$0xff]  ;;  %v5656_v41 = vpack.c.bf16 %v501_v33, %v497_v32 }
  0x63   :  { %v5658_v42 = vpack.c.bf16 %v503_v35, %v499_v34 }
  0xb6   :  { %v73_v62 = vpop.permute.xlu0 %72  ;;  %v79_v20 = vpop.permute.xlu1 %78 }
  0xb7   :  { %vm95_vm0 = vcmp.eq.s32.totalorder %v5535_v54, %v73_v62  ;;  %vm97_vm2 = vcmp.eq.s32.totalorder %v5535_v54, %v79_v20  ;;  %v5614_v62 = vpack.c.bf16 %v486_v50, %v482_v45  ;;  %v5633_v20 = vpack.c.bf16 %v496_v8, %v492_v7 }
  0xb8   :  { %3757 = vmatmul.mubr.msk.f32.vlgmr.msra.gmra.mrb[0].mxu0 %vm95_vm0, %v5419_v5  ;;  %3765 = vmatmul.mubr.msk.f32.vlgmr.msra.gmra.mrb[0].mxu1 %vm95_vm0, %v5419_v5 }
  0xb9   :  { %3895 = vmatpush1.bf16.msra.mxu0 %v5537_v59  ;;  %3927 = vmatpush1.bf16.msra.mxu1 %v5539_v60 }
  0xba   :  { %v76_v13 = vpop.permute.xlu0 %75  ;;  %253 = vmatprep.mubr.f32.mxu0 %v5418_v6  ;;  %366 = vmatprep.mubr.f32.mxu1 %v5418_v6  ;;  %v82_v39 = vpop.permute.xlu1 %81 }
  0xbb   :  { %vm96_vm1 = vcmp.eq.s32.totalorder %v5535_v54, %v76_v13  ;;  %3897 = vmatprep.subr.bf16.mxu0 %v5542_v2  ;;  %3929 = vmatprep.subr.bf16.mxu1 %v5544_v3  ;;  %vm98_vm3 = vcmp.eq.s32.totalorder %v5535_v54, %v82_v39  ;;  %v489_v13 = vld [vmem:[#allocation8 + $0x180] sm:$0xff]  ;;  %v5650_v39 = vpack.c.bf16 %v504_v27, %v500_v26 }
  0xbc   :  { %3758 = vmatmul.mubr.msk.f32.gmra.mrb[2].mxu0 %vm96_vm1, %v5419_v5  ;;  %3766 = vmatmul.mubr.msk.f32.gmra.mrb[2].mxu1 %vm96_vm1, %v5419_v5  ;;  %v5639_v28 = vpack.c.bf16 %v493_v14, %v489_v13 }
  0xbd   :  { %3899 = vmatpush1.bf16.msra.mxu0 %v5550_v10  ;;  %3931 = vmatpush1.bf16.msra.mxu1 %v5552_v11 }
  0xbe   :  { %259 = vmatprep.mubr.f32.mxu0 %v5418_v6  ;;  %372 = vmatprep.mubr.f32.mxu1 %v5418_v6  ;;  %v85_v46 = vpop.permute.xlu0 %84  ;;  %v88_v1 = vpop.permute.xlu1 %87 }
  0xbf   :  { %3901 = vmatprep.subr.bf16.mxu0 %v5559_v17  ;;  %3933 = vmatprep.subr.bf16.mxu1 %v5561_v18  ;;  %vm99_vm4 = vcmp.eq.s32.totalorder %v5535_v54, %v85_v46  ;;  %vm100_vm5 = vcmp.eq.s32.totalorder %v5535_v54, %v88_v1 }
  0xc0   :  { %3759 = vmatmul.mubr.msk.f32.gmra.mrb[4].mxu0 %vm97_vm2, %v5419_v5  ;;  %3767 = vmatmul.mubr.msk.f32.gmra.mrb[4].mxu1 %vm97_vm2, %v5419_v5 }
  0xc1   :  { %3903 = vmatpush1.bf16.msra.mxu0 %v5568_v24  ;;  %3935 = vmatpush1.bf16.msra.mxu1 %v5570_v25 }
  0xc2   :  { %265 = vmatprep.mubr.f32.mxu0 %v5418_v6  ;;  %378 = vmatprep.mubr.f32.mxu1 %v5418_v6  ;;  %v91_v22 = vpop.permute.xlu0 %90  ;;  %v94_v40 = vpop.permute.xlu1 %93 }
  0xc3   :  { %3905 = vmatprep.subr.bf16.mxu0 %v5576_v30  ;;  %3937 = vmatprep.subr.bf16.mxu1 %v5578_v31  ;;  %vm101_vm6 = vcmp.eq.s32.totalorder %v5535_v54, %v91_v22  ;;  %vm102_vm7 = vcmp.eq.s32.totalorder %v5535_v54, %v94_v40 }
  0xc4   :  { %3760 = vmatmul.mubr.msk.f32.gmra.mrb[6].mxu0 %vm98_vm3, %v5419_v5  ;;  %3768 = vmatmul.mubr.msk.f32.gmra.mrb[6].mxu1 %vm98_vm3, %v5419_v5 }
  0xc5   :  { %3907 = vmatpush1.bf16.msra.mxu0 %v5588_v36  ;;  %3939 = vmatpush1.bf16.msra.mxu1 %v5590_v37 }
  0xc6   :  { %271 = vmatprep.mubr.f32.mxu0 %v5418_v6  ;;  %384 = vmatprep.mubr.f32.mxu1 %v5418_v6 }
  0xc7   :  { %3909 = vmatprep.subr.bf16.mxu0 %v5597_v43  ;;  %3941 = vmatprep.subr.bf16.mxu1 %v5599_v44 }
  0xc8   :  { %3761 = vmatmul.mubr.msk.f32.gmra.mrb[8].mxu0 %vm99_vm4, %v5419_v5  ;;  %3769 = vmatmul.mubr.msk.f32.gmra.mrb[8].mxu1 %vm99_vm4, %v5419_v5 }
  0xc9   :  { %3911 = vmatpush1.bf16.msra.mxu0 %v5605_v53  ;;  %3943 = vmatpush1.bf16.msra.mxu1 %v5607_v55 }
  0xca   :  { %277 = vmatprep.mubr.f32.mxu0 %v5418_v6  ;;  %390 = vmatprep.mubr.f32.mxu1 %v5418_v6 }
  0xcb   :  { %3913 = vmatprep.subr.bf16.mxu0 %v5614_v62  ;;  %3945 = vmatprep.subr.bf16.mxu1 %v5616_v63 }
  0xcc   :  { %3762 = vmatmul.mubr.msk.f32.gmra.mrb[10].mxu0 %vm100_vm5, %v5419_v5  ;;  %3770 = vmatmul.mubr.msk.f32.gmra.mrb[10].mxu1 %vm100_vm5, %v5419_v5 }
  0xcd   :  { %3915 = vmatpush1.bf16.msra.mxu0 %v5622_v9  ;;  %3947 = vmatpush1.bf16.msra.mxu1 %v5624_v12 }
  0xce   :  { %283 = vmatprep.mubr.f32.mxu0 %v5418_v6  ;;  %396 = vmatprep.mubr.f32.mxu1 %v5418_v6 }
  0xcf   :  { %3917 = vmatprep.subr.bf16.mxu0 %v5631_v19  ;;  %3949 = vmatprep.subr.bf16.mxu1 %v5633_v20 }
  0xd0   :  { %3763 = vmatmul.mubr.msk.f32.gmra.mrb[12].mxu0 %vm101_vm6, %v5419_v5  ;;  %3771 = vmatmul.mubr.msk.f32.gmra.mrb[12].mxu1 %vm101_vm6, %v5419_v5 }
  0xd1   :  { %3919 = vmatpush1.bf16.msra.mxu0 %v5639_v28  ;;  %3951 = vmatpush1.bf16.msra.mxu1 %v5641_v29 }
  0xd2   :  { %289 = vmatprep.mubr.f32.mxu0 %v5418_v6  ;;  %402 = vmatprep.mubr.f32.mxu1 %v5418_v6 }
  0xd3   :  { %3921 = vmatprep.subr.bf16.mxu0 %v5648_v38  ;;  %3953 = vmatprep.subr.bf16.mxu1 %v5650_v39 }
  0xd4   :  { %3764 = vmatmul.mubr.msk.f32.gmra.mrb[14].mxu0 %vm102_vm7, %v5419_v5  ;;  %3772 = vmatmul.mubr.msk.f32.gmra.mrb[14].mxu1 %vm102_vm7, %v5419_v5 }
  0xd5   :  { %3923 = vmatpush1.bf16.msra.mxu0 %v5656_v41  ;;  %3955 = vmatpush1.bf16.msra.mxu1 %v5658_v42 }
  0xd6   :  { %573 = vmatprep.mubr.f32.mxu0 %v5418_v6  ;;  %644 = vmatprep.mubr.f32.mxu1 %v5418_v6 }
  0xd7   :  { %3957 = vmatprep.subr.bf16.mxu0 %v5528_v47  ;;  %3989 = vmatprep.subr.bf16.mxu1 %v5530_v48 }
  0xd8   :  { %574 = vmatmul.mubr.f32.vlgmr.msra.gmra.mrb[0].mxu0 %v5418_v6  ;;  %645 = vmatmul.mubr.f32.vlgmr.msra.gmra.mrb[0].mxu1 %v5418_v6 }
  0xd9   :  { %3959 = vmatpush1.bf16.msra.mxu0 %v5537_v59  ;;  %3991 = vmatpush1.bf16.msra.mxu1 %v5539_v60 }
  0xda   :  { %3961 = vmatprep.subr.bf16.mxu0 %v5542_v2  ;;  %3993 = vmatprep.subr.bf16.mxu1 %v5544_v3 }
  0xdb   :  { %749 = vmatprep.mubr.f32.mxu0 %v5418_v6  ;;  %820 = vmatprep.mubr.f32.mxu1 %v5418_v6 }
  0xdd   :  { %3963 = vmatpush1.bf16.msra.mxu0 %v5550_v10  ;;  %3995 = vmatpush1.bf16.msra.mxu1 %v5552_v11 }
  0xde   :  { %3965 = vmatprep.subr.bf16.mxu0 %v5559_v17  ;;  %3997 = vmatprep.subr.bf16.mxu1 %v5561_v18 }
  0xe1   :  { %3967 = vmatpush1.bf16.msra.mxu0 %v5568_v24  ;;  %3999 = vmatpush1.bf16.msra.mxu1 %v5570_v25 }
  0xe2   :  { %3969 = vmatprep.subr.bf16.mxu0 %v5576_v30  ;;  %4001 = vmatprep.subr.bf16.mxu1 %v5578_v31 }
  0xe5   :  { %3971 = vmatpush1.bf16.msra.mxu0 %v5588_v36  ;;  %4003 = vmatpush1.bf16.msra.mxu1 %v5590_v37 }
  0xe6   :  { %3973 = vmatprep.subr.bf16.mxu0 %v5597_v43  ;;  %4005 = vmatprep.subr.bf16.mxu1 %v5599_v44 }
  0xe9   :  { %3975 = vmatpush1.bf16.msra.mxu0 %v5605_v53  ;;  %4007 = vmatpush1.bf16.msra.mxu1 %v5607_v55 }
  0xea   :  { %3977 = vmatprep.subr.bf16.mxu0 %v5614_v62  ;;  %4009 = vmatprep.subr.bf16.mxu1 %v5616_v63 }
  0xed   :  { %3979 = vmatpush1.bf16.msra.mxu0 %v5622_v9  ;;  %4011 = vmatpush1.bf16.msra.mxu1 %v5624_v12 }
  0xee   :  { %3981 = vmatprep.subr.bf16.mxu0 %v5631_v19  ;;  %4013 = vmatprep.subr.bf16.mxu1 %v5633_v20 }
  0xf1   :  { %3983 = vmatpush1.bf16.msra.mxu0 %v5639_v28  ;;  %4015 = vmatpush1.bf16.msra.mxu1 %v5641_v29 }
  0xf2   :  { %3985 = vmatprep.subr.bf16.mxu0 %v5648_v38  ;;  %4017 = vmatprep.subr.bf16.mxu1 %v5650_v39 }
  0xf5   :  { %3987 = vmatpush1.bf16.msra.mxu0 %v5656_v41  ;;  %4019 = vmatpush1.bf16.msra.mxu1 %v5658_v42 }
  0xf6   :  { %4021 = vmatprep.subr.bf16.mxu0 %v5528_v47  ;;  %4053 = vmatprep.subr.bf16.mxu1 %v5530_v48 }
 0x1ab   :  { %v575_v54 = vpop.f32.mrb[0].mxu0  ;;  %v646_v5 = vpop.f32.mrb[0].mxu1 }
 0x1ac   :  { %v3773_v45 = vmul.f32 -1.442695, %v575_v54  ;;  %v577_v46 = vpop.f32.mrb[1].mxu0  ;;  %v648_v50 = vpop.f32.mrb[1].mxu1 }
 0x1ad   :  { %v3774_v51 = vmul.f32 -1.442695, %v577_v46  ;;  %v3775_v52 = vmul.f32 -1.442695, %v648_v50 }
 0x1ae   :  { %5086 = vpow2.f32 %v3773_v45 }
 0x1af   :  { %5088 = vpow2.f32 %v3774_v51 }
 0x1b0   :  { %5090 = vpow2.f32 %v3775_v52 }
 0x1b1   :  { %5092 = vtanh.f32 %v646_v5 }
 0x1b8   :  { %v5087_v56 = vpop.eup %5086 }
 0x1b9   :  { %v5089_v57 = vpop.eup %5088  ;;  %v658_v58 = vadd.f32 1.0, %v5087_v56 }
 0x1ba   :  { %v664_v61 = vadd.f32 1.0, %v5089_v57  ;;  %v5091_v0 = vpop.eup %5090 }
 0x1bb   :  { %5094 = vrcp.f32 %v658_v58  ;;  %v5093_v1 = vpop.eup %5092  ;;  %v671_v13 = vadd.f32 1.0, %v5091_v0 }
 0x1bc   :  { %5096 = vrcp.f32 %v664_v61 }
 0x1bd   :  { %5098 = vrcp.f32 %v671_v13 }
 0x1c5   :  { %v5095_v4 = vpop.eup %5094 }
 0x1c6   :  { %v5097_v7 = vpop.eup %5096  ;;  %v675_v8 = vmul.f32 %v5095_v4, %v5093_v1 }
 0x1c7   :  { %v674_v14 = vmul.f32 0.0, %v5097_v7  ;;  %v5099_v16 = vpop.eup %5098 }
 0x1c9   :  { %v5709_v15 = vadd.f32 %v675_v8, %v674_v14 }
 0x1cb   :  { %5100 = vtanh.f32 %v5709_v15 }
 0x1d5   :  { %v5101_v21 = vpop.eup %5100 }
 0x1d6   :  { %v5712_v22 = vmul.f32 %v5101_v21, %v5099_v16 }
 0x1d8   :  { %750 = vmatmul.mubr.f32.vlgmr.msra.gmra.mrb[2].mxu0 %v5712_v22  ;;  %821 = vmatmul.mubr.f32.vlgmr.msra.gmra.mrb[2].mxu1 %v5712_v22 }
 0x1d9   :  { %4023 = vmatpush1.bf16.msra.mxu0 %v5537_v59  ;;  %4055 = vmatpush1.bf16.msra.mxu1 %v5539_v60 }
 0x1da   :  { %4025 = vmatprep.subr.bf16.mxu0 %v5542_v2  ;;  %4057 = vmatprep.subr.bf16.mxu1 %v5544_v3 }
 0x1db   :  { %926 = vmatprep.mubr.f32.mxu0 %v5418_v6  ;;  %997 = vmatprep.mubr.f32.mxu1 %v5418_v6 }
 0x1dd   :  { %4027 = vmatpush1.bf16.msra.mxu0 %v5550_v10  ;;  %4059 = vmatpush1.bf16.msra.mxu1 %v5552_v11 }
 0x1de   :  { %4029 = vmatprep.subr.bf16.mxu0 %v5559_v17  ;;  %4061 = vmatprep.subr.bf16.mxu1 %v5561_v18 }
 0x1e1   :  { %4031 = vmatpush1.bf16.msra.mxu0 %v5568_v24  ;;  %4063 = vmatpush1.bf16.msra.mxu1 %v5570_v25 }
 0x1e2   :  { %4033 = vmatprep.subr.bf16.mxu0 %v5576_v30  ;;  %4065 = vmatprep.subr.bf16.mxu1 %v5578_v31 }
 0x1e5   :  { %4035 = vmatpush1.bf16.msra.mxu0 %v5588_v36  ;;  %4067 = vmatpush1.bf16.msra.mxu1 %v5590_v37 }
 0x1e6   :  { %4037 = vmatprep.subr.bf16.mxu0 %v5597_v43  ;;  %4069 = vmatprep.subr.bf16.mxu1 %v5599_v44 }
 0x1e9   :  { %4039 = vmatpush1.bf16.msra.mxu0 %v5605_v53  ;;  %4071 = vmatpush1.bf16.msra.mxu1 %v5607_v55 }
 0x1ea   :  { %4041 = vmatprep.subr.bf16.mxu0 %v5614_v62  ;;  %4073 = vmatprep.subr.bf16.mxu1 %v5616_v63 }
 0x1ed   :  { %4043 = vmatpush1.bf16.msra.mxu0 %v5622_v9  ;;  %4075 = vmatpush1.bf16.msra.mxu1 %v5624_v12 }
 0x1ee   :  { %4045 = vmatprep.subr.bf16.mxu0 %v5631_v19  ;;  %4077 = vmatprep.subr.bf16.mxu1 %v5633_v20 }
 0x1f1   :  { %4047 = vmatpush1.bf16.msra.mxu0 %v5639_v28  ;;  %4079 = vmatpush1.bf16.msra.mxu1 %v5641_v29 }
 0x1f2   :  { %4049 = vmatprep.subr.bf16.mxu0 %v5648_v38  ;;  %4081 = vmatprep.subr.bf16.mxu1 %v5650_v39 }
 0x1f5   :  { %4051 = vmatpush1.bf16.msra.mxu0 %v5656_v41  ;;  %4083 = vmatpush1.bf16.msra.mxu1 %v5658_v42 }
 0x1f6   :  { %4085 = vmatprep.subr.bf16.mxu0 %v5528_v47  ;;  %4117 = vmatprep.subr.bf16.mxu1 %v5530_v48 }
 0x2ab   :  { %v751_v23 = vpop.f32.mrb[2].mxu0  ;;  %v822_v26 = vpop.f32.mrb[2].mxu1 }
 0x2ac   :  { %v3776_v27 = vmul.f32 -1.442695, %v751_v23  ;;  %v753_v32 = vpop.f32.mrb[3].mxu0  ;;  %v824_v33 = vpop.f32.mrb[3].mxu1 }
 0x2ad   :  { %v3777_v34 = vmul.f32 -1.442695, %v753_v32  ;;  %v3778_v35 = vmul.f32 -1.442695, %v824_v33 }
 0x2ae   :  { %5102 = vpow2.f32 %v3776_v27 }
 0x2af   :  { %5104 = vpow2.f32 %v3777_v34 }
 0x2b0   :  { %5106 = vpow2.f32 %v3778_v35 }
 0x2b1   :  { %5108 = vtanh.f32 %v822_v26 }
 0x2b8   :  { %v5103_v40 = vpop.eup %5102 }
 0x2b9   :  { %v5105_v54 = vpop.eup %5104  ;;  %v834_v5 = vadd.f32 1.0, %v5103_v40 }
 0x2ba   :  { %v840_v45 = vadd.f32 1.0, %v5105_v54  ;;  %v5107_v46 = vpop.eup %5106 }
 0x2bb   :  { %5110 = vrcp.f32 %v834_v5  ;;  %v5109_v50 = vpop.eup %5108  ;;  %v847_v57 = vadd.f32 1.0, %v5107_v46 }
 0x2bc   :  { %5112 = vrcp.f32 %v840_v45 }
 0x2bd   :  { %5114 = vrcp.f32 %v847_v57 }
 0x2c5   :  { %v5111_v51 = vpop.eup %5110 }
 0x2c6   :  { %v5113_v52 = vpop.eup %5112  ;;  %v851_v56 = vmul.f32 %v5111_v51, %v5109_v50 }
 0x2c7   :  { %v850_v58 = vmul.f32 %v5113_v52, %v5709_v15  ;;  %v5115_v0 = vpop.eup %5114 }
 0x2c9   :  { %v5751_v61 = vadd.f32 %v851_v56, %v850_v58 }
 0x2cb   :  { %5116 = vtanh.f32 %v5751_v61 }
 0x2d5   :  { %v5117_v1 = vpop.eup %5116 }
 0x2d6   :  { %v5754_v4 = vmul.f32 %v5117_v1, %v5115_v0 }
 0x2d8   :  { %927 = vmatmul.mubr.f32.vlgmr.msra.gmra.mrb[4].mxu0 %v5754_v4  ;;  %998 = vmatmul.mubr.f32.vlgmr.msra.gmra.mrb[4].mxu1 %v5754_v4 }
 0x2d9   :  { %4087 = vmatpush1.bf16.msra.mxu0 %v5537_v59  ;;  %4119 = vmatpush1.bf16.msra.mxu1 %v5539_v60 }
 0x2da   :  { %4089 = vmatprep.subr.bf16.mxu0 %v5542_v2  ;;  %4121 = vmatprep.subr.bf16.mxu1 %v5544_v3 }
 0x2db   :  { %1103 = vmatprep.mubr.f32.mxu0 %v5418_v6  ;;  %1174 = vmatprep.mubr.f32.mxu1 %v5418_v6 }
 0x2dd   :  { %4091 = vmatpush1.bf16.msra.mxu0 %v5550_v10  ;;  %4123 = vmatpush1.bf16.msra.mxu1 %v5552_v11 }
 0x2de   :  { %4093 = vmatprep.subr.bf16.mxu0 %v5559_v17  ;;  %4125 = vmatprep.subr.bf16.mxu1 %v5561_v18 }
 0x2e1   :  { %4095 = vmatpush1.bf16.msra.mxu0 %v5568_v24  ;;  %4127 = vmatpush1.bf16.msra.mxu1 %v5570_v25 }
 0x2e2   :  { %4097 = vmatprep.subr.bf16.mxu0 %v5576_v30  ;;  %4129 = vmatprep.subr.bf16.mxu1 %v5578_v31 }
 0x2e5   :  { %4099 = vmatpush1.bf16.msra.mxu0 %v5588_v36  ;;  %4131 = vmatpush1.bf16.msra.mxu1 %v5590_v37 }
 0x2e6   :  { %4101 = vmatprep.subr.bf16.mxu0 %v5597_v43  ;;  %4133 = vmatprep.subr.bf16.mxu1 %v5599_v44 }
 0x2e9   :  { %4103 = vmatpush1.bf16.msra.mxu0 %v5605_v53  ;;  %4135 = vmatpush1.bf16.msra.mxu1 %v5607_v55 }
 0x2ea   :  { %4105 = vmatprep.subr.bf16.mxu0 %v5614_v62  ;;  %4137 = vmatprep.subr.bf16.mxu1 %v5616_v63 }
 0x2ed   :  { %4107 = vmatpush1.bf16.msra.mxu0 %v5622_v9  ;;  %4139 = vmatpush1.bf16.msra.mxu1 %v5624_v12 }
 0x2ee   :  { %4109 = vmatprep.subr.bf16.mxu0 %v5631_v19  ;;  %4141 = vmatprep.subr.bf16.mxu1 %v5633_v20 }
 0x2f1   :  { %4111 = vmatpush1.bf16.msra.mxu0 %v5639_v28  ;;  %4143 = vmatpush1.bf16.msra.mxu1 %v5641_v29 }
 0x2f2   :  { %4113 = vmatprep.subr.bf16.mxu0 %v5648_v38  ;;  %4145 = vmatprep.subr.bf16.mxu1 %v5650_v39 }
 0x2f5   :  { %4115 = vmatpush1.bf16.msra.mxu0 %v5656_v41  ;;  %4147 = vmatpush1.bf16.msra.mxu1 %v5658_v42 }
 0x2f6   :  { %4149 = vmatprep.subr.bf16.mxu0 %v5528_v47  ;;  %4181 = vmatprep.subr.bf16.mxu1 %v5530_v48 }
 0x3ab   :  { %v928_v7 = vpop.f32.mrb[4].mxu0  ;;  %v999_v8 = vpop.f32.mrb[4].mxu1 }
 0x3ac   :  { %v3779_v13 = vmul.f32 -1.442695, %v928_v7  ;;  %v930_v14 = vpop.f32.mrb[5].mxu0  ;;  %v1001_v15 = vpop.f32.mrb[5].mxu1 }
 0x3ad   :  { %v3780_v16 = vmul.f32 -1.442695, %v930_v14  ;;  %v3781_v21 = vmul.f32 -1.442695, %v1001_v15 }
 0x3ae   :  { %5118 = vpow2.f32 %v3779_v13 }
 0x3af   :  { %5120 = vpow2.f32 %v3780_v16 }
 0x3b0   :  { %5122 = vpow2.f32 %v3781_v21 }
 0x3b1   :  { %5124 = vtanh.f32 %v999_v8 }
 0x3b8   :  { %v5119_v23 = vpop.eup %5118 }
 0x3b9   :  { %v5121_v26 = vpop.eup %5120  ;;  %v1011_v27 = vadd.f32 1.0, %v5119_v23 }
 0x3ba   :  { %v1017_v32 = vadd.f32 1.0, %v5121_v26  ;;  %v5123_v33 = vpop.eup %5122 }
 0x3bb   :  { %5126 = vrcp.f32 %v1011_v27  ;;  %v5125_v34 = vpop.eup %5124  ;;  %v1024_v5 = vadd.f32 1.0, %v5123_v33 }
 0x3bc   :  { %5128 = vrcp.f32 %v1017_v32 }
 0x3bd   :  { %5130 = vrcp.f32 %v1024_v5 }
 0x3c5   :  { %v5127_v35 = vpop.eup %5126 }
 0x3c6   :  { %v5129_v40 = vpop.eup %5128  ;;  %v1028_v54 = vmul.f32 %v5127_v35, %v5125_v34 }
 0x3c7   :  { %v1027_v45 = vmul.f32 %v5129_v40, %v5751_v61  ;;  %v5131_v50 = vpop.eup %5130 }
 0x3c9   :  { %v5793_v46 = vadd.f32 %v1028_v54, %v1027_v45 }
 0x3cb   :  { %5132 = vtanh.f32 %v5793_v46 }
 0x3d5   :  { %v5133_v51 = vpop.eup %5132 }
 0x3d6   :  { %v5796_v52 = vmul.f32 %v5133_v51, %v5131_v50 }
 0x3d8   :  { %1104 = vmatmul.mubr.f32.vlgmr.msra.gmra.mrb[6].mxu0 %v5796_v52  ;;  %1175 = vmatmul.mubr.f32.vlgmr.msra.gmra.mrb[6].mxu1 %v5796_v52 }
 0x3d9   :  { %4151 = vmatpush1.bf16.msra.mxu0 %v5537_v59  ;;  %4183 = vmatpush1.bf16.msra.mxu1 %v5539_v60 }
 0x3da   :  { %4153 = vmatprep.subr.bf16.mxu0 %v5542_v2  ;;  %4185 = vmatprep.subr.bf16.mxu1 %v5544_v3 }
 0x3db   :  { %1280 = vmatprep.mubr.f32.mxu0 %v5418_v6  ;;  %1351 = vmatprep.mubr.f32.mxu1 %v5418_v6 }
 0x3dd   :  { %4155 = vmatpush1.bf16.msra.mxu0 %v5550_v10  ;;  %4187 = vmatpush1.bf16.msra.mxu1 %v5552_v11 }
 0x3de   :  { %4157 = vmatprep.subr.bf16.mxu0 %v5559_v17  ;;  %4189 = vmatprep.subr.bf16.mxu1 %v5561_v18 }
 0x3e1   :  { %4159 = vmatpush1.bf16.msra.mxu0 %v5568_v24  ;;  %4191 = vmatpush1.bf16.msra.mxu1 %v5570_v25 }
 0x3e2   :  { %4161 = vmatprep.subr.bf16.mxu0 %v5576_v30  ;;  %4193 = vmatprep.subr.bf16.mxu1 %v5578_v31 }
 0x3e5   :  { %4163 = vmatpush1.bf16.msra.mxu0 %v5588_v36  ;;  %4195 = vmatpush1.bf16.msra.mxu1 %v5590_v37 }
 0x3e6   :  { %4165 = vmatprep.subr.bf16.mxu0 %v5597_v43  ;;  %4197 = vmatprep.subr.bf16.mxu1 %v5599_v44 }
 0x3e9   :  { %4167 = vmatpush1.bf16.msra.mxu0 %v5605_v53  ;;  %4199 = vmatpush1.bf16.msra.mxu1 %v5607_v55 }
 0x3ea   :  { %4169 = vmatprep.subr.bf16.mxu0 %v5614_v62  ;;  %4201 = vmatprep.subr.bf16.mxu1 %v5616_v63 }
 0x3ed   :  { %4171 = vmatpush1.bf16.msra.mxu0 %v5622_v9  ;;  %4203 = vmatpush1.bf16.msra.mxu1 %v5624_v12 }
 0x3ee   :  { %4173 = vmatprep.subr.bf16.mxu0 %v5631_v19  ;;  %4205 = vmatprep.subr.bf16.mxu1 %v5633_v20 }
 0x3f1   :  { %4175 = vmatpush1.bf16.msra.mxu0 %v5639_v28  ;;  %4207 = vmatpush1.bf16.msra.mxu1 %v5641_v29 }
 0x3f2   :  { %4177 = vmatprep.subr.bf16.mxu0 %v5648_v38  ;;  %4209 = vmatprep.subr.bf16.mxu1 %v5650_v39 }
 0x3f5   :  { %4179 = vmatpush1.bf16.msra.mxu0 %v5656_v41  ;;  %4211 = vmatpush1.bf16.msra.mxu1 %v5658_v42 }
 0x3f6   :  { %4213 = vmatprep.subr.bf16.mxu0 %v5528_v47  ;;  %4245 = vmatprep.subr.bf16.mxu1 %v5530_v48 }
 0x4ab   :  { %v1105_v56 = vpop.f32.mrb[6].mxu0  ;;  %v1176_v57 = vpop.f32.mrb[6].mxu1 }
 0x4ac   :  { %v3782_v58 = vmul.f32 -1.442695, %v1105_v56  ;;  %v1107_v61 = vpop.f32.mrb[7].mxu0  ;;  %v1178_v0 = vpop.f32.mrb[7].mxu1 }
 0x4ad   :  { %v3783_v1 = vmul.f32 -1.442695, %v1107_v61  ;;  %v3784_v7 = vmul.f32 -1.442695, %v1178_v0 }
 0x4ae   :  { %5134 = vpow2.f32 %v3782_v58 }
 0x4af   :  { %5136 = vpow2.f32 %v3783_v1 }
 0x4b0   :  { %5138 = vpow2.f32 %v3784_v7 }
 0x4b1   :  { %5140 = vtanh.f32 %v1176_v57 }
 0x4b8   :  { %v5135_v8 = vpop.eup %5134 }
 0x4b9   :  { %v5137_v13 = vpop.eup %5136  ;;  %v1188_v14 = vadd.f32 1.0, %v5135_v8 }
 0x4ba   :  { %v1194_v15 = vadd.f32 1.0, %v5137_v13  ;;  %v5139_v16 = vpop.eup %5138 }
 0x4bb   :  { %5142 = vrcp.f32 %v1188_v14  ;;  %v5141_v21 = vpop.eup %5140  ;;  %v1201_v32 = vadd.f32 1.0, %v5139_v16 }
 0x4bc   :  { %5144 = vrcp.f32 %v1194_v15 }
 0x4bd   :  { %5146 = vrcp.f32 %v1201_v32 }
 0x4c5   :  { %v5143_v23 = vpop.eup %5142 }
 0x4c6   :  { %v5145_v26 = vpop.eup %5144  ;;  %v1205_v27 = vmul.f32 %v5143_v23, %v5141_v21 }
 0x4c7   :  { %v1204_v33 = vmul.f32 %v5145_v26, %v5793_v46  ;;  %v5147_v35 = vpop.eup %5146 }
 0x4c9   :  { %v5835_v34 = vadd.f32 %v1205_v27, %v1204_v33 }
 0x4cb   :  { %5148 = vtanh.f32 %v5835_v34 }
 0x4d5   :  { %v5149_v40 = vpop.eup %5148 }
 0x4d6   :  { %v5838_v54 = vmul.f32 %v5149_v40, %v5147_v35 }
 0x4d8   :  { %1281 = vmatmul.mubr.f32.vlgmr.msra.gmra.mrb[8].mxu0 %v5838_v54  ;;  %1352 = vmatmul.mubr.f32.vlgmr.msra.gmra.mrb[8].mxu1 %v5838_v54 }
 0x4d9   :  { %4215 = vmatpush1.bf16.msra.mxu0 %v5537_v59  ;;  %4247 = vmatpush1.bf16.msra.mxu1 %v5539_v60 }
 0x4da   :  { %4217 = vmatprep.subr.bf16.mxu0 %v5542_v2  ;;  %4249 = vmatprep.subr.bf16.mxu1 %v5544_v3 }
 0x4db   :  { %1457 = vmatprep.mubr.f32.mxu0 %v5418_v6  ;;  %1528 = vmatprep.mubr.f32.mxu1 %v5418_v6 }
 0x4dd   :  { %4219 = vmatpush1.bf16.msra.mxu0 %v5550_v10  ;;  %4251 = vmatpush1.bf16.msra.mxu1 %v5552_v11 }
 0x4de   :  { %4221 = vmatprep.subr.bf16.mxu0 %v5559_v17  ;;  %4253 = vmatprep.subr.bf16.mxu1 %v5561_v18 }
 0x4e1   :  { %4223 = vmatpush1.bf16.msra.mxu0 %v5568_v24  ;;  %4255 = vmatpush1.bf16.msra.mxu1 %v5570_v25 }
 0x4e2   :  { %4225 = vmatprep.subr.bf16.mxu0 %v5576_v30  ;;  %4257 = vmatprep.subr.bf16.mxu1 %v5578_v31 }
 0x4e5   :  { %4227 = vmatpush1.bf16.msra.mxu0 %v5588_v36  ;;  %4259 = vmatpush1.bf16.msra.mxu1 %v5590_v37 }
 0x4e6   :  { %4229 = vmatprep.subr.bf16.mxu0 %v5597_v43  ;;  %4261 = vmatprep.subr.bf16.mxu1 %v5599_v44 }
 0x4e9   :  { %4231 = vmatpush1.bf16.msra.mxu0 %v5605_v53  ;;  %4263 = vmatpush1.bf16.msra.mxu1 %v5607_v55 }
 0x4ea   :  { %4233 = vmatprep.subr.bf16.mxu0 %v5614_v62  ;;  %4265 = vmatprep.subr.bf16.mxu1 %v5616_v63 }
 0x4ed   :  { %4235 = vmatpush1.bf16.msra.mxu0 %v5622_v9  ;;  %4267 = vmatpush1.bf16.msra.mxu1 %v5624_v12 }
 0x4ee   :  { %4237 = vmatprep.subr.bf16.mxu0 %v5631_v19  ;;  %4269 = vmatprep.subr.bf16.mxu1 %v5633_v20 }
 0x4f1   :  { %4239 = vmatpush1.bf16.msra.mxu0 %v5639_v28  ;;  %4271 = vmatpush1.bf16.msra.mxu1 %v5641_v29 }
 0x4f2   :  { %4241 = vmatprep.subr.bf16.mxu0 %v5648_v38  ;;  %4273 = vmatprep.subr.bf16.mxu1 %v5650_v39 }
 0x4f5   :  { %4243 = vmatpush1.bf16.msra.mxu0 %v5656_v41  ;;  %4275 = vmatpush1.bf16.msra.mxu1 %v5658_v42 }
 0x4f6   :  { %4277 = vmatprep.subr.bf16.mxu0 %v5528_v47  ;;  %4309 = vmatprep.subr.bf16.mxu1 %v5530_v48 }
 0x5ab   :  { %v1282_v5 = vpop.f32.mrb[8].mxu0  ;;  %v1353_v45 = vpop.f32.mrb[8].mxu1 }
 0x5ac   :  { %v3785_v46 = vmul.f32 -1.442695, %v1282_v5  ;;  %v1284_v50 = vpop.f32.mrb[9].mxu0  ;;  %v1355_v51 = vpop.f32.mrb[9].mxu1 }
 0x5ad   :  { %v3786_v56 = vmul.f32 -1.442695, %v1284_v50  ;;  %v3787_v57 = vmul.f32 -1.442695, %v1355_v51 }
 0x5ae   :  { %5150 = vpow2.f32 %v3785_v46 }
 0x5af   :  { %5152 = vpow2.f32 %v3786_v56 }
 0x5b0   :  { %5154 = vpow2.f32 %v3787_v57 }
 0x5b1   :  { %5156 = vtanh.f32 %v1353_v45 }
 0x5b8   :  { %v5151_v58 = vpop.eup %5150 }
 0x5b9   :  { %v5153_v61 = vpop.eup %5152  ;;  %v1365_v0 = vadd.f32 1.0, %v5151_v58 }
 0x5ba   :  { %v1371_v1 = vadd.f32 1.0, %v5153_v61  ;;  %v5155_v7 = vpop.eup %5154 }
 0x5bb   :  { %5158 = vrcp.f32 %v1365_v0  ;;  %v5157_v8 = vpop.eup %5156  ;;  %v1378_v16 = vadd.f32 1.0, %v5155_v7 }
 0x5bc   :  { %5160 = vrcp.f32 %v1371_v1 }
 0x5bd   :  { %5162 = vrcp.f32 %v1378_v16  ;;  %v1940_v16 = vld [vmem:[#allocation6 + $0x68] sm:$0xff] }
 0x5c5   :  { %v5159_v13 = vpop.eup %5158 }
 0x5c6   :  { %v5161_v14 = vpop.eup %5160  ;;  %v1382_v15 = vmul.f32 %v5159_v13, %v5157_v8 }
 0x5c7   :  { %v1381_v21 = vmul.f32 %v5161_v14, %v5835_v34  ;;  %v5163_v26 = vpop.eup %5162 }
 0x5c9   :  { %v5877_v23 = vadd.f32 %v1382_v15, %v1381_v21  ;;  %v1938_v21 = vld [vmem:[#allocation6 + $0x58] sm:$0xff] }
 0x5cb   :  { %5164 = vtanh.f32 %v5877_v23 }
 0x5d5   :  { %v5165_v27 = vpop.eup %5164 }
 0x5d6   :  { %v5880_v32 = vmul.f32 %v5165_v27, %v5163_v26 }
 0x5d8   :  { %1458 = vmatmul.mubr.f32.vlgmr.msra.gmra.mrb[10].mxu0 %v5880_v32  ;;  %1529 = vmatmul.mubr.f32.vlgmr.msra.gmra.mrb[10].mxu1 %v5880_v32 }
 0x5d9   :  { %4279 = vmatpush1.bf16.msra.mxu0 %v5537_v59  ;;  %4311 = vmatpush1.bf16.msra.mxu1 %v5539_v60 }
 0x5da   :  { %4281 = vmatprep.subr.bf16.mxu0 %v5542_v2  ;;  %4313 = vmatprep.subr.bf16.mxu1 %v5544_v3 }
 0x5db   :  { %1634 = vmatprep.mubr.f32.mxu0 %v5418_v6  ;;  %1705 = vmatprep.mubr.f32.mxu1 %v5418_v6 }
 0x5dd   :  { %4283 = vmatpush1.bf16.msra.mxu0 %v5550_v10  ;;  %4315 = vmatpush1.bf16.msra.mxu1 %v5552_v11 }
 0x5de   :  { %4285 = vmatprep.subr.bf16.mxu0 %v5559_v17  ;;  %4317 = vmatprep.subr.bf16.mxu1 %v5561_v18 }
 0x5e1   :  { %4287 = vmatpush1.bf16.msra.mxu0 %v5568_v24  ;;  %4319 = vmatpush1.bf16.msra.mxu1 %v5570_v25 }
 0x5e2   :  { %4289 = vmatprep.subr.bf16.mxu0 %v5576_v30  ;;  %4321 = vmatprep.subr.bf16.mxu1 %v5578_v31 }
 0x5e5   :  { %4291 = vmatpush1.bf16.msra.mxu0 %v5588_v36  ;;  %4323 = vmatpush1.bf16.msra.mxu1 %v5590_v37 }
 0x5e6   :  { %4293 = vmatprep.subr.bf16.mxu0 %v5597_v43  ;;  %4325 = vmatprep.subr.bf16.mxu1 %v5599_v44 }
 0x5e9   :  { %4295 = vmatpush1.bf16.msra.mxu0 %v5605_v53  ;;  %4327 = vmatpush1.bf16.msra.mxu1 %v5607_v55 }
 0x5ea   :  { %4297 = vmatprep.subr.bf16.mxu0 %v5614_v62  ;;  %4329 = vmatprep.subr.bf16.mxu1 %v5616_v63 }
 0x5ed   :  { %4299 = vmatpush1.bf16.msra.mxu0 %v5622_v9  ;;  %4331 = vmatpush1.bf16.msra.mxu1 %v5624_v12 }
 0x5ee   :  { %4301 = vmatprep.subr.bf16.mxu0 %v5631_v19  ;;  %4333 = vmatprep.subr.bf16.mxu1 %v5633_v20 }
 0x5f1   :  { %4303 = vmatpush1.bf16.msra.mxu0 %v5639_v28  ;;  %4335 = vmatpush1.bf16.msra.mxu1 %v5641_v29 }
 0x5f2   :  { %4305 = vmatprep.subr.bf16.mxu0 %v5648_v38  ;;  %4337 = vmatprep.subr.bf16.mxu1 %v5650_v39 }
 0x5f5   :  { %4307 = vmatpush1.bf16.msra.mxu0 %v5656_v41  ;;  %4339 = vmatpush1.bf16.msra.mxu1 %v5658_v42 }
 0x5f6   :  { %4341 = vmatprep.subr.bf16.mxu0 %v5528_v47  ;;  %4373 = vmatprep.subr.bf16.mxu1 %v5530_v48 }
 0x6ab   :  { %v1459_v33 = vpop.f32.mrb[10].mxu0  ;;  %v1530_v34 = vpop.f32.mrb[10].mxu1 }
 0x6ac   :  { %v3788_v35 = vmul.f32 -1.442695, %v1459_v33  ;;  %v1461_v40 = vpop.f32.mrb[11].mxu0  ;;  %v1532_v5 = vpop.f32.mrb[11].mxu1 }
 0x6ad   :  { %v3789_v45 = vmul.f32 -1.442695, %v1461_v40  ;;  %v3790_v46 = vmul.f32 -1.442695, %v1532_v5  ;;  %v1939_v40 = vld [vmem:[#allocation6 + $0x60] sm:$0xff] }
 0x6ae   :  { %5166 = vpow2.f32 %v3788_v35  ;;  %v1935_v35 = vld [vmem:[#allocation6 + $0x40] sm:$0xff] }
 0x6af   :  { %5168 = vpow2.f32 %v3789_v45 }
 0x6b0   :  { %5170 = vpow2.f32 %v3790_v46 }
 0x6b1   :  { %5172 = vtanh.f32 %v1530_v34 }
 0x6b8   :  { %v5167_v50 = vpop.eup %5166 }
 0x6b9   :  { %v5169_v51 = vpop.eup %5168  ;;  %v1542_v56 = vadd.f32 1.0, %v5167_v50  ;;  %v1937_v50 = vld [vmem:[#allocation6 + $0x50] sm:$0xff] }
 0x6ba   :  { %v1548_v57 = vadd.f32 1.0, %v5169_v51  ;;  %v5171_v47 = vpop.eup %5170  ;;  %v1941_v51 = vld [vmem:[#allocation6 + $0x70] sm:$0xff] }
 0x6bb   :  { %5174 = vrcp.f32 %v1542_v56  ;;  %v5173_v58 = vpop.eup %5172  ;;  %v1555_v1 = vadd.f32 1.0, %v5171_v47  ;;  %v1944_v56 = vld [vmem:[#allocation6 + $0x88] sm:$0xff]  ;;  %v1946_v47 = vld [vmem:[#allocation6 + $0x98] sm:$0xff] }
 0x6bc   :  { %5176 = vrcp.f32 %v1548_v57  ;;  %v1948_v57 = vld [vmem:[#allocation6 + $0xa8] sm:$0xff] }
 0x6bd   :  { %5178 = vrcp.f32 %v1555_v1  ;;  %v1947_v1 = vld [vmem:[#allocation6 + $0xa0] sm:$0xff] }
 0x6c5   :  { %v5175_v48 = vpop.eup %5174 }
 0x6c6   :  { %v5177_v61 = vpop.eup %5176  ;;  %v1559_v0 = vmul.f32 %v5175_v48, %v5173_v58  ;;  %v1950_v58 = vld [vmem:[#allocation6 + $0xb8] sm:$0xff]  ;;  %v4410_v48 = vpack.c.bf16 %v1939_v40, %v1935_v35  ;;  %v1976_v35 = vld [vmem:[#allocation6 + $0x188] sm:$0xff] }
 0x6c7   :  { %v1558_v7 = vmul.f32 %v5177_v61, %v5877_v23  ;;  %v5179_v13 = vpop.eup %5178  ;;  %v1942_v23 = vld [vmem:[#allocation6 + $0x78] sm:$0xff]  ;;  %v4442_v61 = vpack.c.bf16 %v1941_v51, %v1937_v50  ;;  %v1980_v40 = vld [vmem:[#allocation6 + $0x1a8] sm:$0xff] }
 0x6c8   :  { %v4440_v46 = vpack.c.bf16 %v1942_v23, %v1938_v21  ;;  %v1967_v21 = vld [vmem:[#allocation6 + $0x140] sm:$0xff] }
 0x6c9   :  { %v5919_v8 = vadd.f32 %v1559_v0, %v1558_v7  ;;  %v1943_v0 = vld [vmem:[#allocation6 + $0x80] sm:$0xff]  ;;  %v4412_v7 = vpack.c.bf16 %v1948_v57, %v1944_v56 }
 0x6ca   :  { %v1971_v23 = vld [vmem:[#allocation6 + $0x160] sm:$0xff] }
 0x6cb   :  { %5180 = vtanh.f32 %v5919_v8  ;;  %v4426_v50 = vpack.c.bf16 %v1971_v23, %v1967_v21  ;;  %v1975_v56 = vld [vmem:[#allocation6 + $0x180] sm:$0xff]  ;;  %v2295_v23 = vld [vmem:[#allocation8 + $0x2b8] sm:$0xff] }
 0x6cc   :  { %v1979_v57 = vld [vmem:[#allocation6 + $0x1a0] sm:$0xff] }
 0x6cd   :  { %v2292_v21 = vld [vmem:[#allocation8 + $0x2a0] sm:$0xff] }
 0x6d5   :  { %v5181_v14 = vpop.eup %5180 }
 0x6d6   :  { %v5922_v15 = vmul.f32 %v5181_v14, %v5179_v13  ;;  %v1945_v13 = vld [vmem:[#allocation6 + $0x90] sm:$0xff] }
 0x6d7   :  { %v1949_v14 = vld [vmem:[#allocation6 + $0xb0] sm:$0xff] }
 0x6d8   :  { %1635 = vmatmul.mubr.f32.vlgmr.msra.gmra.mrb[12].mxu0 %v5922_v15  ;;  %1706 = vmatmul.mubr.f32.vlgmr.msra.gmra.mrb[12].mxu1 %v5922_v15 }
 0x6d9   :  { %4343 = vmatpush1.bf16.msra.mxu0 %v5537_v59  ;;  %4375 = vmatpush1.bf16.msra.mxu1 %v5539_v60  ;;  %v1928_v59 = vld [vmem:[#allocation6 + $0x8] sm:$0xff] }
 0x6da   :  { %4345 = vmatprep.subr.bf16.mxu0 %v5542_v2  ;;  %4377 = vmatprep.subr.bf16.mxu1 %v5544_v3  ;;  %v1932_v60 = vld [vmem:[#allocation6 + $0x28] sm:$0xff]  ;;  %v1930_v2 = vld [vmem:[#allocation6 + $0x18] sm:$0xff] }
 0x6db   :  { %1811 = vmatprep.mubr.f32.mxu0 %v5418_v6  ;;  %1882 = vmatprep.mubr.f32.mxu1 %v5418_v6  ;;  %v4404_v3 = vpack.c.bf16 %v1932_v60, %v1928_v59  ;;  %v1952_v59 = vld [vmem:[#allocation6 + $0xc8] sm:$0xff] }
 0x6dc   :  { %v1956_v60 = vld [vmem:[#allocation6 + $0xe8] sm:$0xff] }
 0x6dd   :  { %4347 = vmatpush1.bf16.msra.mxu0 %v5550_v10  ;;  %4379 = vmatpush1.bf16.msra.mxu1 %v5552_v11  ;;  %v1934_v10 = vld [vmem:[#allocation6 + $0x38] sm:$0xff] }
 0x6de   :  { %4349 = vmatprep.subr.bf16.mxu0 %v5559_v17  ;;  %4381 = vmatprep.subr.bf16.mxu1 %v5561_v18  ;;  %v4436_v11 = vpack.c.bf16 %v1934_v10, %v1930_v2  ;;  %v1954_v2 = vld [vmem:[#allocation6 + $0xd8] sm:$0xff]  ;;  %v4414_v10 = vpack.c.bf16 %v1947_v1, %v1943_v0  ;;  %v1984_v0 = vld [vmem:[#allocation6 + $0x1c8] sm:$0xff] }
 0x6df   :  { %v1988_v1 = vld [vmem:[#allocation6 + $0x1e8] sm:$0xff] }
 0x6e1   :  { %4351 = vmatpush1.bf16.msra.mxu0 %v5568_v24  ;;  %4383 = vmatpush1.bf16.msra.mxu1 %v5570_v25 }
 0x6e2   :  { %4353 = vmatprep.subr.bf16.mxu0 %v5576_v30  ;;  %4385 = vmatprep.subr.bf16.mxu1 %v5578_v31 }
 0x6e5   :  { %4355 = vmatpush1.bf16.msra.mxu0 %v5588_v36  ;;  %4387 = vmatpush1.bf16.msra.mxu1 %v5590_v37 }
 0x6e6   :  { %4357 = vmatprep.subr.bf16.mxu0 %v5597_v43  ;;  %4389 = vmatprep.subr.bf16.mxu1 %v5599_v44 }
 0x6e9   :  { %4359 = vmatpush1.bf16.msra.mxu0 %v5605_v53  ;;  %4391 = vmatpush1.bf16.msra.mxu1 %v5607_v55 }
 0x6ea   :  { %4361 = vmatprep.subr.bf16.mxu0 %v5614_v62  ;;  %4393 = vmatprep.subr.bf16.mxu1 %v5616_v63 }
 0x6ed   :  { %4363 = vmatpush1.bf16.msra.mxu0 %v5622_v9  ;;  %4395 = vmatpush1.bf16.msra.mxu1 %v5624_v12 }
 0x6ee   :  { %4365 = vmatprep.subr.bf16.mxu0 %v5631_v19  ;;  %4397 = vmatprep.subr.bf16.mxu1 %v5633_v20 }
 0x6f1   :  { %4367 = vmatpush1.bf16.msra.mxu0 %v5639_v28  ;;  %4399 = vmatpush1.bf16.msra.mxu1 %v5641_v29  ;;  %v1927_v29 = vld [vmem:[#allocation6] sm:$0xff] }
 0x6f2   :  { %4369 = vmatprep.subr.bf16.mxu0 %v5648_v38  ;;  %4401 = vmatprep.subr.bf16.mxu1 %v5650_v39  ;;  %v1931_v38 = vld [vmem:[#allocation6 + $0x20] sm:$0xff]  ;;  %v1929_v39 = vld [vmem:[#allocation6 + $0x10] sm:$0xff] }
 0x6f3   :  { %v4406_v33 = vpack.c.bf16 %v1931_v38, %v1927_v29  ;;  %v1968_v29 = vld [vmem:[#allocation6 + $0x148] sm:$0xff] }
 0x6f4   :  { %v1972_v38 = vld [vmem:[#allocation6 + $0x168] sm:$0xff] }
 0x6f5   :  { %4371 = vmatpush1.bf16.msra.mxu0 %v5656_v41  ;;  %4403 = vmatpush1.bf16.msra.mxu1 %v5658_v42  ;;  %v1933_v41 = vld [vmem:[#allocation6 + $0x30] sm:$0xff]  ;;  %v1936_v42 = vld [vmem:[#allocation6 + $0x48] sm:$0xff] }
 0x6f6   :  { %4405 = vmatprep.subr.bf16.mxu0 %v4404_v3  ;;  %4437 = vmatprep.subr.bf16.mxu1 %v4436_v11  ;;  %v4438_v34 = vpack.c.bf16 %v1933_v41, %v1929_v39  ;;  %v4408_v45 = vpack.c.bf16 %v1940_v16, %v1936_v42  ;;  %v1958_v3 = vld [vmem:[#allocation6 + $0xf8] sm:$0xff]  ;;  %v4446_v11 = vpack.c.bf16 %v1949_v14, %v1945_v13 }
 0x6f7   :  { %v1970_v39 = vld [vmem:[#allocation6 + $0x158] sm:$0xff]  ;;  %v4430_v13 = vpack.c.bf16 %v1979_v57, %v1975_v56  ;;  %v2300_v56 = vld [vmem:[#allocation8 + $0x2e0] sm:$0xff] }
 0x6f8   :  { %v1974_v41 = vld [vmem:[#allocation6 + $0x178] sm:$0xff] }
 0x6f9   :  { %v2303_v57 = vld [vmem:[#allocation8 + $0x2f8] sm:$0xff] }
 0x7ab   :  { %v1636_v17 = vpop.f32.mrb[12].mxu0  ;;  %v1707_v18 = vpop.f32.mrb[12].mxu1 }
 0x7ac   :  { %v3791_v24 = vmul.f32 -1.442695, %v1636_v17  ;;  %v1638_v25 = vpop.f32.mrb[13].mxu0  ;;  %v1709_v30 = vpop.f32.mrb[13].mxu1  ;;  %v1951_v17 = vld [vmem:[#allocation6 + $0xc0] sm:$0xff] }
 0x7ad   :  { %v3792_v31 = vmul.f32 -1.442695, %v1638_v25  ;;  %v3793_v36 = vmul.f32 -1.442695, %v1709_v30  ;;  %v4448_v25 = vpack.c.bf16 %v1958_v3, %v1954_v2  ;;  %v1953_v30 = vld [vmem:[#allocation6 + $0xd0] sm:$0xff]  ;;  %v1987_v3 = vld [vmem:[#allocation6 + $0x1e0] sm:$0xff] }
 0x7ae   :  { %5182 = vpow2.f32 %v3791_v24  ;;  %v4416_v24 = vpack.c.bf16 %v1956_v60, %v1952_v59  ;;  %v1983_v59 = vld [vmem:[#allocation6 + $0x1c0] sm:$0xff]  ;;  %v4432_v60 = vpack.c.bf16 %v1988_v1, %v1984_v0  ;;  %v2305_v0 = vld [vmem:[#allocation8 + $0x308] sm:$0xff] }
 0x7af   :  { %5184 = vpow2.f32 %v3792_v31  ;;  %v1957_v31 = vld [vmem:[#allocation6 + $0xf0] sm:$0xff] }
 0x7b0   :  { %5186 = vpow2.f32 %v3793_v36  ;;  %v1960_v36 = vld [vmem:[#allocation6 + $0x108] sm:$0xff] }
 0x7b1   :  { %5188 = vtanh.f32 %v1707_v18  ;;  %v1955_v18 = vld [vmem:[#allocation6 + $0xe0] sm:$0xff] }
 0x7b8   :  { %v5183_v37 = vpop.eup %5182 }
 0x7b9   :  { %v5185_v43 = vpop.eup %5184  ;;  %v1719_v44 = vadd.f32 1.0, %v5183_v37  ;;  %v1964_v37 = vld [vmem:[#allocation6 + $0x128] sm:$0xff] }
 0x7ba   :  { %v1725_v53 = vadd.f32 1.0, %v5185_v43  ;;  %v5187_v55 = vpop.eup %5186  ;;  %v1962_v43 = vld [vmem:[#allocation6 + $0x118] sm:$0xff] }
 0x7bb   :  { %5190 = vrcp.f32 %v1719_v44  ;;  %v5189_v62 = vpop.eup %5188  ;;  %v1732_v19 = vadd.f32 1.0, %v5187_v55  ;;  %v1966_v44 = vld [vmem:[#allocation6 + $0x138] sm:$0xff]  ;;  %v4450_v55 = vpack.c.bf16 %v1957_v31, %v1953_v30  ;;  %v2274_v31 = vld [vmem:[#allocation8 + $0x210] sm:$0xff] }
 0x7bc   :  { %5192 = vrcp.f32 %v1725_v53  ;;  %v4418_v53 = vpack.c.bf16 %v1955_v18, %v1951_v17  ;;  %v4434_v17 = vpack.c.bf16 %v1987_v3, %v1983_v59  ;;  %v2306_v3 = vld [vmem:[#allocation8 + $0x310] sm:$0xff] }
 0x7bd   :  { %5194 = vrcp.f32 %v1732_v19  ;;  %v1961_v19 = vld [vmem:[#allocation6 + $0x110] sm:$0xff] }
 0x7c5   :  { %v5191_v63 = vpop.eup %5190 }
 0x7c6   :  { %v5193_v9 = vpop.eup %5192  ;;  %v1736_v12 = vmul.f32 %v5191_v63, %v5189_v62  ;;  %v1959_v62 = vld [vmem:[#allocation6 + $0x100] sm:$0xff] }
 0x7c7   :  { %v1735_v20 = vmul.f32 %v5193_v9, %v5919_v8  ;;  %v5195_v26 = vpop.eup %5194  ;;  %v4444_v8 = vpack.c.bf16 %v1950_v58, %v1946_v47  ;;  %v1963_v63 = vld [vmem:[#allocation6 + $0x120] sm:$0xff]  ;;  %v4420_v9 = vpack.c.bf16 %v1964_v37, %v1960_v36  ;;  %v4428_v47 = vpack.c.bf16 %v1980_v40, %v1976_v35  ;;  %v2278_v36 = vld [vmem:[#allocation8 + $0x230] sm:$0xff]  ;;  %v2281_v37 = vld [vmem:[#allocation8 + $0x248] sm:$0xff] }
 0x7c8   :  { %v4422_v42 = vpack.c.bf16 %v1963_v63, %v1959_v62  ;;  %v2284_v62 = vld [vmem:[#allocation8 + $0x260] sm:$0xff]  ;;  %v2287_v63 = vld [vmem:[#allocation8 + $0x278] sm:$0xff]  ;;  %v2297_v40 = vld [vmem:[#allocation8 + $0x2c8] sm:$0xff] }
 0x7c9   :  { %v5959_v28 = vadd.f32 %v1736_v12, %v1735_v20  ;;  %v4452_v12 = vpack.c.bf16 %v1966_v44, %v1962_v43  ;;  %v1965_v20 = vld [vmem:[#allocation6 + $0x130] sm:$0xff]  ;;  %v2285_v43 = vld [vmem:[#allocation8 + $0x268] sm:$0xff]  ;;  %v2283_v44 = vld [vmem:[#allocation8 + $0x258] sm:$0xff] }
 0x7ca   :  { %v4454_v16 = vpack.c.bf16 %v1965_v20, %v1961_v19  ;;  %v2282_v19 = vld [vmem:[#allocation8 + $0x250] sm:$0xff] }
 0x7cb   :  { %5196 = vtanh.f32 %v5959_v28  ;;  %v2286_v20 = vld [vmem:[#allocation8 + $0x270] sm:$0xff] }
 0x7d5   :  { %v5197_v27 = vpop.eup %5196 }
 0x7d6   :  { %v5962_v5 = vmul.f32 %v5197_v27, %v5195_v26  ;;  %v4424_v26 = vpack.c.bf16 %v1972_v38, %v1968_v29  ;;  %v4456_v27 = vpack.c.bf16 %v1974_v41, %v1970_v39  ;;  %v6015_v29 = vpack.c.bf16 %v2286_v20, %v2282_v19  ;;  %v2289_v38 = vld [vmem:[#allocation8 + $0x288] sm:$0xff]  ;;  %v2291_v41 = vld [vmem:[#allocation8 + $0x298] sm:$0xff]  ;;  %v2324_v20 = vld [vmem:[#allocation8 + $0x3a0] sm:$0xff] }
 0x7d7   :  { %v2293_v39 = vld [vmem:[#allocation8 + $0x2a8] sm:$0xff] }
 0x7d8   :  { %1812 = vmatmul.mubr.f32.vlgmr.msra.gmra.mrb[14].mxu0 %v5962_v5  ;;  %1883 = vmatmul.mubr.f32.vlgmr.msra.gmra.mrb[14].mxu1 %v5962_v5 }
 0x7d9   :  { %4407 = vmatpush1.bf16.msra.mxu0 %v4406_v33  ;;  %4439 = vmatpush1.bf16.msra.mxu1 %v4438_v34  ;;  %v1969_v33 = vld [vmem:[#allocation6 + $0x150] sm:$0xff] }
 0x7da   :  { %4409 = vmatprep.subr.bf16.mxu0 %v4408_v45  ;;  %4441 = vmatprep.subr.bf16.mxu1 %v4440_v46  ;;  %v1973_v34 = vld [vmem:[#allocation6 + $0x170] sm:$0xff]  ;;  %v1978_v45 = vld [vmem:[#allocation6 + $0x198] sm:$0xff] }
 0x7db   :  { %2077 = vmatprep.mubr.f32.mxu0 %v5418_v6  ;;  %2190 = vmatprep.mubr.f32.mxu1 %v5418_v6  ;;  %v1982_v46 = vld [vmem:[#allocation6 + $0x1b8] sm:$0xff]  ;;  %v4458_v51 = vpack.c.bf16 %v1973_v34, %v1969_v33  ;;  %v2290_v33 = vld [vmem:[#allocation8 + $0x290] sm:$0xff] }
 0x7dc   :  { %v4460_v58 = vpack.c.bf16 %v1982_v46, %v1978_v45  ;;  %v2294_v34 = vld [vmem:[#allocation8 + $0x2b0] sm:$0xff]  ;;  %v2301_v45 = vld [vmem:[#allocation8 + $0x2e8] sm:$0xff]  ;;  %v2299_v46 = vld [vmem:[#allocation8 + $0x2d8] sm:$0xff] }
 0x7dd   :  { %4411 = vmatpush1.bf16.msra.mxu0 %v4410_v48  ;;  %4443 = vmatpush1.bf16.msra.mxu1 %v4442_v61  ;;  %v1977_v48 = vld [vmem:[#allocation6 + $0x190] sm:$0xff]  ;;  %v6027_v35 = vpack.c.bf16 %v2294_v34, %v2290_v33  ;;  %v2333_v33 = vld [vmem:[#allocation8 + $0x3e8] sm:$0xff] }
 0x7de   :  { %4413 = vmatprep.subr.bf16.mxu0 %v4412_v7  ;;  %4445 = vmatprep.subr.bf16.mxu1 %v4444_v8  ;;  %v1981_v61 = vld [vmem:[#allocation6 + $0x1b0] sm:$0xff]  ;;  %v1986_v7 = vld [vmem:[#allocation6 + $0x1d8] sm:$0xff] }
 0x7df   :  { %v1990_v8 = vld [vmem:[#allocation6 + $0x1f8] sm:$0xff]  ;;  %v4462_v14 = vpack.c.bf16 %v1981_v61, %v1977_v48  ;;  %v2298_v48 = vld [vmem:[#allocation8 + $0x2d0] sm:$0xff] }
 0x7e0   :  { %v4464_v2 = vpack.c.bf16 %v1990_v8, %v1986_v7  ;;  %v2302_v61 = vld [vmem:[#allocation8 + $0x2f0] sm:$0xff]  ;;  %v2309_v7 = vld [vmem:[#allocation8 + $0x328] sm:$0xff]  ;;  %v2304_v8 = vld [vmem:[#allocation8 + $0x300] sm:$0xff] }
 0x7e1   :  { %4415 = vmatpush1.bf16.msra.mxu0 %v4414_v10  ;;  %4447 = vmatpush1.bf16.msra.mxu1 %v4446_v11  ;;  %v1985_v10 = vld [vmem:[#allocation6 + $0x1d0] sm:$0xff]  ;;  %v6039_v1 = vpack.c.bf16 %v2302_v61, %v2298_v48 }
 0x7e2   :  { %4417 = vmatprep.subr.bf16.mxu0 %v4416_v24  ;;  %4449 = vmatprep.subr.bf16.mxu1 %v4448_v25  ;;  %v1989_v11 = vld [vmem:[#allocation6 + $0x1f0] sm:$0xff]  ;;  %v2276_v24 = vld [vmem:[#allocation8 + $0x220] sm:$0xff] }
 0x7e3   :  { %v4466_v18 = vpack.c.bf16 %v1989_v11, %v1985_v10  ;;  %v2310_v11 = vld [vmem:[#allocation8 + $0x330] sm:$0xff] }
 0x7e4   :  { %v2330_v61 = vld [vmem:[#allocation8 + $0x3d0] sm:$0xff] }
 0x7e5   :  { %4419 = vmatpush1.bf16.msra.mxu0 %v4418_v53  ;;  %4451 = vmatpush1.bf16.msra.mxu1 %v4450_v55  ;;  %v6008_v53 = vpack.c.bf16 %v2285_v43, %v2281_v37  ;;  %v2280_v55 = vld [vmem:[#allocation8 + $0x240] sm:$0xff] }
 0x7e6   :  { %4421 = vmatprep.subr.bf16.mxu0 %v4420_v9  ;;  %4453 = vmatprep.subr.bf16.mxu1 %v4452_v12  ;;  %v6010_v9 = vpack.c.bf16 %v2284_v62, %v2280_v55  ;;  %v6012_v12 = vpack.c.bf16 %v2287_v63, %v2283_v44  ;;  %v2321_v44 = vld [vmem:[#allocation8 + $0x388] sm:$0xff]  ;;  %v2320_v62 = vld [vmem:[#allocation8 + $0x380] sm:$0xff] }
 0x7e7   :  { %v2325_v55 = vld [vmem:[#allocation8 + $0x3a8] sm:$0xff]  ;;  %v6071_v34 = vpack.c.bf16 %v2324_v20, %v2320_v62 }
 0x7e8   :  { %v6065_v19 = vpack.c.bf16 %v2325_v55, %v2321_v44 }
 0x7e9   :  { %4423 = vmatpush1.bf16.msra.mxu0 %v4422_v42  ;;  %4455 = vmatpush1.bf16.msra.mxu1 %v4454_v16  ;;  %v6020_v42 = vpack.c.bf16 %v2293_v39, %v2289_v38  ;;  %v2288_v16 = vld [vmem:[#allocation8 + $0x280] sm:$0xff]  ;;  %v2323_v38 = vld [vmem:[#allocation8 + $0x398] sm:$0xff] }
 0x7ea   :  { %4425 = vmatprep.subr.bf16.mxu0 %v4424_v26  ;;  %4457 = vmatprep.subr.bf16.mxu1 %v4456_v27  ;;  %v6022_v26 = vpack.c.bf16 %v2292_v21, %v2288_v16  ;;  %v6024_v27 = vpack.c.bf16 %v2295_v23, %v2291_v41  ;;  %v2327_v39 = vld [vmem:[#allocation8 + $0x3b8] sm:$0xff]  ;;  %v2322_v16 = vld [vmem:[#allocation8 + $0x390] sm:$0xff]  ;;  %v2329_v23 = vld [vmem:[#allocation8 + $0x3c8] sm:$0xff] }
 0x7eb   :  { %v6068_v41 = vpack.c.bf16 %v2327_v39, %v2323_v38  ;;  %v2326_v21 = vld [vmem:[#allocation8 + $0x3b0] sm:$0xff] }
 0x7ed   :  { %4427 = vmatpush1.bf16.msra.mxu0 %v4426_v50  ;;  %4459 = vmatpush1.bf16.msra.mxu1 %v4458_v51  ;;  %v6032_v50 = vpack.c.bf16 %v2301_v45, %v2297_v40  ;;  %v2296_v51 = vld [vmem:[#allocation8 + $0x2c0] sm:$0xff]  ;;  %v6075_v40 = vpack.c.bf16 %v2326_v21, %v2322_v16  ;;  %v6077_v45 = vpack.c.bf16 %v2333_v33, %v2329_v23 }
 0x7ee   :  { %4429 = vmatprep.subr.bf16.mxu0 %v4428_v47  ;;  %4461 = vmatprep.subr.bf16.mxu1 %v4460_v58  ;;  %v6034_v47 = vpack.c.bf16 %v2300_v56, %v2296_v51  ;;  %v6036_v58 = vpack.c.bf16 %v2303_v57, %v2299_v46  ;;  %v2331_v46 = vld [vmem:[#allocation8 + $0x3d8] sm:$0xff]  ;;  %v2328_v56 = vld [vmem:[#allocation8 + $0x3c0] sm:$0xff] }
 0x7ef   :  { %v2335_v51 = vld [vmem:[#allocation8 + $0x3f8] sm:$0xff]  ;;  %v2332_v57 = vld [vmem:[#allocation8 + $0x3e0] sm:$0xff] }
 0x7f0   :  { %v6083_v48 = vpack.c.bf16 %v2335_v51, %v2331_v46  ;;  %v1991_v46 = vld [vmem:[%s6431_s4] sm:$0xf] }
 0x7f1   :  { %4431 = vmatpush1.bf16.msra.mxu0 %v4430_v13  ;;  %4463 = vmatpush1.bf16.msra.mxu1 %v4462_v14  ;;  %v2308_v13 = vld [vmem:[#allocation8 + $0x320] sm:$0xff]  ;;  %v6043_v14 = vpack.c.bf16 %v2309_v7, %v2305_v0  ;;  %v6085_v0 = vpack.c.bf16 %v2332_v57, %v2328_v56  ;;  %v2334_v7 = vld [vmem:[#allocation8 + $0x3f0] sm:$0xff] }
 0x7f2   :  { %4433 = vmatprep.subr.bf16.mxu0 %v4432_v60  ;;  %4465 = vmatprep.subr.bf16.mxu1 %v4464_v2  ;;  %v6045_v59 = vpack.c.bf16 %v2308_v13, %v2304_v8  ;;  %v2307_v60 = vld [vmem:[#allocation8 + $0x318] sm:$0xff]  ;;  %v6088_v8 = vpack.c.bf16 %v2334_v7, %v2330_v61 }
 0x7f3   :  { %v2311_v2 = vld [vmem:[#allocation8 + $0x338] sm:$0xff] }
 0x7f4   :  { %v6048_v10 = vpack.c.bf16 %v2311_v2, %v2307_v60 }
 0x7f5   :  { %4435 = vmatpush1.bf16.msra.mxu0 %v4434_v17  ;;  %4467 = vmatpush1.bf16.msra.mxu1 %v4466_v18  ;;  %v2313_v17 = vld [vmem:[#allocation8 + $0x348] sm:$0xff] }
 0x7f6   :  { %v2317_v18 = vld [vmem:[#allocation8 + $0x368] sm:$0xff] }
 0x7f8   :  { %2078 = vmatmul.mubr.f32.vlgmr.msra.gmra.mrb[16].mxu0 %v5712_v22  ;;  %2191 = vmatmul.mubr.f32.vlgmr.msra.gmra.mrb[16].mxu1 %v5712_v22  ;;  %v2273_v22 = vld [vmem:[#allocation8 + $0x208] sm:$0xff] }
 0x7f9   :  { %2083 = vmatprep.mubr.f32.mxu0 %v5418_v6  ;;  %2196 = vmatprep.mubr.f32.mxu1 %v5418_v6 }
 0x7fc   :  { %2084 = vmatmul.mubr.f32.gmra.mrb[18].mxu0 %v5754_v4  ;;  %2197 = vmatmul.mubr.f32.gmra.mrb[18].mxu1 %v5754_v4  ;;  %v2277_v4 = vld [vmem:[#allocation8 + $0x228] sm:$0xff] }
 0x7fd   :  { %2089 = vmatprep.mubr.f32.mxu0 %v5418_v6  ;;  %2202 = vmatprep.mubr.f32.mxu1 %v5418_v6 }
 0x800   :  { %2090 = vmatmul.mubr.f32.gmra.mrb[20].mxu0 %v5796_v52  ;;  %2203 = vmatmul.mubr.f32.gmra.mrb[20].mxu1 %v5796_v52  ;;  %v2275_v52 = vld [vmem:[#allocation8 + $0x218] sm:$0xff] }
 0x801   :  { %2095 = vmatprep.mubr.f32.mxu0 %v5418_v6  ;;  %2208 = vmatprep.mubr.f32.mxu1 %v5418_v6 }
 0x804   :  { %2096 = vmatmul.mubr.f32.gmra.mrb[22].mxu0 %v5838_v54  ;;  %2209 = vmatmul.mubr.f32.gmra.mrb[22].mxu1 %v5838_v54  ;;  %v5996_v54 = vpack.c.bf16 %v2277_v4, %v2273_v22  ;;  %v6051_v22 = vpack.c.bf16 %v2310_v11, %v2306_v3  ;;  %v6053_v4 = vpack.c.bf16 %v2317_v18, %v2313_v17 }
 0x805   :  { %2101 = vmatprep.mubr.f32.mxu0 %v5418_v6  ;;  %2214 = vmatprep.mubr.f32.mxu1 %v5418_v6 }
 0x806   :  { %4469 = vmatprep.subr.bf16.mxu0 %v5996_v54 }
 0x808   :  { %2102 = vmatmul.mubr.f32.gmra.mrb[24].mxu0 %v5880_v32  ;;  %2215 = vmatmul.mubr.f32.gmra.mrb[24].mxu1 %v5880_v32  ;;  %v2272_v32 = vld [vmem:[#allocation8 + $0x200] sm:$0xff] }
 0x809   :  { %2107 = vmatprep.mubr.f32.mxu0 %v5418_v6  ;;  %2220 = vmatprep.mubr.f32.mxu1 %v5418_v6  ;;  %v5998_v25 = vpack.c.bf16 %v2276_v24, %v2272_v32  ;;  %v2316_v32 = vld [vmem:[#allocation8 + $0x360] sm:$0xff]  ;;  %v2315_v24 = vld [vmem:[#allocation8 + $0x358] sm:$0xff] }
 0x80b   :  { %4471 = vmatpush1.bf16.msra.mxu0 %v5998_v25 }
 0x80c   :  { %2108 = vmatmul.mubr.f32.gmra.mrb[26].mxu0 %v5922_v15  ;;  %2221 = vmatmul.mubr.f32.gmra.mrb[26].mxu1 %v5922_v15  ;;  %v2279_v15 = vld [vmem:[#allocation8 + $0x238] sm:$0xff] }
 0x80d   :  { %2113 = vmatprep.mubr.f32.mxu0 %v5418_v6  ;;  %2226 = vmatprep.mubr.f32.mxu1 %v5418_v6  ;;  %v6000_v30 = vpack.c.bf16 %v2279_v15, %v2275_v52  ;;  %v2312_v52 = vld [vmem:[#allocation8 + $0x340] sm:$0xff]  ;;  %v2319_v15 = vld [vmem:[#allocation8 + $0x378] sm:$0xff] }
 0x80e   :  { %4473 = vmatprep.subr.bf16.mxu0 %v6008_v53  ;;  %v6057_v37 = vpack.c.bf16 %v2316_v32, %v2312_v52  ;;  %v6059_v43 = vpack.c.bf16 %v2319_v15, %v2315_v24 }
 0x80f   :  { %4501 = vmatprep.subr.bf16.mxu1 %v6000_v30  ;;  %4475 = vmatpush1.bf16.msra.mxu0 %v6010_v9 }
 0x810   :  { %2114 = vmatmul.mubr.f32.gmra.mrb[28].mxu0 %v5962_v5  ;;  %2227 = vmatmul.mubr.f32.gmra.mrb[28].mxu1 %v5962_v5  ;;  %v6003_v5 = vpack.c.bf16 %v2278_v36, %v2274_v31  ;;  %v2314_v31 = vld [vmem:[#allocation8 + $0x350] sm:$0xff] }
 0x811   :  { %2119 = vmatprep.mubr.f32.mxu0 %v5418_v6  ;;  %2232 = vmatprep.mubr.f32.mxu1 %v5418_v6  ;;  %v2318_v36 = vld [vmem:[#allocation8 + $0x370] sm:$0xff] }
 0x812   :  { %4503 = vmatpush1.bf16.msra.mxu1 %v6003_v5  ;;  %4477 = vmatprep.subr.bf16.mxu0 %v6020_v42  ;;  %v6063_v63 = vpack.c.bf16 %v2318_v36, %v2314_v31 }
 0x813   :  { %4505 = vmatprep.subr.bf16.mxu1 %v6012_v12  ;;  %4479 = vmatpush1.bf16.msra.mxu0 %v6022_v26 }
 0x814   :  { %4481 = vmatprep.subr.bf16.mxu0 %v6032_v50 }
 0x816   :  { %4507 = vmatpush1.bf16.msra.mxu1 %v6015_v29 }
 0x817   :  { %4509 = vmatprep.subr.bf16.mxu1 %v6024_v27  ;;  %4483 = vmatpush1.bf16.msra.mxu0 %v6034_v47 }
 0x818   :  { %4485 = vmatprep.subr.bf16.mxu0 %v6043_v14 }
 0x81a   :  { %4511 = vmatpush1.bf16.msra.mxu1 %v6027_v35 }
 0x81b   :  { %4513 = vmatprep.subr.bf16.mxu1 %v6036_v58  ;;  %4487 = vmatpush1.bf16.msra.mxu0 %v6045_v59 }
 0x81c   :  { %4489 = vmatprep.subr.bf16.mxu0 %v6053_v4 }
 0x81e   :  { %4515 = vmatpush1.bf16.msra.mxu1 %v6039_v1 }
 0x81f   :  { %4517 = vmatprep.subr.bf16.mxu1 %v6048_v10  ;;  %4491 = vmatpush1.bf16.msra.mxu0 %v6057_v37 }
 0x820   :  { %4493 = vmatprep.subr.bf16.mxu0 %v6065_v19 }
 0x822   :  { %4519 = vmatpush1.bf16.msra.mxu1 %v6051_v22 }
 0x823   :  { %4521 = vmatprep.subr.bf16.mxu1 %v6059_v43  ;;  %4495 = vmatpush1.bf16.msra.mxu0 %v6071_v34 }
 0x824   :  { %4497 = vmatprep.subr.bf16.mxu0 %v6077_v45 }
 0x826   :  { %4523 = vmatpush1.bf16.msra.mxu1 %v6063_v63 }
 0x827   :  { %4525 = vmatprep.subr.bf16.mxu1 %v6068_v41  ;;  %4499 = vmatpush1.bf16.msra.mxu0 %v6085_v0 }
 0x828   :  { %4533 = vmatprep.subr.bf16.mxu0 %v5996_v54 }
 0x82a   :  { %4527 = vmatpush1.bf16.msra.mxu1 %v6075_v40 }
 0x82b   :  { %4529 = vmatprep.subr.bf16.mxu1 %v6083_v48 }
 0x82e   :  { %4531 = vmatpush1.bf16.msra.mxu1 %v6088_v8 }
 0x82f   :  { %4565 = vmatprep.subr.bf16.mxu1 %v6000_v30 }
 0x8ab   :  { %v1813_v13 = vpop.f32.mrb[14].mxu0  ;;  %v1884_v60 = vpop.f32.mrb[14].mxu1 }
 0x8ac   :  { %v3794_v2 = vmul.f32 -1.442695, %v1813_v13  ;;  %v1815_v3 = vpop.f32.mrb[15].mxu0  ;;  %v1886_v11 = vpop.f32.mrb[15].mxu1 }
 0x8ad   :  { %v3795_v17 = vmul.f32 -1.442695, %v1815_v3  ;;  %v3796_v18 = vmul.f32 -1.442695, %v1886_v11 }
 0x8ae   :  { %5198 = vpow2.f32 %v3794_v2 }
 0x8af   :  { %5200 = vpow2.f32 %v3795_v17 }
 0x8b0   :  { %5202 = vpow2.f32 %v3796_v18 }
 0x8b1   :  { %5204 = vtanh.f32 %v1884_v60 }
 0x8b8   :  { %v5199_v52 = vpop.eup %5198 }
 0x8b9   :  { %v5201_v32 = vpop.eup %5200  ;;  %v1896_v24 = vadd.f32 1.0, %v5199_v52 }
 0x8ba   :  { %v1902_v15 = vadd.f32 1.0, %v5201_v32  ;;  %v5203_v31 = vpop.eup %5202 }
 0x8bb   :  { %5206 = vrcp.f32 %v1896_v24  ;;  %v5205_v36 = vpop.eup %5204  ;;  %v1909_v20 = vadd.f32 1.0, %v5203_v31 }
 0x8bc   :  { %5208 = vrcp.f32 %v1902_v15 }
 0x8bd   :  { %5210 = vrcp.f32 %v1909_v20 }
 0x8c5   :  { %v5207_v44 = vpop.eup %5206 }
 0x8c6   :  { %v5209_v55 = vpop.eup %5208  ;;  %v1913_v62 = vmul.f32 %v5207_v44, %v5205_v36 }
 0x8c7   :  { %v1912_v38 = vmul.f32 %v5209_v55, %v5959_v28  ;;  %v5211_v16 = vpop.eup %5210  ;;  %v1994_v28 = vshrl.u32 %v69_v49, 7 }
 0x8c9   :  { %v1914_v39 = vadd.f32 %v1913_v62, %v1912_v38  ;;  %v1995_v33 = vsub.s32 0, %v1994_v28  ;;  %v1999_v51 = vsub.s32 1, %v1994_v28  ;;  %v2007_v13 = vsub.s32 3, %v1994_v28 }
 0x8ca   :  { %v2003_v52 = vsub.s32 2, %v1994_v28 }
 0x8cb   :  { %5212 = vtanh.f32 %v1914_v39  ;;  %v6137_v56 = vrot.slane %v1991_v46, %v1995_v33  ;;  %v6139_v57 = vrot.slane %v1991_v46, %v1999_v51  ;;  %v6143_v18 = vrot.slane %v1991_v46, %v2007_v13 }
 0x8cc   :  { %v6146_v24 = vrot.slane %v1991_v46, %v2003_v52 }
 0x8d5   :  { %v5213_v21 = vpop.eup %5212 }
 0x8d6   :  { %v1916_v23 = vmul.f32 %v5213_v21, %v5211_v16 }
 0x8d8   :  { %2120 = vmatmul.mubr.f32.gmra.mrb[30].mxu0 %v1916_v23  ;;  %2233 = vmatmul.mubr.f32.gmra.mrb[30].mxu1 %v1916_v23 }
 0x8d9   :  { %2404 = vmatprep.mubr.f32.mxu0 %v5418_v6  ;;  %2475 = vmatprep.mubr.f32.mxu1 %v5418_v6 }
 0x8dc   :  { %2405 = vmatmul.mubr.f32.vlgmr.msra.gmra.mrb[16].mxu0 %v5418_v6  ;;  %2476 = vmatmul.mubr.f32.vlgmr.msra.gmra.mrb[16].mxu1 %v5418_v6 }
 0x8dd   :  { %4535 = vmatpush1.bf16.msra.mxu0 %v5998_v25  ;;  %4567 = vmatpush1.bf16.msra.mxu1 %v6003_v5 }
 0x8de   :  { %4537 = vmatprep.subr.bf16.mxu0 %v6008_v53  ;;  %4569 = vmatprep.subr.bf16.mxu1 %v6012_v12 }
 0x8df   :  { %2579 = vmatprep.mubr.f32.mxu0 %v5418_v6  ;;  %2650 = vmatprep.mubr.f32.mxu1 %v5418_v6 }
 0x8e1   :  { %4539 = vmatpush1.bf16.msra.mxu0 %v6010_v9  ;;  %4571 = vmatpush1.bf16.msra.mxu1 %v6015_v29 }
 0x8e2   :  { %4541 = vmatprep.subr.bf16.mxu0 %v6020_v42  ;;  %4573 = vmatprep.subr.bf16.mxu1 %v6024_v27 }
 0x8e5   :  { %4543 = vmatpush1.bf16.msra.mxu0 %v6022_v26  ;;  %4575 = vmatpush1.bf16.msra.mxu1 %v6027_v35 }
 0x8e6   :  { %4545 = vmatprep.subr.bf16.mxu0 %v6032_v50  ;;  %4577 = vmatprep.subr.bf16.mxu1 %v6036_v58 }
 0x8e9   :  { %4547 = vmatpush1.bf16.msra.mxu0 %v6034_v47  ;;  %4579 = vmatpush1.bf16.msra.mxu1 %v6039_v1 }
 0x8ea   :  { %4549 = vmatprep.subr.bf16.mxu0 %v6043_v14  ;;  %4581 = vmatprep.subr.bf16.mxu1 %v6048_v10 }
 0x8ed   :  { %4551 = vmatpush1.bf16.msra.mxu0 %v6045_v59  ;;  %4583 = vmatpush1.bf16.msra.mxu1 %v6051_v22 }
 0x8ee   :  { %4553 = vmatprep.subr.bf16.mxu0 %v6053_v4  ;;  %4585 = vmatprep.subr.bf16.mxu1 %v6059_v43 }
 0x8f1   :  { %4555 = vmatpush1.bf16.msra.mxu0 %v6057_v37  ;;  %4587 = vmatpush1.bf16.msra.mxu1 %v6063_v63 }
 0x8f2   :  { %4557 = vmatprep.subr.bf16.mxu0 %v6065_v19  ;;  %4589 = vmatprep.subr.bf16.mxu1 %v6068_v41 }
 0x8f5   :  { %4559 = vmatpush1.bf16.msra.mxu0 %v6071_v34  ;;  %4591 = vmatpush1.bf16.msra.mxu1 %v6075_v40 }
 0x8f6   :  { %4561 = vmatprep.subr.bf16.mxu0 %v6077_v45  ;;  %4593 = vmatprep.subr.bf16.mxu1 %v6083_v48 }
 0x8f9   :  { %4563 = vmatpush1.bf16.msra.mxu0 %v6085_v0  ;;  %4595 = vmatpush1.bf16.msra.mxu1 %v6088_v8 }
 0x8fa   :  { %4597 = vmatprep.subr.bf16.mxu0 %v5996_v54  ;;  %4629 = vmatprep.subr.bf16.mxu1 %v6000_v30 }
 0x9af   :  { %v2406_v61 = vpop.f32.mrb[16].mxu0  ;;  %v2477_v7 = vpop.f32.mrb[16].mxu1 }
 0x9b0   :  { %v4980_v60 = vadd.f32 %v2406_v61, %v6137_v56  ;;  %v2408_v2 = vpop.f32.mrb[17].mxu0  ;;  %v2479_v3 = vpop.f32.mrb[17].mxu1  ;;  %v4996_v31 = vadd.f32 %v2477_v7, %v6146_v24 }
 0x9b1   :  { %v4981_v11 = vadd.f32 %v2408_v2, %v6139_v57  ;;  %v4997_v32 = vadd.f32 %v2479_v3, %v6143_v18 }
 0x9b2   :  { %v3797_v49 = vmul.f32 -1.442695, %v4980_v60 }
 0x9b3   :  { %v3798_v17 = vmul.f32 -1.442695, %v4981_v11  ;;  %v3799_v15 = vmul.f32 -1.442695, %v4997_v32 }
 0x9b4   :  { %5214 = vpow2.f32 %v3797_v49 }
 0x9b5   :  { %5216 = vpow2.f32 %v3798_v17 }
 0x9b6   :  { %5218 = vpow2.f32 %v3799_v15 }
 0x9b7   :  { %5220 = vtanh.f32 %v4996_v31 }
 0x9be   :  { %v5215_v36 = vpop.eup %5214 }
 0x9bf   :  { %v5217_v44 = vpop.eup %5216  ;;  %v2489_v55 = vadd.f32 1.0, %v5215_v36 }
 0x9c0   :  { %v2495_v62 = vadd.f32 1.0, %v5217_v44  ;;  %v5219_v20 = vpop.eup %5218 }
 0x9c1   :  { %5222 = vrcp.f32 %v2489_v55  ;;  %v5221_v38 = vpop.eup %5220  ;;  %v2502_v23 = vadd.f32 1.0, %v5219_v20 }
 0x9c2   :  { %5224 = vrcp.f32 %v2495_v62 }
 0x9c3   :  { %5226 = vrcp.f32 %v2502_v23 }
 0x9cb   :  { %v5223_v39 = vpop.eup %5222 }
 0x9cc   :  { %v5225_v16 = vpop.eup %5224  ;;  %v2506_v21 = vmul.f32 %v5223_v39, %v5221_v38 }
 0x9cd   :  { %v2505_v28 = vmul.f32 0.0, %v5225_v16  ;;  %v5227_v46 = vpop.eup %5226 }
 0x9cf   :  { %v6149_v33 = vadd.f32 %v2506_v21, %v2505_v28 }
 0x9d1   :  { %5228 = vtanh.f32 %v6149_v33 }
 0x9db   :  { %v5229_v51 = vpop.eup %5228 }
 0x9dc   :  { %v2509_v61 = vmul.f32 %v5229_v51, %v5227_v46 }
 0x9de   :  { %2510 = vst [vmem:[%s6432_s5] sm:$0xff] %v2509_v61  ;;  %2580 = vmatmul.mubr.f32.vlgmr.msra.gmra.mrb[18].mxu0 %v2509_v61  ;;  %2651 = vmatmul.mubr.f32.vlgmr.msra.gmra.mrb[18].mxu1 %v2509_v61 }
 0x9df   :  { %4599 = vmatpush1.bf16.msra.mxu0 %v5998_v25  ;;  %4631 = vmatpush1.bf16.msra.mxu1 %v6003_v5 }
 0x9e0   :  { %4601 = vmatprep.subr.bf16.mxu0 %v6008_v53  ;;  %4633 = vmatprep.subr.bf16.mxu1 %v6012_v12 }
 0x9e1   :  { %2755 = vmatprep.mubr.f32.mxu0 %v5418_v6  ;;  %2826 = vmatprep.mubr.f32.mxu1 %v5418_v6 }
 0x9e3   :  { %4603 = vmatpush1.bf16.msra.mxu0 %v6010_v9  ;;  %4635 = vmatpush1.bf16.msra.mxu1 %v6015_v29 }
 0x9e4   :  { %4605 = vmatprep.subr.bf16.mxu0 %v6020_v42  ;;  %4637 = vmatprep.subr.bf16.mxu1 %v6024_v27 }
 0x9e7   :  { %4607 = vmatpush1.bf16.msra.mxu0 %v6022_v26  ;;  %4639 = vmatpush1.bf16.msra.mxu1 %v6027_v35 }
 0x9e8   :  { %4609 = vmatprep.subr.bf16.mxu0 %v6032_v50  ;;  %4641 = vmatprep.subr.bf16.mxu1 %v6036_v58 }
 0x9eb   :  { %4611 = vmatpush1.bf16.msra.mxu0 %v6034_v47  ;;  %4643 = vmatpush1.bf16.msra.mxu1 %v6039_v1 }
 0x9ec   :  { %4613 = vmatprep.subr.bf16.mxu0 %v6043_v14  ;;  %4645 = vmatprep.subr.bf16.mxu1 %v6048_v10 }
 0x9ef   :  { %4615 = vmatpush1.bf16.msra.mxu0 %v6045_v59  ;;  %4647 = vmatpush1.bf16.msra.mxu1 %v6051_v22 }
 0x9f0   :  { %4617 = vmatprep.subr.bf16.mxu0 %v6053_v4  ;;  %4649 = vmatprep.subr.bf16.mxu1 %v6059_v43 }
 0x9f3   :  { %4619 = vmatpush1.bf16.msra.mxu0 %v6057_v37  ;;  %4651 = vmatpush1.bf16.msra.mxu1 %v6063_v63 }
 0x9f4   :  { %4621 = vmatprep.subr.bf16.mxu0 %v6065_v19  ;;  %4653 = vmatprep.subr.bf16.mxu1 %v6068_v41 }
 0x9f7   :  { %4623 = vmatpush1.bf16.msra.mxu0 %v6071_v34  ;;  %4655 = vmatpush1.bf16.msra.mxu1 %v6075_v40 }
 0x9f8   :  { %4625 = vmatprep.subr.bf16.mxu0 %v6077_v45  ;;  %4657 = vmatprep.subr.bf16.mxu1 %v6083_v48 }
 0x9fb   :  { %4627 = vmatpush1.bf16.msra.mxu0 %v6085_v0  ;;  %4659 = vmatpush1.bf16.msra.mxu1 %v6088_v8 }
 0x9fc   :  { %4661 = vmatprep.subr.bf16.mxu0 %v5996_v54  ;;  %4693 = vmatprep.subr.bf16.mxu1 %v6000_v30 }
 0xab1   :  { %v2581_v7 = vpop.f32.mrb[18].mxu0  ;;  %v2652_v13 = vpop.f32.mrb[18].mxu1 }
 0xab2   :  { %v4982_v60 = vadd.f32 %v2581_v7, %v6137_v56  ;;  %v2583_v2 = vpop.f32.mrb[19].mxu0  ;;  %v2654_v3 = vpop.f32.mrb[19].mxu1  ;;  %v4998_v15 = vadd.f32 %v2652_v13, %v6146_v24 }
 0xab3   :  { %v4983_v11 = vadd.f32 %v2583_v2, %v6139_v57  ;;  %v4999_v52 = vadd.f32 %v2654_v3, %v6143_v18 }
 0xab4   :  { %v3800_v49 = vmul.f32 -1.442695, %v4982_v60 }
 0xab5   :  { %v3801_v17 = vmul.f32 -1.442695, %v4983_v11  ;;  %v3802_v32 = vmul.f32 -1.442695, %v4999_v52 }
 0xab6   :  { %5230 = vpow2.f32 %v3800_v49 }
 0xab7   :  { %5232 = vpow2.f32 %v3801_v17 }
 0xab8   :  { %5234 = vpow2.f32 %v3802_v32 }
 0xab9   :  { %5236 = vtanh.f32 %v4998_v15 }
 0xac0   :  { %v5231_v31 = vpop.eup %5230 }
 0xac1   :  { %v5233_v36 = vpop.eup %5232  ;;  %v2664_v44 = vadd.f32 1.0, %v5231_v31 }
 0xac2   :  { %v2670_v55 = vadd.f32 1.0, %v5233_v36  ;;  %v5235_v62 = vpop.eup %5234 }
 0xac3   :  { %5238 = vrcp.f32 %v2664_v44  ;;  %v5237_v20 = vpop.eup %5236  ;;  %v2677_v21 = vadd.f32 1.0, %v5235_v62 }
 0xac4   :  { %5240 = vrcp.f32 %v2670_v55 }
 0xac5   :  { %5242 = vrcp.f32 %v2677_v21 }
 0xacd   :  { %v5239_v38 = vpop.eup %5238 }
 0xace   :  { %v5241_v39 = vpop.eup %5240  ;;  %v2681_v16 = vmul.f32 %v5239_v38, %v5237_v20 }
 0xacf   :  { %v2680_v23 = vmul.f32 %v5241_v39, %v6149_v33  ;;  %v5243_v46 = vpop.eup %5242 }
 0xad1   :  { %v6194_v28 = vadd.f32 %v2681_v16, %v2680_v23 }
 0xad3   :  { %5244 = vtanh.f32 %v6194_v28 }
 0xadd   :  { %v5245_v51 = vpop.eup %5244 }
 0xade   :  { %v2684_v61 = vmul.f32 %v5245_v51, %v5243_v46 }
 0xae0   :  { %3803 = vst [vmem:[%s6432_s5 + $0x8] sm:$0xff] %v2684_v61  ;;  %2756 = vmatmul.mubr.f32.vlgmr.msra.gmra.mrb[20].mxu0 %v2684_v61  ;;  %2827 = vmatmul.mubr.f32.vlgmr.msra.gmra.mrb[20].mxu1 %v2684_v61 }
 0xae1   :  { %4663 = vmatpush1.bf16.msra.mxu0 %v5998_v25  ;;  %4695 = vmatpush1.bf16.msra.mxu1 %v6003_v5 }
 0xae2   :  { %4665 = vmatprep.subr.bf16.mxu0 %v6008_v53  ;;  %4697 = vmatprep.subr.bf16.mxu1 %v6012_v12 }
 0xae3   :  { %2931 = vmatprep.mubr.f32.mxu0 %v5418_v6  ;;  %3002 = vmatprep.mubr.f32.mxu1 %v5418_v6 }
 0xae5   :  { %4667 = vmatpush1.bf16.msra.mxu0 %v6010_v9  ;;  %4699 = vmatpush1.bf16.msra.mxu1 %v6015_v29 }
 0xae6   :  { %4669 = vmatprep.subr.bf16.mxu0 %v6020_v42  ;;  %4701 = vmatprep.subr.bf16.mxu1 %v6024_v27 }
 0xae9   :  { %4671 = vmatpush1.bf16.msra.mxu0 %v6022_v26  ;;  %4703 = vmatpush1.bf16.msra.mxu1 %v6027_v35 }
 0xaea   :  { %4673 = vmatprep.subr.bf16.mxu0 %v6032_v50  ;;  %4705 = vmatprep.subr.bf16.mxu1 %v6036_v58 }
 0xaed   :  { %4675 = vmatpush1.bf16.msra.mxu0 %v6034_v47  ;;  %4707 = vmatpush1.bf16.msra.mxu1 %v6039_v1 }
 0xaee   :  { %4677 = vmatprep.subr.bf16.mxu0 %v6043_v14  ;;  %4709 = vmatprep.subr.bf16.mxu1 %v6048_v10 }
 0xaf1   :  { %4679 = vmatpush1.bf16.msra.mxu0 %v6045_v59  ;;  %4711 = vmatpush1.bf16.msra.mxu1 %v6051_v22 }
 0xaf2   :  { %4681 = vmatprep.subr.bf16.mxu0 %v6053_v4  ;;  %4713 = vmatprep.subr.bf16.mxu1 %v6059_v43 }
 0xaf5   :  { %4683 = vmatpush1.bf16.msra.mxu0 %v6057_v37  ;;  %4715 = vmatpush1.bf16.msra.mxu1 %v6063_v63 }
 0xaf6   :  { %4685 = vmatprep.subr.bf16.mxu0 %v6065_v19  ;;  %4717 = vmatprep.subr.bf16.mxu1 %v6068_v41 }
 0xaf9   :  { %4687 = vmatpush1.bf16.msra.mxu0 %v6071_v34  ;;  %4719 = vmatpush1.bf16.msra.mxu1 %v6075_v40 }
 0xafa   :  { %4689 = vmatprep.subr.bf16.mxu0 %v6077_v45  ;;  %4721 = vmatprep.subr.bf16.mxu1 %v6083_v48 }
 0xafd   :  { %4691 = vmatpush1.bf16.msra.mxu0 %v6085_v0  ;;  %4723 = vmatpush1.bf16.msra.mxu1 %v6088_v8 }
 0xafe   :  { %4725 = vmatprep.subr.bf16.mxu0 %v5996_v54  ;;  %4757 = vmatprep.subr.bf16.mxu1 %v6000_v30 }
 0xbb3   :  { %v2757_v33 = vpop.f32.mrb[20].mxu0  ;;  %v2828_v7 = vpop.f32.mrb[20].mxu1 }
 0xbb4   :  { %v4984_v13 = vadd.f32 %v2757_v33, %v6137_v56  ;;  %v2759_v60 = vpop.f32.mrb[21].mxu0  ;;  %v2830_v2 = vpop.f32.mrb[21].mxu1  ;;  %v5000_v32 = vadd.f32 %v2828_v7, %v6146_v24 }
 0xbb5   :  { %v4985_v3 = vadd.f32 %v2759_v60, %v6139_v57  ;;  %v5001_v17 = vadd.f32 %v2830_v2, %v6143_v18 }
 0xbb6   :  { %v3804_v11 = vmul.f32 -1.442695, %v4984_v13 }
 0xbb7   :  { %v3805_v49 = vmul.f32 -1.442695, %v4985_v3  ;;  %v3806_v52 = vmul.f32 -1.442695, %v5001_v17 }
 0xbb8   :  { %5246 = vpow2.f32 %v3804_v11 }
 0xbb9   :  { %5248 = vpow2.f32 %v3805_v49 }
 0xbba   :  { %5250 = vpow2.f32 %v3806_v52 }
 0xbbb   :  { %5252 = vtanh.f32 %v5000_v32 }
 0xbc2   :  { %v5247_v15 = vpop.eup %5246 }
 0xbc3   :  { %v5249_v31 = vpop.eup %5248  ;;  %v2840_v36 = vadd.f32 1.0, %v5247_v15 }
 0xbc4   :  { %v2846_v44 = vadd.f32 1.0, %v5249_v31  ;;  %v5251_v55 = vpop.eup %5250 }
 0xbc5   :  { %5254 = vrcp.f32 %v2840_v36  ;;  %v5253_v62 = vpop.eup %5252  ;;  %v2853_v16 = vadd.f32 1.0, %v5251_v55 }
 0xbc6   :  { %5256 = vrcp.f32 %v2846_v44 }
 0xbc7   :  { %5258 = vrcp.f32 %v2853_v16 }
 0xbcf   :  { %v5255_v20 = vpop.eup %5254 }
 0xbd0   :  { %v5257_v38 = vpop.eup %5256  ;;  %v2857_v39 = vmul.f32 %v5255_v20, %v5253_v62 }
 0xbd1   :  { %v2856_v21 = vmul.f32 %v5257_v38, %v6194_v28  ;;  %v5259_v46 = vpop.eup %5258 }
 0xbd3   :  { %v6239_v23 = vadd.f32 %v2857_v39, %v2856_v21 }
 0xbd5   :  { %5260 = vtanh.f32 %v6239_v23 }
 0xbdf   :  { %v5261_v51 = vpop.eup %5260 }
 0xbe0   :  { %v2860_v61 = vmul.f32 %v5261_v51, %v5259_v46 }
 0xbe2   :  { %3807 = vst [vmem:[%s6432_s5 + $0x10] sm:$0xff] %v2860_v61  ;;  %2932 = vmatmul.mubr.f32.vlgmr.msra.gmra.mrb[22].mxu0 %v2860_v61  ;;  %3003 = vmatmul.mubr.f32.vlgmr.msra.gmra.mrb[22].mxu1 %v2860_v61 }
 0xbe3   :  { %4727 = vmatpush1.bf16.msra.mxu0 %v5998_v25  ;;  %4759 = vmatpush1.bf16.msra.mxu1 %v6003_v5 }
 0xbe4   :  { %4729 = vmatprep.subr.bf16.mxu0 %v6008_v53  ;;  %4761 = vmatprep.subr.bf16.mxu1 %v6012_v12 }
 0xbe5   :  { %3107 = vmatprep.mubr.f32.mxu0 %v5418_v6  ;;  %3178 = vmatprep.mubr.f32.mxu1 %v5418_v6 }
 0xbe7   :  { %4731 = vmatpush1.bf16.msra.mxu0 %v6010_v9  ;;  %4763 = vmatpush1.bf16.msra.mxu1 %v6015_v29 }
 0xbe8   :  { %4733 = vmatprep.subr.bf16.mxu0 %v6020_v42  ;;  %4765 = vmatprep.subr.bf16.mxu1 %v6024_v27 }
 0xbeb   :  { %4735 = vmatpush1.bf16.msra.mxu0 %v6022_v26  ;;  %4767 = vmatpush1.bf16.msra.mxu1 %v6027_v35 }
 0xbec   :  { %4737 = vmatprep.subr.bf16.mxu0 %v6032_v50  ;;  %4769 = vmatprep.subr.bf16.mxu1 %v6036_v58 }
 0xbef   :  { %4739 = vmatpush1.bf16.msra.mxu0 %v6034_v47  ;;  %4771 = vmatpush1.bf16.msra.mxu1 %v6039_v1 }
 0xbf0   :  { %4741 = vmatprep.subr.bf16.mxu0 %v6043_v14  ;;  %4773 = vmatprep.subr.bf16.mxu1 %v6048_v10 }
 0xbf3   :  { %4743 = vmatpush1.bf16.msra.mxu0 %v6045_v59  ;;  %4775 = vmatpush1.bf16.msra.mxu1 %v6051_v22 }
 0xbf4   :  { %4745 = vmatprep.subr.bf16.mxu0 %v6053_v4  ;;  %4777 = vmatprep.subr.bf16.mxu1 %v6059_v43 }
 0xbf7   :  { %4747 = vmatpush1.bf16.msra.mxu0 %v6057_v37  ;;  %4779 = vmatpush1.bf16.msra.mxu1 %v6063_v63 }
 0xbf8   :  { %4749 = vmatprep.subr.bf16.mxu0 %v6065_v19  ;;  %4781 = vmatprep.subr.bf16.mxu1 %v6068_v41 }
 0xbfb   :  { %4751 = vmatpush1.bf16.msra.mxu0 %v6071_v34  ;;  %4783 = vmatpush1.bf16.msra.mxu1 %v6075_v40 }
 0xbfc   :  { %4753 = vmatprep.subr.bf16.mxu0 %v6077_v45  ;;  %4785 = vmatprep.subr.bf16.mxu1 %v6083_v48 }
 0xbff   :  { %4755 = vmatpush1.bf16.msra.mxu0 %v6085_v0  ;;  %4787 = vmatpush1.bf16.msra.mxu1 %v6088_v8 }
 0xc00   :  { %4789 = vmatprep.subr.bf16.mxu0 %v5996_v54  ;;  %4821 = vmatprep.subr.bf16.mxu1 %v6000_v30 }
 0xcb5   :  { %v2933_v28 = vpop.f32.mrb[22].mxu0  ;;  %v3004_v33 = vpop.f32.mrb[22].mxu1 }
 0xcb6   :  { %v4986_v7 = vadd.f32 %v2933_v28, %v6137_v56  ;;  %v2935_v13 = vpop.f32.mrb[23].mxu0  ;;  %v3006_v60 = vpop.f32.mrb[23].mxu1  ;;  %v5002_v52 = vadd.f32 %v3004_v33, %v6146_v24 }
 0xcb7   :  { %v4987_v2 = vadd.f32 %v2935_v13, %v6139_v57  ;;  %v5003_v49 = vadd.f32 %v3006_v60, %v6143_v18 }
 0xcb8   :  { %v3808_v3 = vmul.f32 -1.442695, %v4986_v7 }
 0xcb9   :  { %v3809_v11 = vmul.f32 -1.442695, %v4987_v2  ;;  %v3810_v17 = vmul.f32 -1.442695, %v5003_v49 }
 0xcba   :  { %5262 = vpow2.f32 %v3808_v3 }
 0xcbb   :  { %5264 = vpow2.f32 %v3809_v11 }
 0xcbc   :  { %5266 = vpow2.f32 %v3810_v17 }
 0xcbd   :  { %5268 = vtanh.f32 %v5002_v52 }
 0xcc4   :  { %v5263_v32 = vpop.eup %5262 }
 0xcc5   :  { %v5265_v15 = vpop.eup %5264  ;;  %v3016_v31 = vadd.f32 1.0, %v5263_v32 }
 0xcc6   :  { %v3022_v36 = vadd.f32 1.0, %v5265_v15  ;;  %v5267_v44 = vpop.eup %5266 }
 0xcc7   :  { %5270 = vrcp.f32 %v3016_v31  ;;  %v5269_v55 = vpop.eup %5268  ;;  %v3029_v39 = vadd.f32 1.0, %v5267_v44 }
 0xcc8   :  { %5272 = vrcp.f32 %v3022_v36 }
 0xcc9   :  { %5274 = vrcp.f32 %v3029_v39 }
 0xcd1   :  { %v5271_v62 = vpop.eup %5270 }
 0xcd2   :  { %v5273_v20 = vpop.eup %5272  ;;  %v3033_v38 = vmul.f32 %v5271_v62, %v5269_v55 }
 0xcd3   :  { %v3032_v16 = vmul.f32 %v5273_v20, %v6239_v23  ;;  %v5275_v46 = vpop.eup %5274 }
 0xcd5   :  { %v6284_v21 = vadd.f32 %v3033_v38, %v3032_v16 }
 0xcd7   :  { %5276 = vtanh.f32 %v6284_v21 }
 0xce1   :  { %v5277_v51 = vpop.eup %5276 }
 0xce2   :  { %v3036_v61 = vmul.f32 %v5277_v51, %v5275_v46 }
 0xce4   :  { %3811 = vst [vmem:[%s6432_s5 + $0x18] sm:$0xff] %v3036_v61  ;;  %3108 = vmatmul.mubr.f32.vlgmr.msra.gmra.mrb[24].mxu0 %v3036_v61  ;;  %3179 = vmatmul.mubr.f32.vlgmr.msra.gmra.mrb[24].mxu1 %v3036_v61 }
 0xce5   :  { %4791 = vmatpush1.bf16.msra.mxu0 %v5998_v25  ;;  %4823 = vmatpush1.bf16.msra.mxu1 %v6003_v5 }
 0xce6   :  { %4793 = vmatprep.subr.bf16.mxu0 %v6008_v53  ;;  %4825 = vmatprep.subr.bf16.mxu1 %v6012_v12 }
 0xce7   :  { %3283 = vmatprep.mubr.f32.mxu0 %v5418_v6  ;;  %3354 = vmatprep.mubr.f32.mxu1 %v5418_v6 }
 0xce9   :  { %4795 = vmatpush1.bf16.msra.mxu0 %v6010_v9  ;;  %4827 = vmatpush1.bf16.msra.mxu1 %v6015_v29 }
 0xcea   :  { %4797 = vmatprep.subr.bf16.mxu0 %v6020_v42  ;;  %4829 = vmatprep.subr.bf16.mxu1 %v6024_v27 }
 0xced   :  { %4799 = vmatpush1.bf16.msra.mxu0 %v6022_v26  ;;  %4831 = vmatpush1.bf16.msra.mxu1 %v6027_v35 }
 0xcee   :  { %4801 = vmatprep.subr.bf16.mxu0 %v6032_v50  ;;  %4833 = vmatprep.subr.bf16.mxu1 %v6036_v58 }
 0xcf1   :  { %4803 = vmatpush1.bf16.msra.mxu0 %v6034_v47  ;;  %4835 = vmatpush1.bf16.msra.mxu1 %v6039_v1 }
 0xcf2   :  { %4805 = vmatprep.subr.bf16.mxu0 %v6043_v14  ;;  %4837 = vmatprep.subr.bf16.mxu1 %v6048_v10 }
 0xcf5   :  { %4807 = vmatpush1.bf16.msra.mxu0 %v6045_v59  ;;  %4839 = vmatpush1.bf16.msra.mxu1 %v6051_v22 }
 0xcf6   :  { %4809 = vmatprep.subr.bf16.mxu0 %v6053_v4  ;;  %4841 = vmatprep.subr.bf16.mxu1 %v6059_v43 }
 0xcf9   :  { %4811 = vmatpush1.bf16.msra.mxu0 %v6057_v37  ;;  %4843 = vmatpush1.bf16.msra.mxu1 %v6063_v63 }
 0xcfa   :  { %4813 = vmatprep.subr.bf16.mxu0 %v6065_v19  ;;  %4845 = vmatprep.subr.bf16.mxu1 %v6068_v41 }
 0xcfd   :  { %4815 = vmatpush1.bf16.msra.mxu0 %v6071_v34  ;;  %4847 = vmatpush1.bf16.msra.mxu1 %v6075_v40 }
 0xcfe   :  { %4817 = vmatprep.subr.bf16.mxu0 %v6077_v45  ;;  %4849 = vmatprep.subr.bf16.mxu1 %v6083_v48 }
 0xd01   :  { %4819 = vmatpush1.bf16.msra.mxu0 %v6085_v0  ;;  %4851 = vmatpush1.bf16.msra.mxu1 %v6088_v8 }
 0xd02   :  { %4853 = vmatprep.subr.bf16.mxu0 %v5996_v54  ;;  %4885 = vmatprep.subr.bf16.mxu1 %v6000_v30 }
 0xdb7   :  { %v3109_v23 = vpop.f32.mrb[24].mxu0  ;;  %v3180_v28 = vpop.f32.mrb[24].mxu1 }
 0xdb8   :  { %v4988_v33 = vadd.f32 %v3109_v23, %v6137_v56  ;;  %v3111_v7 = vpop.f32.mrb[25].mxu0  ;;  %v3182_v13 = vpop.f32.mrb[25].mxu1  ;;  %v5004_v17 = vadd.f32 %v3180_v28, %v6146_v24 }
 0xdb9   :  { %v4989_v60 = vadd.f32 %v3111_v7, %v6139_v57  ;;  %v5005_v11 = vadd.f32 %v3182_v13, %v6143_v18 }
 0xdba   :  { %v3812_v2 = vmul.f32 -1.442695, %v4988_v33 }
 0xdbb   :  { %v3813_v3 = vmul.f32 -1.442695, %v4989_v60  ;;  %v3814_v49 = vmul.f32 -1.442695, %v5005_v11 }
 0xdbc   :  { %5278 = vpow2.f32 %v3812_v2 }
 0xdbd   :  { %5280 = vpow2.f32 %v3813_v3 }
 0xdbe   :  { %5282 = vpow2.f32 %v3814_v49 }
 0xdbf   :  { %5284 = vtanh.f32 %v5004_v17 }
 0xdc6   :  { %v5279_v52 = vpop.eup %5278 }
 0xdc7   :  { %v5281_v32 = vpop.eup %5280  ;;  %v3192_v15 = vadd.f32 1.0, %v5279_v52 }
 0xdc8   :  { %v3198_v31 = vadd.f32 1.0, %v5281_v32  ;;  %v5283_v36 = vpop.eup %5282 }
 0xdc9   :  { %5286 = vrcp.f32 %v3192_v15  ;;  %v5285_v44 = vpop.eup %5284  ;;  %v3205_v38 = vadd.f32 1.0, %v5283_v36 }
 0xdca   :  { %5288 = vrcp.f32 %v3198_v31 }
 0xdcb   :  { %5290 = vrcp.f32 %v3205_v38 }
 0xdd3   :  { %v5287_v55 = vpop.eup %5286 }
 0xdd4   :  { %v5289_v62 = vpop.eup %5288  ;;  %v3209_v20 = vmul.f32 %v5287_v55, %v5285_v44 }
 0xdd5   :  { %v3208_v39 = vmul.f32 %v5289_v62, %v6284_v21  ;;  %v5291_v46 = vpop.eup %5290 }
 0xdd7   :  { %v6329_v16 = vadd.f32 %v3209_v20, %v3208_v39 }
 0xdd9   :  { %5292 = vtanh.f32 %v6329_v16 }
 0xde3   :  { %v5293_v51 = vpop.eup %5292 }
 0xde4   :  { %v3212_v61 = vmul.f32 %v5293_v51, %v5291_v46 }
 0xde6   :  { %3815 = vst [vmem:[%s6432_s5 + $0x20] sm:$0xff] %v3212_v61  ;;  %3284 = vmatmul.mubr.f32.vlgmr.msra.gmra.mrb[26].mxu0 %v3212_v61  ;;  %3355 = vmatmul.mubr.f32.vlgmr.msra.gmra.mrb[26].mxu1 %v3212_v61 }
 0xde7   :  { %4855 = vmatpush1.bf16.msra.mxu0 %v5998_v25  ;;  %4887 = vmatpush1.bf16.msra.mxu1 %v6003_v5 }
 0xde8   :  { %4857 = vmatprep.subr.bf16.mxu0 %v6008_v53  ;;  %4889 = vmatprep.subr.bf16.mxu1 %v6012_v12 }
 0xde9   :  { %3459 = vmatprep.mubr.f32.mxu0 %v5418_v6  ;;  %3530 = vmatprep.mubr.f32.mxu1 %v5418_v6 }
 0xdeb   :  { %4859 = vmatpush1.bf16.msra.mxu0 %v6010_v9  ;;  %4891 = vmatpush1.bf16.msra.mxu1 %v6015_v29 }
 0xdec   :  { %4861 = vmatprep.subr.bf16.mxu0 %v6020_v42  ;;  %4893 = vmatprep.subr.bf16.mxu1 %v6024_v27 }
 0xdef   :  { %4863 = vmatpush1.bf16.msra.mxu0 %v6022_v26  ;;  %4895 = vmatpush1.bf16.msra.mxu1 %v6027_v35 }
 0xdf0   :  { %4865 = vmatprep.subr.bf16.mxu0 %v6032_v50  ;;  %4897 = vmatprep.subr.bf16.mxu1 %v6036_v58 }
 0xdf3   :  { %4867 = vmatpush1.bf16.msra.mxu0 %v6034_v47  ;;  %4899 = vmatpush1.bf16.msra.mxu1 %v6039_v1 }
 0xdf4   :  { %4869 = vmatprep.subr.bf16.mxu0 %v6043_v14  ;;  %4901 = vmatprep.subr.bf16.mxu1 %v6048_v10 }
 0xdf7   :  { %4871 = vmatpush1.bf16.msra.mxu0 %v6045_v59  ;;  %4903 = vmatpush1.bf16.msra.mxu1 %v6051_v22 }
 0xdf8   :  { %4873 = vmatprep.subr.bf16.mxu0 %v6053_v4  ;;  %4905 = vmatprep.subr.bf16.mxu1 %v6059_v43 }
 0xdfb   :  { %4875 = vmatpush1.bf16.msra.mxu0 %v6057_v37  ;;  %4907 = vmatpush1.bf16.msra.mxu1 %v6063_v63 }
 0xdfc   :  { %4877 = vmatprep.subr.bf16.mxu0 %v6065_v19  ;;  %4909 = vmatprep.subr.bf16.mxu1 %v6068_v41 }
 0xdff   :  { %4879 = vmatpush1.bf16.msra.mxu0 %v6071_v34  ;;  %4911 = vmatpush1.bf16.msra.mxu1 %v6075_v40 }
 0xe00   :  { %4881 = vmatprep.subr.bf16.mxu0 %v6077_v45  ;;  %4913 = vmatprep.subr.bf16.mxu1 %v6083_v48 }
 0xe03   :  { %4883 = vmatpush1.bf16.msra.mxu0 %v6085_v0  ;;  %4915 = vmatpush1.bf16.msra.mxu1 %v6088_v8 }
 0xe04   :  { %4917 = vmatprep.subr.bf16.mxu0 %v5996_v54  ;;  %4949 = vmatprep.subr.bf16.mxu1 %v6000_v30 }
 0xeb9   :  { %v3285_v21 = vpop.f32.mrb[26].mxu0  ;;  %v3356_v23 = vpop.f32.mrb[26].mxu1 }
 0xeba   :  { %v4990_v28 = vadd.f32 %v3285_v21, %v6137_v56  ;;  %v3287_v33 = vpop.f32.mrb[27].mxu0  ;;  %v3358_v7 = vpop.f32.mrb[27].mxu1  ;;  %v5006_v49 = vadd.f32 %v3356_v23, %v6146_v24 }
 0xebb   :  { %v4991_v13 = vadd.f32 %v3287_v33, %v6139_v57  ;;  %v5007_v3 = vadd.f32 %v3358_v7, %v6143_v18 }
 0xebc   :  { %v3816_v60 = vmul.f32 -1.442695, %v4990_v28 }
 0xebd   :  { %v3817_v2 = vmul.f32 -1.442695, %v4991_v13  ;;  %v3818_v11 = vmul.f32 -1.442695, %v5007_v3 }
 0xebe   :  { %5294 = vpow2.f32 %v3816_v60 }
 0xebf   :  { %5296 = vpow2.f32 %v3817_v2 }
 0xec0   :  { %5298 = vpow2.f32 %v3818_v11 }
 0xec1   :  { %5300 = vtanh.f32 %v5006_v49 }
 0xec8   :  { %v5295_v54 = vpop.eup %5294 }
 0xec9   :  { %v5297_v17 = vpop.eup %5296  ;;  %v3368_v30 = vadd.f32 1.0, %v5295_v54 }
 0xeca   :  { %v3374_v52 = vadd.f32 1.0, %v5297_v17  ;;  %v5299_v32 = vpop.eup %5298 }
 0xecb   :  { %5302 = vrcp.f32 %v3368_v30  ;;  %v5301_v15 = vpop.eup %5300  ;;  %v3381_v55 = vadd.f32 1.0, %v5299_v32 }
 0xecc   :  { %5304 = vrcp.f32 %v3374_v52 }
 0xecd   :  { %5306 = vrcp.f32 %v3381_v55 }
 0xed5   :  { %v5303_v31 = vpop.eup %5302 }
 0xed6   :  { %v5305_v36 = vpop.eup %5304  ;;  %v3385_v44 = vmul.f32 %v5303_v31, %v5301_v15 }
 0xed7   :  { %v3384_v62 = vmul.f32 %v5305_v36, %v6329_v16  ;;  %v5307_v38 = vpop.eup %5306 }
 0xed9   :  { %v6374_v20 = vadd.f32 %v3385_v44, %v3384_v62 }
 0xedb   :  { %5308 = vtanh.f32 %v6374_v20 }
 0xee5   :  { %v5309_v39 = vpop.eup %5308 }
 0xee6   :  { %v3388_v46 = vmul.f32 %v5309_v39, %v5307_v38 }
 0xee8   :  { %3819 = vst [vmem:[%s6432_s5 + $0x28] sm:$0xff] %v3388_v46  ;;  %3460 = vmatmul.mubr.f32.vlgmr.msra.gmra.mrb[28].mxu0 %v3388_v46  ;;  %3531 = vmatmul.mubr.f32.vlgmr.msra.gmra.mrb[28].mxu1 %v3388_v46 }
 0xee9   :  { %4919 = vmatpush1.bf16.msra.mxu0 %v5998_v25  ;;  %4951 = vmatpush1.bf16.msra.mxu1 %v6003_v5 }
 0xeea   :  { %4921 = vmatprep.subr.bf16.mxu0 %v6008_v53  ;;  %4953 = vmatprep.subr.bf16.mxu1 %v6012_v12 }
 0xeeb   :  { %3635 = vmatprep.mubr.f32.mxu0 %v5418_v6  ;;  %3706 = vmatprep.mubr.f32.mxu1 %v5418_v6 }
 0xeed   :  { %4923 = vmatpush1.bf16.msra.mxu0 %v6010_v9  ;;  %4955 = vmatpush1.bf16.msra.mxu1 %v6015_v29 }
 0xeee   :  { %4925 = vmatprep.subr.bf16.mxu0 %v6020_v42  ;;  %4957 = vmatprep.subr.bf16.mxu1 %v6024_v27 }
 0xef1   :  { %4927 = vmatpush1.bf16.msra.mxu0 %v6022_v26  ;;  %4959 = vmatpush1.bf16.msra.mxu1 %v6027_v35 }
 0xef2   :  { %4929 = vmatprep.subr.bf16.mxu0 %v6032_v50  ;;  %4961 = vmatprep.subr.bf16.mxu1 %v6036_v58 }
 0xef5   :  { %4931 = vmatpush1.bf16.msra.mxu0 %v6034_v47  ;;  %4963 = vmatpush1.bf16.msra.mxu1 %v6039_v1 }
 0xef6   :  { %4933 = vmatprep.subr.bf16.mxu0 %v6043_v14  ;;  %4965 = vmatprep.subr.bf16.mxu1 %v6048_v10 }
 0xef9   :  { %4935 = vmatpush1.bf16.msra.mxu0 %v6045_v59  ;;  %4967 = vmatpush1.bf16.msra.mxu1 %v6051_v22 }
 0xefa   :  { %4937 = vmatprep.subr.bf16.mxu0 %v6053_v4  ;;  %4969 = vmatprep.subr.bf16.mxu1 %v6059_v43 }
 0xefd   :  { %4939 = vmatpush1.bf16.msra.mxu0 %v6057_v37  ;;  %4971 = vmatpush1.bf16.msra.mxu1 %v6063_v63 }
 0xefe   :  { %4941 = vmatprep.subr.bf16.mxu0 %v6065_v19  ;;  %4973 = vmatprep.subr.bf16.mxu1 %v6068_v41 }
 0xf01   :  { %4943 = vmatpush1.bf16.msra.mxu0 %v6071_v34  ;;  %4975 = vmatpush1.bf16.msra.mxu1 %v6075_v40 }
 0xf02   :  { %4945 = vmatprep.subr.bf16.mxu0 %v6077_v45  ;;  %4977 = vmatprep.subr.bf16.mxu1 %v6083_v48 }
 0xf05   :  { %4947 = vmatpush1.bf16.msra.mxu0 %v6085_v0  ;;  %4979 = vmatpush1.bf16.msra.mxu1 %v6088_v8 }
 0xfbb   :  { %v3461_v6 = vpop.f32.mrb[28].mxu0  ;;  %v3532_v25 = vpop.f32.mrb[28].mxu1 }
 0xfbc   :  { %v4992_v5 = vadd.f32 %v3461_v6, %v6137_v56  ;;  %v3463_v53 = vpop.f32.mrb[29].mxu0  ;;  %v3534_v9 = vpop.f32.mrb[29].mxu1  ;;  %v5008_v35 = vadd.f32 %v3532_v25, %v6146_v24 }
 0xfbd   :  { %v4993_v12 = vadd.f32 %v3463_v53, %v6139_v57  ;;  %v5009_v26 = vadd.f32 %v3534_v9, %v6143_v18 }
 0xfbe   :  { %v3820_v29 = vmul.f32 -1.442695, %v4992_v5 }
 0xfbf   :  { %v3821_v42 = vmul.f32 -1.442695, %v4993_v12  ;;  %v3822_v27 = vmul.f32 -1.442695, %v5009_v26 }
 0xfc0   :  { %5310 = vpow2.f32 %v3820_v29 }
 0xfc1   :  { %5312 = vpow2.f32 %v3821_v42 }
 0xfc2   :  { %5314 = vpow2.f32 %v3822_v27 }
 0xfc3   :  { %5316 = vtanh.f32 %v5008_v35 }
 0xfca   :  { %v5311_v50 = vpop.eup %5310 }
 0xfcb   :  { %v5313_v47 = vpop.eup %5312  ;;  %v3544_v58 = vadd.f32 1.0, %v5311_v50 }
 0xfcc   :  { %v3550_v1 = vadd.f32 1.0, %v5313_v47  ;;  %v5315_v14 = vpop.eup %5314 }
 0xfcd   :  { %5318 = vrcp.f32 %v3544_v58  ;;  %v5317_v59 = vpop.eup %5316  ;;  %v3557_v37 = vadd.f32 1.0, %v5315_v14 }
 0xfce   :  { %5320 = vrcp.f32 %v3550_v1 }
 0xfcf   :  { %5322 = vrcp.f32 %v3557_v37 }
 0xfd7   :  { %v5319_v10 = vpop.eup %5318 }
 0xfd8   :  { %v5321_v22 = vpop.eup %5320  ;;  %v3561_v4 = vmul.f32 %v5319_v10, %v5317_v59 }
 0xfd9   :  { %v3560_v43 = vmul.f32 %v5321_v22, %v6374_v20  ;;  %v5323_v19 = vpop.eup %5322 }
 0xfdb   :  { %v3562_v63 = vadd.f32 %v3561_v4, %v3560_v43 }
 0xfdd   :  { %5324 = vtanh.f32 %v3562_v63 }
 0xfe7   :  { %v5325_v41 = vpop.eup %5324 }
 0xfe8   :  { %v3564_v34 = vmul.f32 %v5325_v41, %v5323_v19 }
 0xfea   :  { %3823 = vst [vmem:[%s6432_s5 + $0x30] sm:$0xff] %v3564_v34  ;;  %3636 = vmatmul.mubr.f32.vlgmr.msra.gmra.mrb[30].mxu0 %v3564_v34  ;;  %3707 = vmatmul.mubr.f32.vlgmr.msra.gmra.mrb[30].mxu1 %v3564_v34 }
0x10bd   :  { %v3637_v40 = vpop.f32.mrb[30].mxu0  ;;  %v3708_v45 = vpop.f32.mrb[30].mxu1 }
0x10be   :  { %v4994_v48 = vadd.f32 %v3637_v40, %v6137_v56  ;;  %v3639_v0 = vpop.f32.mrb[31].mxu0  ;;  %v3710_v8 = vpop.f32.mrb[31].mxu1  ;;  %v5010_v28 = vadd.f32 %v3708_v45, %v6146_v24 }
0x10bf   :  { %v4995_v16 = vadd.f32 %v3639_v0, %v6139_v57  ;;  %v5011_v21 = vadd.f32 %v3710_v8, %v6143_v18 }
0x10c0   :  { %v3824_v51 = vmul.f32 -1.442695, %v4994_v48 }
0x10c1   :  { %v3825_v61 = vmul.f32 -1.442695, %v4995_v16  ;;  %v3826_v23 = vmul.f32 -1.442695, %v5011_v21 }
0x10c2   :  { %5326 = vpow2.f32 %v3824_v51 }
0x10c3   :  { %5328 = vpow2.f32 %v3825_v61 }
0x10c4   :  { %5330 = vpow2.f32 %v3826_v23 }
0x10c5   :  { %5332 = vtanh.f32 %v5010_v28 }
0x10cc   :  { %v5327_v33 = vpop.eup %5326 }
0x10cd   :  { %v5329_v7 = vpop.eup %5328  ;;  %v3720_v13 = vadd.f32 1.0, %v5327_v33 }
0x10ce   :  { %v3726_v60 = vadd.f32 1.0, %v5329_v7  ;;  %v5331_v56 = vpop.eup %5330 }
0x10cf   :  { %5334 = vrcp.f32 %v3720_v13  ;;  %v5333_v2 = vpop.eup %5332  ;;  %v3733_v49 = vadd.f32 1.0, %v5331_v56 }
0x10d0   :  { %5336 = vrcp.f32 %v3726_v60 }
0x10d1   :  { %5338 = vrcp.f32 %v3733_v49 }
0x10d9   :  { %v5335_v57 = vpop.eup %5334 }
0x10da   :  { %v5337_v3 = vpop.eup %5336  ;;  %v3737_v11 = vmul.f32 %v5335_v57, %v5333_v2 }
0x10db   :  { %v3736_v54 = vmul.f32 %v5337_v3, %v3562_v63  ;;  %v5339_v18 = vpop.eup %5338 }
0x10dd   :  { %v3738_v17 = vadd.f32 %v3737_v11, %v3736_v54 }
0x10df   :  { %5340 = vtanh.f32 %v3738_v17 }
0x10e9   :  { %v5341_v24 = vpop.eup %5340 }
0x10ea   :  { %v3740_v30 = vmul.f32 %v5341_v24, %v5339_v18 }
0x10ec   :  { %3827 = vst [vmem:[%s6432_s5 + $0x38] sm:$0xff] %v3740_v30 }
0x10ed   :  { %3747 = vsyncpa [#allocation5], 1 }
0x10ee   :  { %3748 = vsyncpa [#allocation7], 1 }

</bundles_post_ra>
